<compile_context>
chip_gen: v7x
topology: tpu7x:2x2x1
jax: 0.10.0
libtpu: 0.0.40
codegen_flags: <defaults>
</compile_context>

<pallas_src>
import functools

import numpy as np
import jax
import jax.numpy as jnp
from jax import lax
from jax.experimental import pallas as pl
from jax.experimental.pallas import tpu as pltpu


def _window_bounds(in_size, out_size):
    """Adaptive-pool windows: start = floor(i*I/O), end = ceil((i+1)*I/O). Static ints."""
    return tuple(
        ((i * in_size) // out_size,
         ((i + 1) * in_size + out_size - 1) // out_size)
        for i in range(out_size)
    )


def _pick_tb(B, H, W):
    """Plane-batch (lane tile) size under a VMEM budget; generation aware."""
    try:
        vmem = pltpu.get_tpu_info().vmem_capacity_bytes
    except Exception:
        vmem = 64 << 20  # assume the smallest generation (v7x) if we cannot query
    # input block is double-buffered and the kernel holds a few full-plane f32
    # temps, so keep a single block well under the scoped-VMEM default everywhere.
    budget = min(vmem // 8, 8 << 20)
    cap = max(1, budget // (2 * H * W * 4))
    if cap >= B:
        return B, B                       # whole channel axis in one lane-dense block
    tb = max(128, (cap // 128) * 128)     # lane tiles must be multiples of 128
    # TODO(synk): for very large H*W (where even TB=128 overshoots the budget) an
    # additional H-tiled accumulation pass would be needed.
    b_pad = ((B + tb - 1) // tb) * tb
    return tb, b_pad


def _pool_kernel(x_ref, o_ref, *, mode, oh, ow, h_bounds, w_bounds):
    """Pool one batch of TB planes held on the lane axis.

    x_ref: (2, H, W, TB) f32 -- [0]=real plane, [1]=imag plane.
    o_ref: (2, OH, OW, TB) f32
    """
    re = x_ref[0]                         # (H, W, TB)
    im = x_ref[1]

    if mode == 'absolute':
        # argmax(|x|) == argmax(re^2 + im^2): skip the sqrt entirely.
        score = re * re + im * im
    else:
        # 'magnitude' pools by x.real; 'conjugate' pools by conj(x).real == x.real.
        score = re

    # ---- pass 1: max over each W-window, carrying re/im (first-index tie-break) ----
    cols_re, cols_im, cols_sc = [], [], []
    for j in range(ow):
        ws, we = w_bounds[j]
        wl = we - ws
        s_win = score[:, ws:we, :]                                # (H, wl, TB)
        maxv = jnp.max(s_win, axis=1, keepdims=True)              # (H, 1, TB)
        iota = lax.broadcasted_iota(jnp.int32, s_win.shape, 1)
        idx = jnp.min(jnp.where(s_win == maxv, iota, wl), axis=1, keepdims=True)
        sel = iota == idx                                         # one-hot along wl
        cols_re.append(jnp.sum(jnp.where(sel, re[:, ws:we, :], 0.0), axis=1)[None])
        cols_im.append(jnp.sum(jnp.where(sel, im[:, ws:we, :], 0.0), axis=1)[None])
        cols_sc.append(maxv[:, 0, :][None])
    re1 = jnp.concatenate(cols_re, axis=0)                        # (OW, H, TB)
    im1 = jnp.concatenate(cols_im, axis=0)
    sc1 = jnp.concatenate(cols_sc, axis=0)

    # ---- pass 2: max over each H-window of the column-reduced planes ----
    rows_re, rows_im = [], []
    for i in range(oh):
        hs, he = h_bounds[i]
        hl = he - hs
        s_win = sc1[:, hs:he, :]                                  # (OW, hl, TB)
        maxv = jnp.max(s_win, axis=1, keepdims=True)
        iota = lax.broadcasted_iota(jnp.int32, s_win.shape, 1)
        idx = jnp.min(jnp.where(s_win == maxv, iota, hl), axis=1, keepdims=True)
        sel = iota == idx
        rows_re.append(jnp.sum(jnp.where(sel, re1[:, hs:he, :], 0.0), axis=1)[None])
        rows_im.append(jnp.sum(jnp.where(sel, im1[:, hs:he, :], 0.0), axis=1)[None])

    o_ref[0] = jnp.concatenate(rows_re, axis=0)                   # (OH, OW, TB)
    o_ref[1] = jnp.concatenate(rows_im, axis=0)


def complex_adaptive_max_pool2d(x, output_size, mode='absolute'):
    assert mode in ('magnitude', 'conjugate', 'absolute')
    if isinstance(output_size, int):
        output_size = (output_size, output_size)
    oh, ow = output_size

    input_dtype = x.dtype
    xc = x.astype(jnp.complex64)
    N, C, H, W = xc.shape
    B = N * C

    # channel-in-lane layout: (2, H, W, B); real/imag stacked so each grid step
    # issues a single input DMA.
    re = jnp.real(xc).astype(jnp.float32).reshape(B, H, W)
    im = jnp.imag(xc).astype(jnp.float32).reshape(B, H, W)
    xr = jnp.transpose(jnp.stack([re, im], axis=0), (0, 2, 3, 1))  # (2, H, W, B)

    TB, B_pad = _pick_tb(B, H, W)
    if B_pad != B:
        xr = jnp.pad(xr, ((0, 0), (0, 0), (0, 0), (0, B_pad - B)))

    h_bounds = _window_bounds(H, oh)
    w_bounds = _window_bounds(W, ow)

    kernel = functools.partial(_pool_kernel, mode=mode, oh=oh, ow=ow,
                               h_bounds=h_bounds, w_bounds=w_bounds)

    out = pl.pallas_call(
        kernel,
        out_shape=jax.ShapeDtypeStruct((2, oh, ow, B_pad), jnp.float32),
        grid_spec=pltpu.PrefetchScalarGridSpec(
            num_scalar_prefetch=0,
            grid=(B_pad // TB,),
            in_specs=[pl.BlockSpec((2, H, W, TB), lambda b: (0, 0, 0, b))],
            out_specs=pl.BlockSpec((2, oh, ow, TB), lambda b: (0, 0, 0, b)),
        ),
        compiler_params=pltpu.CompilerParams(
            dimension_semantics=("parallel",)),  # independent steps -> megacore on v7x
    )(xr)

    out = out[..., :B]                                            # drop lane padding
    out_re = jnp.transpose(out[0], (2, 0, 1)).reshape(N, C, oh, ow)
    out_im = jnp.transpose(out[1], (2, 0, 1)).reshape(N, C, oh, ow)

    if jnp.issubdtype(input_dtype, jnp.complexfloating):
        return (out_re + 1j * out_im).astype(input_dtype)
    # torch .type(real_dtype) on a complex tensor keeps the real part
    return out_re.astype(input_dtype)


def _reference(x, output_size, mode):
    """Pure-numpy reference matching torch adaptive_max_pool2d + gather."""
    x = np.asarray(x).astype(np.complex64)
    N, C, H, W = x.shape
    oh, ow = output_size
    out = np.zeros((N, C, oh, ow), dtype=np.complex64)
    for n in range(N):
        for c in range(C):
            img = x[n, c]
            score = np.abs(img) if mode == 'absolute' else img.real
            for i in range(oh):
                hs, he = (i * H) // oh, -(-((i + 1) * H) // oh)
                for j in range(ow):
                    ws, we = (j * W) // ow, -(-((j + 1) * W) // ow)
                    win = score[hs:he, ws:we]
                    r, cc = np.unravel_index(np.argmax(win), win.shape)
                    out[n, c, i, j] = img[hs + r, ws + cc]
    return out


if __name__ == "__main__":
    key = jax.random.PRNGKey(0)
    kr, ki = jax.random.split(key)
    N, C, H, W = 2, 4, 16, 16
    output_size = (5, 3)   # non-divisible on purpose: exercises overlapping adaptive windows

    x = (jax.random.normal(kr, (N, C, H, W), dtype=jnp.float32)
         + 1j * jax.random.normal(ki, (N, C, H, W), dtype=jnp.float32)
         ).astype(jnp.complex64)

    for mode in ('absolute', 'magnitude', 'conjugate'):
        out = complex_adaptive_max_pool2d(x, output_size, mode=mode)
        out = jax.block_until_ready(out)
        ref = _reference(np.asarray(x), output_size, mode)
        assert out.shape == (N, C) + output_size and out.dtype == jnp.complex64
        np.testing.assert_allclose(np.asarray(out), ref, rtol=1e-5, atol=1e-5)

    print("KERNEL_OK")
</pallas_src>

<mosaic_0001>
module attributes {stable_mosaic.version = 11 : i64} {
  func.func @_pool_kernel(%arg0: i32, %arg1: memref<2x16x16x8xf32, #tpu.memory_space<vmem>>, %arg2: memref<2x5x3x8xf32, #tpu.memory_space<vmem>>) attributes {dimension_semantics = [#tpu.dimension_semantics<parallel>], iteration_bounds = array<i64: 1>, scalar_prefetch = 0 : i64, scratch_operands = 0 : i64, tpu.core_type = #tpu.core_type<tc>, window_params = [{transform_indices = @transform_0, window_bounds = array<i64: 2, 16, 16, 8>}, {transform_indices = @transform_1, window_bounds = array<i64: 2, 5, 3, 8>}]} {
    %c0 = arith.constant 0 : index
    %c0_0 = arith.constant 0 : index
    %c0_1 = arith.constant 0 : index
    %c0_2 = arith.constant 0 : index
    %0 = vector.load %arg1[%c0, %c0_0, %c0_1, %c0_2] : memref<2x16x16x8xf32, #tpu.memory_space<vmem>>, vector<1x16x16x8xf32>
    %1 = vector.shape_cast %0 : vector<1x16x16x8xf32> to vector<16x16x8xf32>
    %c1 = arith.constant 1 : index
    %c0_3 = arith.constant 0 : index
    %c0_4 = arith.constant 0 : index
    %c0_5 = arith.constant 0 : index
    %2 = vector.load %arg1[%c1, %c0_3, %c0_4, %c0_5] : memref<2x16x16x8xf32, #tpu.memory_space<vmem>>, vector<1x16x16x8xf32>
    %3 = vector.shape_cast %2 : vector<1x16x16x8xf32> to vector<16x16x8xf32>
    %4 = arith.mulf %1, %1 : vector<16x16x8xf32>
    %5 = arith.mulf %3, %3 : vector<16x16x8xf32>
    %6 = arith.addf %4, %5 : vector<16x16x8xf32>
    %7 = vector.extract_strided_slice %6 {offsets = [0, 0, 0], sizes = [16, 6, 8], strides = [1, 1, 1]} : vector<16x16x8xf32> to vector<16x6x8xf32>
    %cst = arith.constant dense<0xFF800000> : vector<16x8xf32>
    %8 = vector.multi_reduction <maximumf>, %7, %cst [1] : vector<16x6x8xf32> to vector<16x8xf32>
    %9 = vector.shape_cast %8 : vector<16x8xf32> to vector<16x1x8xf32>
    %10 = tpu.iota {dimensions = array<i32: 1>} : vector<16x6x8xi32>
    %11 = vector.broadcast %9 : vector<16x1x8xf32> to vector<16x6x8xf32>
    %12 = arith.cmpf oeq, %7, %11 : vector<16x6x8xf32>
    %c6_i32 = arith.constant 6 : i32
    %13 = vector.broadcast %c6_i32 : i32 to vector<16x6x8xi32>
    %14 = arith.select %12, %10, %13 : vector<16x6x8xi1>, vector<16x6x8xi32>
    %cst_6 = arith.constant dense<2147483647> : vector<16x8xi32>
    %15 = vector.multi_reduction <minsi>, %14, %cst_6 [1] : vector<16x6x8xi32> to vector<16x8xi32>
    %16 = vector.shape_cast %15 : vector<16x8xi32> to vector<16x1x8xi32>
    %17 = vector.broadcast %16 : vector<16x1x8xi32> to vector<16x6x8xi32>
    %18 = arith.cmpi eq, %10, %17 : vector<16x6x8xi32>
    %19 = vector.extract_strided_slice %1 {offsets = [0, 0, 0], sizes = [16, 6, 8], strides = [1, 1, 1]} : vector<16x16x8xf32> to vector<16x6x8xf32>
    %cst_7 = arith.constant 0.000000e+00 : f32
    %20 = vector.broadcast %cst_7 : f32 to vector<16x6x8xf32>
    %21 = arith.select %18, %19, %20 : vector<16x6x8xi1>, vector<16x6x8xf32>
    %cst_8 = arith.constant dense<0.000000e+00> : vector<16x8xf32>
    %22 = vector.multi_reduction <add>, %21, %cst_8 [1] : vector<16x6x8xf32> to vector<16x8xf32>
    %23 = vector.shape_cast %22 : vector<16x8xf32> to vector<1x16x8xf32>
    %24 = vector.extract_strided_slice %3 {offsets = [0, 0, 0], sizes = [16, 6, 8], strides = [1, 1, 1]} : vector<16x16x8xf32> to vector<16x6x8xf32>
    %cst_9 = arith.constant 0.000000e+00 : f32
    %25 = vector.broadcast %cst_9 : f32 to vector<16x6x8xf32>
    %26 = arith.select %18, %24, %25 : vector<16x6x8xi1>, vector<16x6x8xf32>
    %cst_10 = arith.constant dense<0.000000e+00> : vector<16x8xf32>
    %27 = vector.multi_reduction <add>, %26, %cst_10 [1] : vector<16x6x8xf32> to vector<16x8xf32>
    %28 = vector.shape_cast %27 : vector<16x8xf32> to vector<1x16x8xf32>
    %29 = vector.shape_cast %9 : vector<16x1x8xf32> to vector<16x8xf32>
    %30 = vector.shape_cast %29 : vector<16x8xf32> to vector<1x16x8xf32>
    %31 = vector.extract_strided_slice %6 {offsets = [0, 5, 0], sizes = [16, 6, 8], strides = [1, 1, 1]} : vector<16x16x8xf32> to vector<16x6x8xf32>
    %cst_11 = arith.constant dense<0xFF800000> : vector<16x8xf32>
    %32 = vector.multi_reduction <maximumf>, %31, %cst_11 [1] : vector<16x6x8xf32> to vector<16x8xf32>
    %33 = vector.shape_cast %32 : vector<16x8xf32> to vector<16x1x8xf32>
    %34 = tpu.iota {dimensions = array<i32: 1>} : vector<16x6x8xi32>
    %35 = vector.broadcast %33 : vector<16x1x8xf32> to vector<16x6x8xf32>
    %36 = arith.cmpf oeq, %31, %35 : vector<16x6x8xf32>
    %c6_i32_12 = arith.constant 6 : i32
    %37 = vector.broadcast %c6_i32_12 : i32 to vector<16x6x8xi32>
    %38 = arith.select %36, %34, %37 : vector<16x6x8xi1>, vector<16x6x8xi32>
    %cst_13 = arith.constant dense<2147483647> : vector<16x8xi32>
    %39 = vector.multi_reduction <minsi>, %38, %cst_13 [1] : vector<16x6x8xi32> to vector<16x8xi32>
    %40 = vector.shape_cast %39 : vector<16x8xi32> to vector<16x1x8xi32>
    %41 = vector.broadcast %40 : vector<16x1x8xi32> to vector<16x6x8xi32>
    %42 = arith.cmpi eq, %34, %41 : vector<16x6x8xi32>
    %43 = vector.extract_strided_slice %1 {offsets = [0, 5, 0], sizes = [16, 6, 8], strides = [1, 1, 1]} : vector<16x16x8xf32> to vector<16x6x8xf32>
    %cst_14 = arith.constant 0.000000e+00 : f32
    %44 = vector.broadcast %cst_14 : f32 to vector<16x6x8xf32>
    %45 = arith.select %42, %43, %44 : vector<16x6x8xi1>, vector<16x6x8xf32>
    %cst_15 = arith.constant dense<0.000000e+00> : vector<16x8xf32>
    %46 = vector.multi_reduction <add>, %45, %cst_15 [1] : vector<16x6x8xf32> to vector<16x8xf32>
    %47 = vector.shape_cast %46 : vector<16x8xf32> to vector<1x16x8xf32>
    %48 = vector.extract_strided_slice %3 {offsets = [0, 5, 0], sizes = [16, 6, 8], strides = [1, 1, 1]} : vector<16x16x8xf32> to vector<16x6x8xf32>
    %cst_16 = arith.constant 0.000000e+00 : f32
    %49 = vector.broadcast %cst_16 : f32 to vector<16x6x8xf32>
    %50 = arith.select %42, %48, %49 : vector<16x6x8xi1>, vector<16x6x8xf32>
    %cst_17 = arith.constant dense<0.000000e+00> : vector<16x8xf32>
    %51 = vector.multi_reduction <add>, %50, %cst_17 [1] : vector<16x6x8xf32> to vector<16x8xf32>
    %52 = vector.shape_cast %51 : vector<16x8xf32> to vector<1x16x8xf32>
    %53 = vector.shape_cast %33 : vector<16x1x8xf32> to vector<16x8xf32>
    %54 = vector.shape_cast %53 : vector<16x8xf32> to vector<1x16x8xf32>
    %55 = vector.extract_strided_slice %6 {offsets = [0, 10, 0], sizes = [16, 6, 8], strides = [1, 1, 1]} : vector<16x16x8xf32> to vector<16x6x8xf32>
    %cst_18 = arith.constant dense<0xFF800000> : vector<16x8xf32>
    %56 = vector.multi_reduction <maximumf>, %55, %cst_18 [1] : vector<16x6x8xf32> to vector<16x8xf32>
    %57 = vector.shape_cast %56 : vector<16x8xf32> to vector<16x1x8xf32>
    %58 = tpu.iota {dimensions = array<i32: 1>} : vector<16x6x8xi32>
    %59 = vector.broadcast %57 : vector<16x1x8xf32> to vector<16x6x8xf32>
    %60 = arith.cmpf oeq, %55, %59 : vector<16x6x8xf32>
    %c6_i32_19 = arith.constant 6 : i32
    %61 = vector.broadcast %c6_i32_19 : i32 to vector<16x6x8xi32>
    %62 = arith.select %60, %58, %61 : vector<16x6x8xi1>, vector<16x6x8xi32>
    %cst_20 = arith.constant dense<2147483647> : vector<16x8xi32>
    %63 = vector.multi_reduction <minsi>, %62, %cst_20 [1] : vector<16x6x8xi32> to vector<16x8xi32>
    %64 = vector.shape_cast %63 : vector<16x8xi32> to vector<16x1x8xi32>
    %65 = vector.broadcast %64 : vector<16x1x8xi32> to vector<16x6x8xi32>
    %66 = arith.cmpi eq, %58, %65 : vector<16x6x8xi32>
    %67 = vector.extract_strided_slice %1 {offsets = [0, 10, 0], sizes = [16, 6, 8], strides = [1, 1, 1]} : vector<16x16x8xf32> to vector<16x6x8xf32>
    %cst_21 = arith.constant 0.000000e+00 : f32
    %68 = vector.broadcast %cst_21 : f32 to vector<16x6x8xf32>
    %69 = arith.select %66, %67, %68 : vector<16x6x8xi1>, vector<16x6x8xf32>
    %cst_22 = arith.constant dense<0.000000e+00> : vector<16x8xf32>
    %70 = vector.multi_reduction <add>, %69, %cst_22 [1] : vector<16x6x8xf32> to vector<16x8xf32>
    %71 = vector.shape_cast %70 : vector<16x8xf32> to vector<1x16x8xf32>
    %72 = vector.extract_strided_slice %3 {offsets = [0, 10, 0], sizes = [16, 6, 8], strides = [1, 1, 1]} : vector<16x16x8xf32> to vector<16x6x8xf32>
    %cst_23 = arith.constant 0.000000e+00 : f32
    %73 = vector.broadcast %cst_23 : f32 to vector<16x6x8xf32>
    %74 = arith.select %66, %72, %73 : vector<16x6x8xi1>, vector<16x6x8xf32>
    %cst_24 = arith.constant dense<0.000000e+00> : vector<16x8xf32>
    %75 = vector.multi_reduction <add>, %74, %cst_24 [1] : vector<16x6x8xf32> to vector<16x8xf32>
    %76 = vector.shape_cast %75 : vector<16x8xf32> to vector<1x16x8xf32>
    %77 = vector.shape_cast %57 : vector<16x1x8xf32> to vector<16x8xf32>
    %78 = vector.shape_cast %77 : vector<16x8xf32> to vector<1x16x8xf32>
    %79 = tpu.concatenate %23, %47, %71 in 0 : vector<1x16x8xf32>, vector<1x16x8xf32>, vector<1x16x8xf32> -> vector<3x16x8xf32>
    %80 = tpu.concatenate %28, %52, %76 in 0 : vector<1x16x8xf32>, vector<1x16x8xf32>, vector<1x16x8xf32> -> vector<3x16x8xf32>
    %81 = tpu.concatenate %30, %54, %78 in 0 : vector<1x16x8xf32>, vector<1x16x8xf32>, vector<1x16x8xf32> -> vector<3x16x8xf32>
    %82 = vector.extract_strided_slice %81 {offsets = [0, 0, 0], sizes = [3, 4, 8], strides = [1, 1, 1]} : vector<3x16x8xf32> to vector<3x4x8xf32>
    %cst_25 = arith.constant dense<0xFF800000> : vector<3x8xf32>
    %83 = vector.multi_reduction <maximumf>, %82, %cst_25 [1] : vector<3x4x8xf32> to vector<3x8xf32>
    %84 = vector.shape_cast %83 : vector<3x8xf32> to vector<3x1x8xf32>
    %85 = tpu.iota {dimensions = array<i32: 1>} : vector<3x4x8xi32>
    %86 = vector.broadcast %84 : vector<3x1x8xf32> to vector<3x4x8xf32>
    %87 = arith.cmpf oeq, %82, %86 : vector<3x4x8xf32>
    %c4_i32 = arith.constant 4 : i32
    %88 = vector.broadcast %c4_i32 : i32 to vector<3x4x8xi32>
    %89 = arith.select %87, %85, %88 : vector<3x4x8xi1>, vector<3x4x8xi32>
    %cst_26 = arith.constant dense<2147483647> : vector<3x8xi32>
    %90 = vector.multi_reduction <minsi>, %89, %cst_26 [1] : vector<3x4x8xi32> to vector<3x8xi32>
    %91 = vector.shape_cast %90 : vector<3x8xi32> to vector<3x1x8xi32>
    %92 = vector.broadcast %91 : vector<3x1x8xi32> to vector<3x4x8xi32>
    %93 = arith.cmpi eq, %85, %92 : vector<3x4x8xi32>
    %94 = vector.extract_strided_slice %79 {offsets = [0, 0, 0], sizes = [3, 4, 8], strides = [1, 1, 1]} : vector<3x16x8xf32> to vector<3x4x8xf32>
    %cst_27 = arith.constant 0.000000e+00 : f32
    %95 = vector.broadcast %cst_27 : f32 to vector<3x4x8xf32>
    %96 = arith.select %93, %94, %95 : vector<3x4x8xi1>, vector<3x4x8xf32>
    %cst_28 = arith.constant dense<0.000000e+00> : vector<3x8xf32>
    %97 = vector.multi_reduction <add>, %96, %cst_28 [1] : vector<3x4x8xf32> to vector<3x8xf32>
    %98 = vector.shape_cast %97 : vector<3x8xf32> to vector<1x3x8xf32>
    %99 = vector.extract_strided_slice %80 {offsets = [0, 0, 0], sizes = [3, 4, 8], strides = [1, 1, 1]} : vector<3x16x8xf32> to vector<3x4x8xf32>
    %cst_29 = arith.constant 0.000000e+00 : f32
    %100 = vector.broadcast %cst_29 : f32 to vector<3x4x8xf32>
    %101 = arith.select %93, %99, %100 : vector<3x4x8xi1>, vector<3x4x8xf32>
    %cst_30 = arith.constant dense<0.000000e+00> : vector<3x8xf32>
    %102 = vector.multi_reduction <add>, %101, %cst_30 [1] : vector<3x4x8xf32> to vector<3x8xf32>
    %103 = vector.shape_cast %102 : vector<3x8xf32> to vector<1x3x8xf32>
    %104 = vector.extract_strided_slice %81 {offsets = [0, 3, 0], sizes = [3, 4, 8], strides = [1, 1, 1]} : vector<3x16x8xf32> to vector<3x4x8xf32>
    %cst_31 = arith.constant dense<0xFF800000> : vector<3x8xf32>
    %105 = vector.multi_reduction <maximumf>, %104, %cst_31 [1] : vector<3x4x8xf32> to vector<3x8xf32>
    %106 = vector.shape_cast %105 : vector<3x8xf32> to vector<3x1x8xf32>
    %107 = tpu.iota {dimensions = array<i32: 1>} : vector<3x4x8xi32>
    %108 = vector.broadcast %106 : vector<3x1x8xf32> to vector<3x4x8xf32>
    %109 = arith.cmpf oeq, %104, %108 : vector<3x4x8xf32>
    %c4_i32_32 = arith.constant 4 : i32
    %110 = vector.broadcast %c4_i32_32 : i32 to vector<3x4x8xi32>
    %111 = arith.select %109, %107, %110 : vector<3x4x8xi1>, vector<3x4x8xi32>
    %cst_33 = arith.constant dense<2147483647> : vector<3x8xi32>
    %112 = vector.multi_reduction <minsi>, %111, %cst_33 [1] : vector<3x4x8xi32> to vector<3x8xi32>
    %113 = vector.shape_cast %112 : vector<3x8xi32> to vector<3x1x8xi32>
    %114 = vector.broadcast %113 : vector<3x1x8xi32> to vector<3x4x8xi32>
    %115 = arith.cmpi eq, %107, %114 : vector<3x4x8xi32>
    %116 = vector.extract_strided_slice %79 {offsets = [0, 3, 0], sizes = [3, 4, 8], strides = [1, 1, 1]} : vector<3x16x8xf32> to vector<3x4x8xf32>
    %cst_34 = arith.constant 0.000000e+00 : f32
    %117 = vector.broadcast %cst_34 : f32 to vector<3x4x8xf32>
    %118 = arith.select %115, %116, %117 : vector<3x4x8xi1>, vector<3x4x8xf32>
    %cst_35 = arith.constant dense<0.000000e+00> : vector<3x8xf32>
    %119 = vector.multi_reduction <add>, %118, %cst_35 [1] : vector<3x4x8xf32> to vector<3x8xf32>
    %120 = vector.shape_cast %119 : vector<3x8xf32> to vector<1x3x8xf32>
    %121 = vector.extract_strided_slice %80 {offsets = [0, 3, 0], sizes = [3, 4, 8], strides = [1, 1, 1]} : vector<3x16x8xf32> to vector<3x4x8xf32>
    %cst_36 = arith.constant 0.000000e+00 : f32
    %122 = vector.broadcast %cst_36 : f32 to vector<3x4x8xf32>
    %123 = arith.select %115, %121, %122 : vector<3x4x8xi1>, vector<3x4x8xf32>
    %cst_37 = arith.constant dense<0.000000e+00> : vector<3x8xf32>
    %124 = vector.multi_reduction <add>, %123, %cst_37 [1] : vector<3x4x8xf32> to vector<3x8xf32>
    %125 = vector.shape_cast %124 : vector<3x8xf32> to vector<1x3x8xf32>
    %126 = vector.extract_strided_slice %81 {offsets = [0, 6, 0], sizes = [3, 4, 8], strides = [1, 1, 1]} : vector<3x16x8xf32> to vector<3x4x8xf32>
    %cst_38 = arith.constant dense<0xFF800000> : vector<3x8xf32>
    %127 = vector.multi_reduction <maximumf>, %126, %cst_38 [1] : vector<3x4x8xf32> to vector<3x8xf32>
    %128 = vector.shape_cast %127 : vector<3x8xf32> to vector<3x1x8xf32>
    %129 = tpu.iota {dimensions = array<i32: 1>} : vector<3x4x8xi32>
    %130 = vector.broadcast %128 : vector<3x1x8xf32> to vector<3x4x8xf32>
    %131 = arith.cmpf oeq, %126, %130 : vector<3x4x8xf32>
    %c4_i32_39 = arith.constant 4 : i32
    %132 = vector.broadcast %c4_i32_39 : i32 to vector<3x4x8xi32>
    %133 = arith.select %131, %129, %132 : vector<3x4x8xi1>, vector<3x4x8xi32>
    %cst_40 = arith.constant dense<2147483647> : vector<3x8xi32>
    %134 = vector.multi_reduction <minsi>, %133, %cst_40 [1] : vector<3x4x8xi32> to vector<3x8xi32>
    %135 = vector.shape_cast %134 : vector<3x8xi32> to vector<3x1x8xi32>
    %136 = vector.broadcast %135 : vector<3x1x8xi32> to vector<3x4x8xi32>
    %137 = arith.cmpi eq, %129, %136 : vector<3x4x8xi32>
    %138 = vector.extract_strided_slice %79 {offsets = [0, 6, 0], sizes = [3, 4, 8], strides = [1, 1, 1]} : vector<3x16x8xf32> to vector<3x4x8xf32>
    %cst_41 = arith.constant 0.000000e+00 : f32
    %139 = vector.broadcast %cst_41 : f32 to vector<3x4x8xf32>
    %140 = arith.select %137, %138, %139 : vector<3x4x8xi1>, vector<3x4x8xf32>
    %cst_42 = arith.constant dense<0.000000e+00> : vector<3x8xf32>
    %141 = vector.multi_reduction <add>, %140, %cst_42 [1] : vector<3x4x8xf32> to vector<3x8xf32>
    %142 = vector.shape_cast %141 : vector<3x8xf32> to vector<1x3x8xf32>
    %143 = vector.extract_strided_slice %80 {offsets = [0, 6, 0], sizes = [3, 4, 8], strides = [1, 1, 1]} : vector<3x16x8xf32> to vector<3x4x8xf32>
    %cst_43 = arith.constant 0.000000e+00 : f32
    %144 = vector.broadcast %cst_43 : f32 to vector<3x4x8xf32>
    %145 = arith.select %137, %143, %144 : vector<3x4x8xi1>, vector<3x4x8xf32>
    %cst_44 = arith.constant dense<0.000000e+00> : vector<3x8xf32>
    %146 = vector.multi_reduction <add>, %145, %cst_44 [1] : vector<3x4x8xf32> to vector<3x8xf32>
    %147 = vector.shape_cast %146 : vector<3x8xf32> to vector<1x3x8xf32>
    %148 = vector.extract_strided_slice %81 {offsets = [0, 9, 0], sizes = [3, 4, 8], strides = [1, 1, 1]} : vector<3x16x8xf32> to vector<3x4x8xf32>
    %cst_45 = arith.constant dense<0xFF800000> : vector<3x8xf32>
    %149 = vector.multi_reduction <maximumf>, %148, %cst_45 [1] : vector<3x4x8xf32> to vector<3x8xf32>
    %150 = vector.shape_cast %149 : vector<3x8xf32> to vector<3x1x8xf32>
    %151 = tpu.iota {dimensions = array<i32: 1>} : vector<3x4x8xi32>
    %152 = vector.broadcast %150 : vector<3x1x8xf32> to vector<3x4x8xf32>
    %153 = arith.cmpf oeq, %148, %152 : vector<3x4x8xf32>
    %c4_i32_46 = arith.constant 4 : i32
    %154 = vector.broadcast %c4_i32_46 : i32 to vector<3x4x8xi32>
    %155 = arith.select %153, %151, %154 : vector<3x4x8xi1>, vector<3x4x8xi32>
    %cst_47 = arith.constant dense<2147483647> : vector<3x8xi32>
    %156 = vector.multi_reduction <minsi>, %155, %cst_47 [1] : vector<3x4x8xi32> to vector<3x8xi32>
    %157 = vector.shape_cast %156 : vector<3x8xi32> to vector<3x1x8xi32>
    %158 = vector.broadcast %157 : vector<3x1x8xi32> to vector<3x4x8xi32>
    %159 = arith.cmpi eq, %151, %158 : vector<3x4x8xi32>
    %160 = vector.extract_strided_slice %79 {offsets = [0, 9, 0], sizes = [3, 4, 8], strides = [1, 1, 1]} : vector<3x16x8xf32> to vector<3x4x8xf32>
    %cst_48 = arith.constant 0.000000e+00 : f32
    %161 = vector.broadcast %cst_48 : f32 to vector<3x4x8xf32>
    %162 = arith.select %159, %160, %161 : vector<3x4x8xi1>, vector<3x4x8xf32>
    %cst_49 = arith.constant dense<0.000000e+00> : vector<3x8xf32>
    %163 = vector.multi_reduction <add>, %162, %cst_49 [1] : vector<3x4x8xf32> to vector<3x8xf32>
    %164 = vector.shape_cast %163 : vector<3x8xf32> to vector<1x3x8xf32>
    %165 = vector.extract_strided_slice %80 {offsets = [0, 9, 0], sizes = [3, 4, 8], strides = [1, 1, 1]} : vector<3x16x8xf32> to vector<3x4x8xf32>
    %cst_50 = arith.constant 0.000000e+00 : f32
    %166 = vector.broadcast %cst_50 : f32 to vector<3x4x8xf32>
    %167 = arith.select %159, %165, %166 : vector<3x4x8xi1>, vector<3x4x8xf32>
    %cst_51 = arith.constant dense<0.000000e+00> : vector<3x8xf32>
    %168 = vector.multi_reduction <add>, %167, %cst_51 [1] : vector<3x4x8xf32> to vector<3x8xf32>
    %169 = vector.shape_cast %168 : vector<3x8xf32> to vector<1x3x8xf32>
    %170 = vector.extract_strided_slice %81 {offsets = [0, 12, 0], sizes = [3, 4, 8], strides = [1, 1, 1]} : vector<3x16x8xf32> to vector<3x4x8xf32>
    %cst_52 = arith.constant dense<0xFF800000> : vector<3x8xf32>
    %171 = vector.multi_reduction <maximumf>, %170, %cst_52 [1] : vector<3x4x8xf32> to vector<3x8xf32>
    %172 = vector.shape_cast %171 : vector<3x8xf32> to vector<3x1x8xf32>
    %173 = tpu.iota {dimensions = array<i32: 1>} : vector<3x4x8xi32>
    %174 = vector.broadcast %172 : vector<3x1x8xf32> to vector<3x4x8xf32>
    %175 = arith.cmpf oeq, %170, %174 : vector<3x4x8xf32>
    %c4_i32_53 = arith.constant 4 : i32
    %176 = vector.broadcast %c4_i32_53 : i32 to vector<3x4x8xi32>
    %177 = arith.select %175, %173, %176 : vector<3x4x8xi1>, vector<3x4x8xi32>
    %cst_54 = arith.constant dense<2147483647> : vector<3x8xi32>
    %178 = vector.multi_reduction <minsi>, %177, %cst_54 [1] : vector<3x4x8xi32> to vector<3x8xi32>
    %179 = vector.shape_cast %178 : vector<3x8xi32> to vector<3x1x8xi32>
    %180 = vector.broadcast %179 : vector<3x1x8xi32> to vector<3x4x8xi32>
    %181 = arith.cmpi eq, %173, %180 : vector<3x4x8xi32>
    %182 = vector.extract_strided_slice %79 {offsets = [0, 12, 0], sizes = [3, 4, 8], strides = [1, 1, 1]} : vector<3x16x8xf32> to vector<3x4x8xf32>
    %cst_55 = arith.constant 0.000000e+00 : f32
    %183 = vector.broadcast %cst_55 : f32 to vector<3x4x8xf32>
    %184 = arith.select %181, %182, %183 : vector<3x4x8xi1>, vector<3x4x8xf32>
    %cst_56 = arith.constant dense<0.000000e+00> : vector<3x8xf32>
    %185 = vector.multi_reduction <add>, %184, %cst_56 [1] : vector<3x4x8xf32> to vector<3x8xf32>
    %186 = vector.shape_cast %185 : vector<3x8xf32> to vector<1x3x8xf32>
    %187 = vector.extract_strided_slice %80 {offsets = [0, 12, 0], sizes = [3, 4, 8], strides = [1, 1, 1]} : vector<3x16x8xf32> to vector<3x4x8xf32>
    %cst_57 = arith.constant 0.000000e+00 : f32
    %188 = vector.broadcast %cst_57 : f32 to vector<3x4x8xf32>
    %189 = arith.select %181, %187, %188 : vector<3x4x8xi1>, vector<3x4x8xf32>
    %cst_58 = arith.constant dense<0.000000e+00> : vector<3x8xf32>
    %190 = vector.multi_reduction <add>, %189, %cst_58 [1] : vector<3x4x8xf32> to vector<3x8xf32>
    %191 = vector.shape_cast %190 : vector<3x8xf32> to vector<1x3x8xf32>
    %192 = tpu.concatenate %98, %120, %142, %164, %186 in 0 : vector<1x3x8xf32>, vector<1x3x8xf32>, vector<1x3x8xf32>, vector<1x3x8xf32>, vector<1x3x8xf32> -> vector<5x3x8xf32>
    %c0_59 = arith.constant 0 : index
    %c0_60 = arith.constant 0 : index
    %c0_61 = arith.constant 0 : index
    %c0_62 = arith.constant 0 : index
    %193 = vector.load %arg2[%c0_59, %c0_60, %c0_61, %c0_62] : memref<2x5x3x8xf32, #tpu.memory_space<vmem>>, vector<1x5x3x8xf32>
    %194 = vector.shape_cast %193 : vector<1x5x3x8xf32> to vector<5x3x8xf32>
    %195 = vector.shape_cast %192 : vector<5x3x8xf32> to vector<1x5x3x8xf32>
    tpu.vector_store %arg2[%c0_59, %c0_60, %c0_61, %c0_62], %195 {strides = array<i32>} : memref<2x5x3x8xf32, #tpu.memory_space<vmem>>, vector<1x5x3x8xf32>,
    %196 = tpu.concatenate %103, %125, %147, %169, %191 in 0 : vector<1x3x8xf32>, vector<1x3x8xf32>, vector<1x3x8xf32>, vector<1x3x8xf32>, vector<1x3x8xf32> -> vector<5x3x8xf32>
    %c1_63 = arith.constant 1 : index
    %c0_64 = arith.constant 0 : index
    %c0_65 = arith.constant 0 : index
    %c0_66 = arith.constant 0 : index
    %197 = vector.load %arg2[%c1_63, %c0_64, %c0_65, %c0_66] : memref<2x5x3x8xf32, #tpu.memory_space<vmem>>, vector<1x5x3x8xf32>
    %198 = vector.shape_cast %197 : vector<1x5x3x8xf32> to vector<5x3x8xf32>
    %199 = vector.shape_cast %196 : vector<5x3x8xf32> to vector<1x5x3x8xf32>
    tpu.vector_store %arg2[%c1_63, %c0_64, %c0_65, %c0_66], %199 {strides = array<i32>} : memref<2x5x3x8xf32, #tpu.memory_space<vmem>>, vector<1x5x3x8xf32>,
    return
  }
  func.func @transform_0(%arg0: i32) -> (i32, i32, i32, i32) {
    %c0_i32 = arith.constant 0 : i32
    %c0_i32_0 = arith.constant 0 : i32
    %c0_i32_1 = arith.constant 0 : i32
    %c0_i32_2 = arith.constant 0 : i32
    return %c0_i32, %c0_i32_0, %c0_i32_1, %arg0 : i32, i32, i32, i32
  }
  func.func @transform_1(%arg0: i32) -> (i32, i32, i32, i32) {
    %c0_i32 = arith.constant 0 : i32
    %c0_i32_0 = arith.constant 0 : i32
    %c0_i32_1 = arith.constant 0 : i32
    %c0_i32_2 = arith.constant 0 : i32
    return %c0_i32, %c0_i32_0, %c0_i32_1, %arg0 : i32, i32, i32, i32
  }
}

</mosaic_0001>

<bundles_post_ra>
// kernel: tpu_custom_call.1
= control target key start
LH: loop header
LB: loop body
LE: loop exit
PB: predicated region body
PF: predicated region fallthrough
CT: control target
= control target key end

     0   :  { %v282_v7 = vlaneseq  ;;  %vm7159_vm0 = vcmask 62464   ;;  %s7049_s0 = inlined_call_operand.vmem [shape: f32[2,16,16,8], index: 0, kind: input, shape index: {}]   ;;  %s7050_s1 = inlined_call_operand.vmem [shape: f32[2,5,3,8], index: 1, kind: output, shape index: {}]  }
   0x1   :  { %v3579_v0 = vld [vmem:[%s7049_s0] sm:$0xff]  ;;  %v9_v1 = vld [vmem:[%s7049_s0 + $0x8] sm:$0xff]  ;;  %v3587_v2 = vld [vmem:[%s7049_s0 + $0x10] sm:$0xff] }
   0x2   :  { %7261 = vst [vmem:[#allocation2_spill] sm:$0xff] %v3579_v0  ;;  %7262 = vst [vmem:[#allocation3_spill] sm:$0xff] %v3587_v2  ;;  %v11_v3 = vld [vmem:[%s7049_s0 + $0x18] sm:$0xff]  ;;  %v3595_v4 = vld [vmem:[%s7049_s0 + $0x20] sm:$0xff]  ;;  %v3663_v22 = vmul.f32 %v3579_v0, %v3579_v0  ;;  %v3665_v23 = vmul.f32 %v9_v1, %v9_v1  ;;  %v3669_v24 = vmul.f32 %v3587_v2, %v3587_v2  ;;  %v3671_v25 = vshrl.u32 %v282_v7, 7 }
   0x3   :  { %7263 = vst [vmem:[#allocation4_spill] sm:$0xff] %v3595_v4  ;;  %v13_v5 = vld [vmem:[%s7049_s0 + $0x28] sm:$0xff]  ;;  %v3603_v6 = vld [vmem:[%s7049_s0 + $0x30] sm:$0xff]  ;;  %v15_v8 = vld [vmem:[%s7049_s0 + $0x38] sm:$0xff]  ;;  %v3684_v29 = vmul.f32 %v11_v3, %v11_v3  ;;  %v3688_v30 = vmul.f32 %v3595_v4, %v3595_v4 }
   0x4   :  { %7264 = vst [vmem:[#allocation5_spill] sm:$0xff] %v3603_v6  ;;  %v3611_v9 = vld [vmem:[%s7049_s0 + $0x40] sm:$0xff]  ;;  %v17_v10 = vld [vmem:[%s7049_s0 + $0x48] sm:$0xff]  ;;  %v3619_v11 = vld [vmem:[%s7049_s0 + $0x50] sm:$0xff]  ;;  %v3690_v31 = vmul.f32 %v13_v5, %v13_v5  ;;  %v3694_v32 = vmul.f32 %v3603_v6, %v3603_v6  ;;  %v3709_v36 = vmul.f32 %v15_v8, %v15_v8 }
   0x5   :  { %7265 = vst [vmem:[#allocation6_spill] sm:$0xff] %v3611_v9  ;;  %7266 = vst [vmem:[#allocation7_spill] sm:$0xff] %v3619_v11  ;;  %v19_v12 = vld [vmem:[%s7049_s0 + $0x58] sm:$0xff]  ;;  %v3627_v13 = vld [vmem:[%s7049_s0 + $0x60] sm:$0xff]  ;;  %v3713_v37 = vmul.f32 %v3611_v9, %v3611_v9  ;;  %v3715_v38 = vmul.f32 %v17_v10, %v17_v10  ;;  %v3719_v39 = vmul.f32 %v3619_v11, %v3619_v11 }
   0x6   :  { %7267 = vst [vmem:[#allocation8_spill] sm:$0xff] %v3627_v13  ;;  %v21_v14 = vld [vmem:[%s7049_s0 + $0x68] sm:$0xff]  ;;  %v3635_v15 = vld [vmem:[%s7049_s0 + $0x70] sm:$0xff]  ;;  %v23_v16 = vld [vmem:[%s7049_s0 + $0x78] sm:$0xff]  ;;  %v3732_v43 = vmul.f32 %v19_v12, %v19_v12  ;;  %v3736_v44 = vmul.f32 %v3627_v13, %v3627_v13 }
   0x7   :  { %7268 = vst [vmem:[#allocation9_spill] sm:$0xff] %v3635_v15  ;;  %v3643_v17 = vld [vmem:[%s7049_s0 + $0x80] sm:$0xff]  ;;  %v25_v18 = vld [vmem:[%s7049_s0 + $0x88] sm:$0xff]  ;;  %v3651_v19 = vld [vmem:[%s7049_s0 + $0x90] sm:$0xff]  ;;  %v3738_v45 = vmul.f32 %v21_v14, %v21_v14  ;;  %v3742_v46 = vmul.f32 %v3635_v15, %v3635_v15  ;;  %v3755_v50 = vmul.f32 %v23_v16, %v23_v16 }
   0x8   :  { %7269 = vst [vmem:[#allocation10_spill] sm:$0xff] %v3643_v17  ;;  %7270 = vst [vmem:[#allocation11_spill] sm:$0xff] %v3651_v19  ;;  %v27_v20 = vld [vmem:[%s7049_s0 + $0x98] sm:$0xff]  ;;  %v3659_v21 = vld [vmem:[%s7049_s0 + $0xa0] sm:$0xff]  ;;  %v3759_v51 = vmul.f32 %v3643_v17, %v3643_v17  ;;  %v3761_v52 = vmul.f32 %v25_v18, %v25_v18  ;;  %v3765_v53 = vmul.f32 %v3651_v19, %v3651_v19 }
   0x9   :  { %7271 = vst [vmem:[#allocation12_spill] sm:$0xff] %v3659_v21  ;;  %7272 = vst [vmem:[#allocation13_spill] sm:$0xff] %v3671_v25  ;;  %v29_v26 = vld [vmem:[%s7049_s0 + $0xa8] sm:$0xff]  ;;  %v3679_v27 = vld [vmem:[%s7049_s0 + $0xb0] sm:$0xff]  ;;  %v3776_v57 = vmul.f32 %v27_v20, %v27_v20  ;;  %v3780_v58 = vmul.f32 %v3659_v21, %v3659_v21 }
   0xa   :  { %7273 = vst [vmem:[#allocation14_spill] sm:$0xff] %v3679_v27  ;;  %v31_v28 = vld [vmem:[%s7049_s0 + $0xb8] sm:$0xff]  ;;  %v3699_v33 = vld [vmem:[%s7049_s0 + $0xc0] sm:$0xff]  ;;  %v33_v34 = vld [vmem:[%s7049_s0 + $0xc8] sm:$0xff]  ;;  %v3782_v59 = vmul.f32 %v29_v26, %v29_v26  ;;  %v3786_v60 = vmul.f32 %v3679_v27, %v3679_v27 }
   0xb   :  { %7274 = vst [vmem:[#allocation15_spill] sm:$0xff] %v3699_v33  ;;  %v3707_v35 = vld [vmem:[%s7049_s0 + $0xd0] sm:$0xff]  ;;  %v35_v40 = vld [vmem:[%s7049_s0 + $0xd8] sm:$0xff]  ;;  %v3727_v41 = vld [vmem:[%s7049_s0 + $0xe0] sm:$0xff]  ;;  %v3797_v1 = vmul.f32 %v31_v28, %v31_v28  ;;  %v3801_v3 = vmul.f32 %v3699_v33, %v3699_v33  ;;  %v3803_v5 = vmul.f32 %v33_v34, %v33_v34 }
   0xc   :  { %7275 = vst [vmem:[#allocation16_spill] sm:$0xff] %v3707_v35  ;;  %7276 = vst [vmem:[#allocation17_spill] sm:$0xff] %v3727_v41  ;;  %v3420_v42 = vld [vmem:[%s7049_s0 + $0x100] sm:$0xff]  ;;  %v37_v47 = vld [vmem:[%s7049_s0 + $0xe8] sm:$0xff]  ;;  %v3816_v14 = vmul.f32 %v3707_v35, %v3707_v35  ;;  %v3818_v16 = vmul.f32 %v35_v40, %v35_v40  ;;  %v3822_v18 = vmul.f32 %v3727_v41, %v3727_v41 }
   0xd   :  { %v3750_v48 = vld [vmem:[%s7049_s0 + $0xf0] sm:$0xff]  ;;  %v3421_v49 = vld [vmem:[%s7049_s0 + $0x108] sm:$0xff]  ;;  %v39_v54 = vld [vmem:[%s7049_s0 + $0xf8] sm:$0xff]  ;;  %v105_v7 = vmul.f32 %v3420_v42, %v3420_v42  ;;  %v3833_v42 = vmul.f32 %v37_v47, %v37_v47 }
   0xe   :  { %7277 = vst [vmem:[#allocation18_spill] sm:$0xff] %v3750_v48  ;;  %v3422_v55 = vld [vmem:[%s7049_s0 + $0x110] sm:$0xff]  ;;  %v3423_v56 = vld [vmem:[%s7049_s0 + $0x118] sm:$0xff]  ;;  %v3424_v61 = vld [vmem:[%s7049_s0 + $0x120] sm:$0xff]  ;;  %v106_v20 = vmul.f32 %v3421_v49, %v3421_v49  ;;  %v3837_v40 = vmul.f32 %v3750_v48, %v3750_v48  ;;  %v3839_v41 = vmul.f32 %v39_v54, %v39_v54 }
   0xf   :  { %v3425_v62 = vld [vmem:[%s7049_s0 + $0x128] sm:$0xff]  ;;  %v3426_v63 = vld [vmem:[%s7049_s0 + $0x130] sm:$0xff]  ;;  %v3427_v8 = vld [vmem:[%s7049_s0 + $0x138] sm:$0xff]  ;;  %7278 = vst [vmem:[#allocation19_spill] sm:$0xff] %v3833_v42  ;;  %v107_v49 = vmul.f32 %v3422_v55, %v3422_v55  ;;  %v108_v27 = vmul.f32 %v3423_v56, %v3423_v56  ;;  %v109_v21 = vmul.f32 %v3424_v61, %v3424_v61  ;;  %v3860_v56 = vadd.f32 %v105_v7, %v3663_v22 }
  0x10   :  { %v3428_v10 = vld [vmem:[%s7049_s0 + $0x140] sm:$0xff]  ;;  %v3429_v12 = vld [vmem:[%s7049_s0 + $0x148] sm:$0xff]  ;;  %v3430_v26 = vld [vmem:[%s7049_s0 + $0x150] sm:$0xff]  ;;  %7279 = vst [vmem:[#allocation20_spill] sm:$0xff] %v3837_v40  ;;  %v110_v19 = vmul.f32 %v3425_v62, %v3425_v62  ;;  %v111_v48 = vmul.f32 %v3426_v63, %v3426_v63  ;;  %v112_v15 = vmul.f32 %v3427_v8, %v3427_v8 }
  0x11   :  { %v3431_v28 = vld [vmem:[%s7049_s0 + $0x158] sm:$0xff]  ;;  %v3432_v34 = vld [vmem:[%s7049_s0 + $0x160] sm:$0xff]  ;;  %7280 = vst [vmem:[#allocation21_spill] sm:$0xff] %v3839_v41  ;;  %v3433_v35 = vld [vmem:[%s7049_s0 + $0x168] sm:$0xff]  ;;  %v113_v13 = vmul.f32 %v3428_v10, %v3428_v10  ;;  %v114_v11 = vmul.f32 %v3429_v12, %v3429_v12  ;;  %v115_v9 = vmul.f32 %v3430_v26, %v3430_v26  ;;  %v3872_v10 = vadd.f32 %v106_v20, %v3665_v23 }
  0x12   :  { %v3434_v33 = vld [vmem:[%s7049_s0 + $0x170] sm:$0xff]  ;;  %v3435_v47 = vld [vmem:[%s7049_s0 + $0x178] sm:$0xff]  ;;  %v3436_v54 = vld [vmem:[%s7049_s0 + $0x180] sm:$0xff]  ;;  %7281 = vst [vmem:[#allocation22_spill] sm:$0xff] %v3860_v56  ;;  %v116_v6 = vmul.f32 %v3431_v28, %v3431_v28  ;;  %v117_v8 = vmul.f32 %v3432_v34, %v3432_v34  ;;  %v118_v7 = vmul.f32 %v3433_v35, %v3433_v35  ;;  %v3878_v2 = vadd.f32 %v107_v49, %v3669_v24 }
  0x13   :  { %v3437_v55 = vld [vmem:[%s7049_s0 + $0x188] sm:$0xff]  ;;  %v3438_v17 = vld [vmem:[%s7049_s0 + $0x190] sm:$0xff]  ;;  %v3439_v61 = vld [vmem:[%s7049_s0 + $0x198] sm:$0xff]  ;;  %7282 = vst [vmem:[#allocation23_spill] sm:$0xff] %v3872_v10  ;;  %v119_v12 = vmul.f32 %v3434_v33, %v3434_v33  ;;  %v120_v4 = vmul.f32 %v3435_v47, %v3435_v47  ;;  %v121_v20 = vmul.f32 %v3436_v54, %v3436_v54  ;;  %v3890_v33 = vadd.f32 %v108_v27, %v3684_v29 }
  0x14   :  { %v3440_v62 = vld [vmem:[%s7049_s0 + $0x1a0] sm:$0xff]  ;;  %v3441_v63 = vld [vmem:[%s7049_s0 + $0x1a8] sm:$0xff]  ;;  %v3442_v22 = vld [vmem:[%s7049_s0 + $0x1b0] sm:$0xff]  ;;  %7283 = vst [vmem:[#allocation24_spill] sm:$0xff] %v3878_v2  ;;  %v122_v28 = vmul.f32 %v3437_v55, %v3437_v55  ;;  %v123_v35 = vmul.f32 %v3438_v17, %v3438_v17  ;;  %v124_v47 = vmul.f32 %v3439_v61, %v3439_v61  ;;  %v3902_v17 = vadd.f32 %v109_v21, %v3688_v30 }
  0x15   :  { %v3443_v0 = vld [vmem:[%s7049_s0 + $0x1b8] sm:$0xff]  ;;  %v3444_v26 = vld [vmem:[%s7049_s0 + $0x1c0] sm:$0xff]  ;;  %v3445_v23 = vld [vmem:[%s7049_s0 + $0x1c8] sm:$0xff]  ;;  %7284 = vst [vmem:[#allocation25_spill] sm:$0xff] %v3890_v33  ;;  %v125_v10 = vmul.f32 %v3440_v62, %v3440_v62  ;;  %v126_v54 = vmul.f32 %v3441_v63, %v3441_v63  ;;  %v127_v27 = vmul.f32 %v3442_v22, %v3442_v22  ;;  %v3905_v29 = vadd.f32 %v110_v19, %v3690_v31 }
  0x16   :  { %v3446_v24 = vld [vmem:[%s7049_s0 + $0x1d0] sm:$0xff]  ;;  %v3447_v34 = vld [vmem:[%s7049_s0 + $0x1d8] sm:$0xff]  ;;  %v3448_v49 = vld [vmem:[%s7049_s0 + $0x1e0] sm:$0xff]  ;;  %7285 = vst [vmem:[#allocation26_spill] sm:$0xff] %v3902_v17  ;;  %v170_v55 = vsel %vm7159_vm0, %v3860_v56, -inf  ;;  %v177_v33 = vsel %vm7159_vm0, %v3878_v2, -inf  ;;  %v128_v19 = vmul.f32 %v3443_v0, %v3443_v0  ;;  %v129_v30 = vmul.f32 %v3444_v26, %v3444_v26 }
  0x17   :  { %7286 = vst [vmem:[#allocation27_spill] sm:$0xff] %v3905_v29  ;;  %v3449_v25 = vld [vmem:[%s7049_s0 + $0x1e8] sm:$0xff]  ;;  %v3450_v61 = vld [vmem:[%s7049_s0 + $0x1f0] sm:$0xff]  ;;  %v3451_v21 = vld [vmem:[%s7049_s0 + $0x1f8] sm:$0xff]  ;;  %v130_v31 = vmul.f32 %v3445_v23, %v3445_v23  ;;  %v3921_v62 = vadd.f32 %v111_v48, %v3694_v32  ;;  %v131_v63 = vmul.f32 %v3446_v24, %v3446_v24  ;;  %v132_v22 = vmul.f32 %v3447_v34, %v3447_v34 }
  0x18   :  { %v133_v29 = vmul.f32 %v3448_v49, %v3448_v49  ;;  %v3924_v2 = vadd.f32 %v112_v15, %v3709_v36  ;;  %v171_v56 = vrot.slane %v170_v55, 4  ;;  %v178_v41 = vrot.slane %v177_v33, 4 }
  0x19   :  { %7287 = vst [vmem:[#allocation28_spill] sm:$0xff] %v3921_v62  ;;  %v184_v40 = vsel %vm7159_vm0, %v3902_v17, -inf  ;;  %v191_v42 = vsel %vm7159_vm0, %v3921_v62, -inf  ;;  %v134_v0 = vmul.f32 %v3449_v25, %v3449_v25  ;;  %v135_v26 = vmul.f32 %v3450_v61, %v3450_v61 }
  0x1a   :  { %7288 = vst [vmem:[#allocation29_spill] sm:$0xff] %v3924_v2  ;;  %v136_v23 = vmul.f32 %v3451_v21, %v3451_v21  ;;  %v3931_v32 = vadd.f32 %v113_v13, %v3713_v37  ;;  %v3934_v48 = vadd.f32 %v114_v11, %v3715_v38  ;;  %v3937_v15 = vadd.f32 %v115_v9, %v3719_v39 }
  0x1b   :  { %v3940_v36 = vadd.f32 %v116_v6, %v3732_v43  ;;  %v3943_v24 = vadd.f32 %v117_v8, %v3736_v44  ;;  %v3946_v34 = vadd.f32 %v118_v7, %v3738_v45  ;;  %v3949_v25 = vadd.f32 %v119_v12, %v3742_v46 }
  0x1c   :  { %7289 = vst [vmem:[#allocation30_spill] sm:$0xff] %v3931_v32  ;;  %7290 = vst [vmem:[#allocation31_spill] sm:$0xff] %v3934_v48  ;;  %v185_v13 = vrot.slane %v184_v40, 4  ;;  %v192_v37 = vrot.slane %v191_v42, 4  ;;  %v3952_v11 = vadd.f32 %v120_v4, %v3755_v50  ;;  %v3955_v9 = vadd.f32 %v121_v20, %v3759_v51 }
  0x1d   :  { %7291 = vst [vmem:[#allocation32_spill] sm:$0xff] %v3937_v15  ;;  %7292 = vst [vmem:[#allocation33_spill] sm:$0xff] %v3940_v36  ;;  %v172_v38 = vmax.f32 %v170_v55, %v171_v56  ;;  %v179_v6 = vmax.f32 %v177_v33, %v178_v41  ;;  %v3958_v39 = vadd.f32 %v122_v28, %v3761_v52  ;;  %v219_v12 = vsel %vm7159_vm0, %v3949_v25, -inf }
  0x1e   :  { %7293 = vst [vmem:[#allocation34_spill] sm:$0xff] %v3943_v24  ;;  %7294 = vst [vmem:[#allocation35_spill] sm:$0xff] %v3946_v34  ;;  %v3961_v43 = vadd.f32 %v123_v35, %v3765_v53  ;;  %v3964_v44 = vadd.f32 %v124_v47, %v3776_v57  ;;  %v3967_v45 = vadd.f32 %v125_v10, %v3780_v58  ;;  %v7314_v10 = vld [vmem:[#allocation21_spill] sm:$0xff] }
  0x1f   :  { %7295 = vst [vmem:[#allocation36_spill] sm:$0xff] %v3949_v25  ;;  %7296 = vst [vmem:[#allocation37_spill] sm:$0xff] %v3952_v11  ;;  %v3970_v4 = vadd.f32 %v126_v54, %v3782_v59  ;;  %v3973_v46 = vadd.f32 %v127_v27, %v3786_v60  ;;  %v3976_v41 = vadd.f32 %v128_v19, %v3797_v1  ;;  %v173_v58 = vrot.slane %v172_v38, 2 }
  0x20   :  { %7297 = vst [vmem:[#allocation38_spill] sm:$0xff] %v3955_v9  ;;  %7298 = vst [vmem:[#allocation39_spill] sm:$0xff] %v3958_v39  ;;  %v3979_v50 = vadd.f32 %v129_v30, %v3801_v3  ;;  %v3982_v51 = vadd.f32 %v130_v31, %v3803_v5  ;;  %v3985_v52 = vadd.f32 %v131_v63, %v3816_v14  ;;  %v180_v59 = vrot.slane %v179_v6, 2  ;;  %v7310_v5 = vld [vmem:[#allocation19_spill] sm:$0xff] }
  0x21   :  { %7299 = vst [vmem:[#allocation40_spill] sm:$0xff] %v3961_v43  ;;  %7300 = vst [vmem:[#allocation41_spill] sm:$0xff] %v3964_v44  ;;  %v186_v53 = vmax.f32 %v184_v40, %v185_v13  ;;  %v193_v57 = vmax.f32 %v191_v42, %v192_v37  ;;  %v198_v60 = vsel %vm7159_vm0, %v3931_v32, -inf  ;;  %v205_v1 = vsel %vm7159_vm0, %v3937_v15, -inf  ;;  %v7312_v42 = vld [vmem:[#allocation20_spill] sm:$0xff] }
  0x22   :  { %7301 = vst [vmem:[#allocation42_spill] sm:$0xff] %v3967_v45  ;;  %7302 = vst [vmem:[#allocation43_spill] sm:$0xff] %v3970_v4  ;;  %v3992_v56 = vadd.f32 %v132_v22, %v3818_v16  ;;  %v3995_v3 = vadd.f32 %v133_v29, %v3822_v18  ;;  %v3998_v8 = vadd.f32 %v134_v0, %v7310_v5  ;;  %v212_v14 = vsel %vm7159_vm0, %v3943_v24, -inf }
  0x23   :  { %7303 = vst [vmem:[#allocation44_spill] sm:$0xff] %v3973_v46  ;;  %7304 = vst [vmem:[#allocation45_spill] sm:$0xff] %v3976_v41  ;;  %v4003_v40 = vadd.f32 %v135_v26, %v7312_v42  ;;  %v4006_v7 = vadd.f32 %v136_v23, %v7314_v10  ;;  %v226_v16 = vsel %vm7159_vm0, %v3955_v9, -inf  ;;  %v187_v18 = vrot.slane %v186_v53, 2 }
  0x24   :  { %7305 = vst [vmem:[#allocation46_spill] sm:$0xff] %v3979_v50  ;;  %7306 = vst [vmem:[#allocation47_spill] sm:$0xff] %v3982_v51  ;;  %v194_v20 = vrot.slane %v193_v57, 2  ;;  %v199_v28 = vrot.slane %v198_v60, 4  ;;  %v206_v35 = vrot.slane %v205_v1, 4  ;;  %v174_v33 = vmax.f32 %v172_v38, %v173_v58 }
  0x25   :  { %7307 = vst [vmem:[#allocation48_spill] sm:$0xff] %v3985_v52  ;;  %7308 = vst [vmem:[#allocation49_spill] sm:$0xff] %v3992_v56  ;;  %v181_v49 = vmax.f32 %v179_v6, %v180_v59  ;;  %v213_v47 = vrot.slane %v212_v14, 4  ;;  %v233_v54 = vsel %vm7159_vm0, %v3961_v43, -inf  ;;  %v220_v27 = vrot.slane %v219_v12, 4 }
  0x26   :  { %7309 = vst [vmem:[#allocation50_spill] sm:$0xff] %v3995_v3  ;;  %7311 = vst [vmem:[#allocation19_spill] sm:$0xff] %v3998_v8  ;;  %v227_v29 = vrot.slane %v226_v16, 4  ;;  %v240_v55 = vsel %vm7159_vm0, %v3967_v45, -inf  ;;  %v247_v61 = vsel %vm7159_vm0, %v3973_v46, -inf  ;;  %v254_v21 = vsel %vm7159_vm0, %v3979_v50, -inf }
  0x27   :  { %7313 = vst [vmem:[#allocation20_spill] sm:$0xff] %v4003_v40  ;;  %7315 = vst [vmem:[#allocation21_spill] sm:$0xff] %v4006_v7  ;;  %v261_v19 = vsel %vm7159_vm0, %v3985_v52, -inf  ;;  %v268_v30 = vsel %vm7159_vm0, %v3995_v3, -inf  ;;  %v275_v31 = vsel %vm7159_vm0, %v4003_v40, -inf  ;;  %v188_v63 = vmax.f32 %v186_v53, %v187_v18 }
  0x28   :  { %v195_v22 = vmax.f32 %v193_v57, %v194_v20  ;;  %v200_v0 = vmax.f32 %v198_v60, %v199_v28  ;;  %v234_v26 = vrot.slane %v233_v54, 4  ;;  %v175_v23 = vrot.slane %v174_v33, 1 }
  0x29   :  { %v182_v13 = vrot.slane %v181_v49, 1  ;;  %v241_v37 = vrot.slane %v240_v55, 4  ;;  %v248_v38 = vrot.slane %v247_v61, 4  ;;  %v255_v6 = vrot.slane %v254_v21, 4 }
  0x2a   :  { %v262_v58 = vrot.slane %v261_v19, 4  ;;  %v269_v59 = vrot.slane %v268_v30, 4  ;;  %v276_v5 = vrot.slane %v275_v31, 4  ;;  %v207_v42 = vmax.f32 %v205_v1, %v206_v35 }
  0x2b   :  { %v214_v10 = vmax.f32 %v212_v14, %v213_v47  ;;  %v221_v7 = vmax.f32 %v219_v12, %v220_v27  ;;  %v228_v8 = vmax.f32 %v226_v16, %v227_v29  ;;  %v189_v56 = vrot.slane %v188_v63, 1  ;;  %v7321_v27 = vld [vmem:[#allocation24_spill] sm:$0xff] }
  0x2c   :  { %v196_v51 = vrot.slane %v195_v22, 1  ;;  %v201_v41 = vrot.slane %v200_v0, 2  ;;  %v235_v4 = vmax.f32 %v233_v54, %v234_v26  ;;  %v4026_v53 = vmax.f32 %v174_v33, %v175_v23 }
  0x2d   :  { %v4028_v57 = vmax.f32 %v181_v49, %v182_v13  ;;  %v242_v60 = vmax.f32 %v240_v55, %v241_v37  ;;  %v249_v18 = vmax.f32 %v247_v61, %v248_v38  ;;  %v256_v20 = vmax.f32 %v254_v21, %v255_v6  ;;  %v7320_v49 = vld [vmem:[#allocation22_spill] sm:$0xff] }
  0x2e   :  { %7316 = vst [vmem:[#allocation51_spill] sm:$0xff] %v4026_v53  ;;  %v263_v28 = vmax.f32 %v261_v19, %v262_v58  ;;  %v270_v44 = vmax.f32 %v268_v30, %v269_v59  ;;  %v277_v39 = vmax.f32 %v275_v31, %v276_v5  ;;  %v208_v11 = vrot.slane %v207_v42, 2 }
  0x2f   :  { %7317 = vst [vmem:[#allocation52_spill] sm:$0xff] %v4028_v57  ;;  %v215_v34 = vrot.slane %v214_v10, 2  ;;  %v222_v1 = vrot.slane %v221_v7, 2  ;;  %v229_v14 = vrot.slane %v228_v8, 2  ;;  %v4030_v12 = vmax.f32 %v188_v63, %v189_v56 }
  0x30   :  { %v4032_v16 = vmax.f32 %v195_v22, %v196_v51  ;;  %v202_v35 = vmax.f32 %v200_v0, %v201_v41  ;;  %v236_v47 = vrot.slane %v235_v4, 2  ;;  %v243_v33 = vrot.slane %v242_v60, 2  ;;  %v7322_v41 = vld [vmem:[#allocation13_spill] sm:$0xff] }
  0x31   :  { %7318 = vst [vmem:[#allocation53_spill] sm:$0xff] %v4030_v12  ;;  %v250_v54 = vrot.slane %v249_v18, 2  ;;  %vm284_vm1 = vcmp.eq.f32.partialorder %v7320_v49, %v4026_v53  ;;  %vm285_vm2 = vcmp.eq.f32.partialorder %v7321_v27, %v4028_v57  ;;  %v257_v29 = vrot.slane %v256_v20, 2 }
  0x32   :  { %7319 = vst [vmem:[#allocation54_spill] sm:$0xff] %v4032_v16  ;;  %v264_v55 = vrot.slane %v263_v28, 2  ;;  %v271_v61 = vrot.slane %v270_v44, 2  ;;  %v278_v21 = vrot.slane %v277_v39, 2  ;;  %v209_v19 = vmax.f32 %v207_v42, %v208_v11 }
  0x33   :  { %v216_v30 = vmax.f32 %v214_v10, %v215_v34  ;;  %v223_v56 = vmax.f32 %v221_v7, %v222_v1  ;;  %v230_v31 = vmax.f32 %v228_v8, %v229_v14  ;;  %vm286_vm3 = vcmp.eq.f32.partialorder %v3902_v17, %v4030_v12 }
  0x34   :  { %vm287_vm4 = vcmp.eq.f32.partialorder %v3921_v62, %v4032_v16  ;;  %v300_v51 = vsel %vm284_vm1, %v7322_v41, 6  ;;  %v301_v63 = vsel %vm285_vm2, %v7322_v41, 6  ;;  %v203_v22 = vrot.slane %v202_v35, 1 }
  0x35   :  { %v237_v0 = vmax.f32 %v235_v4, %v236_v47  ;;  %v244_v26 = vmax.f32 %v242_v60, %v243_v33  ;;  %v251_v23 = vmax.f32 %v249_v18, %v250_v54  ;;  %v258_v13 = vmax.f32 %v256_v20, %v257_v29 }
  0x36   :  { %v265_v37 = vmax.f32 %v263_v28, %v264_v55  ;;  %v272_v11 = vmax.f32 %v270_v44, %v271_v61  ;;  %v279_v34 = vmax.f32 %v277_v39, %v278_v21  ;;  %v302_v8 = vsel %vm286_vm3, %v7322_v41, 6 }
  0x37   :  { %v303_v7 = vsel %vm287_vm4, %v7322_v41, 6  ;;  %v316_v38 = vsel %vm7159_vm0, %v300_v51, 2147483647  ;;  %v326_v6 = vsel %vm7159_vm0, %v301_v63, 2147483647  ;;  %v210_v58 = vrot.slane %v209_v19, 1 }
  0x38   :  { %v217_v59 = vrot.slane %v216_v30, 1  ;;  %v224_v5 = vrot.slane %v223_v56, 1  ;;  %v231_v42 = vrot.slane %v230_v31, 1  ;;  %v4048_v10 = vmax.f32 %v202_v35, %v203_v22 }
  0x39   :  { %v238_v4 = vrot.slane %v237_v0, 1  ;;  %v245_v60 = vrot.slane %v244_v26, 1  ;;  %v252_v18 = vrot.slane %v251_v23, 1  ;;  %v317_v20 = vrot.slane %v316_v38, 4 }
  0x3a   :  { %7323 = vst [vmem:[#allocation13_spill] sm:$0xff] %v4048_v10  ;;  %v327_v44 = vrot.slane %v326_v6, 4  ;;  %v336_v39 = vsel %vm7159_vm0, %v302_v8, 2147483647  ;;  %v346_v28 = vsel %vm7159_vm0, %v303_v7, 2147483647  ;;  %v4052_v54 = vmax.f32 %v209_v19, %v210_v58 }
  0x3b   :  { %v259_v1 = vrot.slane %v258_v13, 1  ;;  %v266_v14 = vrot.slane %v265_v37, 1  ;;  %v273_v47 = vrot.slane %v272_v11, 1  ;;  %v280_v33 = vrot.slane %v279_v34, 1 }
  0x3c   :  { %7324 = vst [vmem:[#allocation55_spill] sm:$0xff] %v4052_v54  ;;  %v4054_v29 = vmax.f32 %v216_v30, %v217_v59  ;;  %v4056_v55 = vmax.f32 %v223_v56, %v224_v5  ;;  %v4058_v35 = vmax.f32 %v230_v31, %v231_v42  ;;  %v4060_v61 = vmax.f32 %v237_v0, %v238_v4 }
  0x3d   :  { %vm288_vm5 = vcmp.eq.f32.partialorder %v3931_v32, %v4048_v10  ;;  %v337_v21 = vrot.slane %v336_v39, 4  ;;  %v347_v51 = vrot.slane %v346_v28, 4  ;;  %v4064_v63 = vmax.f32 %v244_v26, %v245_v60 }
  0x3e   :  { %7325 = vst [vmem:[#allocation56_spill] sm:$0xff] %v4054_v29  ;;  %7326 = vst [vmem:[#allocation57_spill] sm:$0xff] %v4056_v55  ;;  %v4066_v22 = vmax.f32 %v251_v23, %v252_v18  ;;  %vm318_vm6 = vcmp.lt.s32.totalorder %v316_v38, %v317_v20  ;;  %vm328_vm7 = vcmp.lt.s32.totalorder %v326_v6, %v327_v44  ;;  %v304_v0 = vsel %vm288_vm5, %v7322_v41, 6 }
  0x3f   :  { %7327 = vst [vmem:[#allocation58_spill] sm:$0xff] %v4058_v35  ;;  %7328 = vst [vmem:[#allocation59_spill] sm:$0xff] %v4060_v61  ;;  %v4068_v19 = vmax.f32 %v258_v13, %v259_v1  ;;  %v4070_v30 = vmax.f32 %v265_v37, %v266_v14  ;;  %v4072_v56 = vmax.f32 %v272_v11, %v273_v47  ;;  %v356_v37 = vsel %vm7159_vm0, %v304_v0, 2147483647 }
  0x40   :  { %7329 = vst [vmem:[#allocation60_spill] sm:$0xff] %v4064_v63  ;;  %7330 = vst [vmem:[#allocation61_spill] sm:$0xff] %v4066_v22  ;;  %v4074_v31 = vmax.f32 %v279_v34, %v280_v33  ;;  %vm289_vm8 = vcmp.eq.f32.partialorder %v3937_v15, %v4052_v54  ;;  %vm290_vm9 = vcmp.eq.f32.partialorder %v3943_v24, %v4054_v29  ;;  %vm7115_vm5 = vcmask 64517  }
  0x41   :  { %7331 = vst [vmem:[#allocation62_spill] sm:$0xff] %v4068_v19  ;;  %7332 = vst [vmem:[#allocation63_spill] sm:$0xff] %v4070_v30  ;;  %vm291_vm10 = vcmp.eq.f32.partialorder %v3949_v25, %v4056_v55  ;;  %v319_v26 = vsel %vm318_vm6, %v316_v38, %v317_v20  ;;  %v329_v23 = vsel %vm328_vm7, %v326_v6, %v327_v44  ;;  %v305_v13 = vsel %vm289_vm8, %v7322_v41, 6 }
  0x42   :  { %7333 = vst [vmem:[#allocation64_spill] sm:$0xff] %v4072_v56  ;;  %7334 = vst [vmem:[#allocation65_spill] sm:$0xff] %v4074_v31  ;;  %vm338_vm11 = vcmp.lt.s32.totalorder %v336_v39, %v337_v21  ;;  %vm348_vm12 = vcmp.lt.s32.totalorder %v346_v28, %v347_v51  ;;  %vm292_vm13 = vcmp.eq.f32.partialorder %v3955_v9, %v4058_v35  ;;  %v320_v11 = vrot.slane %v319_v26, 2 }
  0x43   :  { %vm293_vm14 = vcmp.eq.f32.partialorder %v3961_v43, %v4060_v61  ;;  %vm294_vm15 = vcmp.eq.f32.partialorder %v3967_v45, %v4064_v63  ;;  %vm295_vm1 = vcmp.eq.f32.partialorder %v3973_v46, %v4066_v22  ;;  %vm296_vm2 = vcmp.eq.f32.partialorder %v3979_v50, %v4068_v19 }
  0x44   :  { %vm297_vm3 = vcmp.eq.f32.partialorder %v3985_v52, %v4070_v30  ;;  %v330_v34 = vrot.slane %v329_v23, 2  ;;  %v339_v8 = vsel %vm338_vm11, %v336_v39, %v337_v21  ;;  %v349_v7 = vsel %vm348_vm12, %v346_v28, %v347_v51 }
  0x45   :  { %vm298_vm4 = vcmp.eq.f32.partialorder %v3995_v3, %v4072_v56  ;;  %v306_v38 = vsel %vm290_vm9, %v7322_v41, 6  ;;  %v307_v6 = vsel %vm291_vm10, %v7322_v41, 6  ;;  %v308_v58 = vsel %vm292_vm13, %v7322_v41, 6 }
  0x46   :  { %v309_v59 = vsel %vm293_vm14, %v7322_v41, 6  ;;  %v310_v5 = vsel %vm294_vm15, %v7322_v41, 6  ;;  %v311_v42 = vsel %vm295_vm1, %v7322_v41, 6  ;;  %v357_v4 = vrot.slane %v356_v37, 4 }
  0x47   :  { %v312_v60 = vsel %vm296_vm2, %v7322_v41, 6  ;;  %v340_v18 = vrot.slane %v339_v8, 2  ;;  %v350_v20 = vrot.slane %v349_v7, 2  ;;  %v366_v44 = vsel %vm7159_vm0, %v305_v13, 2147483647 }
  0x48   :  { %v313_v39 = vsel %vm297_vm3, %v7322_v41, 6  ;;  %v314_v28 = vsel %vm298_vm4, %v7322_v41, 6  ;;  %vm321_vm6 = vcmp.lt.s32.totalorder %v319_v26, %v320_v11  ;;  %vm331_vm7 = vcmp.lt.s32.totalorder %v329_v23, %v330_v34 }
  0x49   :  { %vm299_vm8 = vcmp.eq.f32.partialorder %v4003_v40, %v4074_v31  ;;  %v376_v1 = vsel %vm7159_vm0, %v306_v38, 2147483647  ;;  %v386_v14 = vsel %vm7159_vm0, %v307_v6, 2147483647  ;;  %v396_v47 = vsel %vm7159_vm0, %v308_v58, 2147483647 }
  0x4a   :  { %vm4135_vm9 = vcmp.lt.s32.totalorder %v356_v37, %v357_v4  ;;  %v367_v21 = vrot.slane %v366_v44, 4  ;;  %v406_v51 = vsel %vm7159_vm0, %v309_v59, 2147483647  ;;  %v416_v0 = vsel %vm7159_vm0, %v310_v5, 2147483647 }
  0x4b   :  { %v322_v13 = vsel %vm321_vm6, %v319_v26, %v320_v11  ;;  %v4141_v30 = vsel %vm331_vm7, %v329_v23, %v330_v34  ;;  %vm341_vm10 = vcmp.lt.s32.totalorder %v339_v8, %v340_v18  ;;  %vm351_vm11 = vcmp.lt.s32.totalorder %v349_v7, %v350_v20 }
  0x4c   :  { %v377_v56 = vrot.slane %v376_v1, 4  ;;  %v387_v38 = vrot.slane %v386_v14, 4  ;;  %v397_v19 = vrot.slane %v396_v47, 4  ;;  %v426_v6 = vsel %vm7159_vm0, %v311_v42, 2147483647 }
  0x4d   :  { %v315_v58 = vsel %vm299_vm8, %v7322_v41, 6  ;;  %v407_v22 = vrot.slane %v406_v51, 4  ;;  %v417_v63 = vrot.slane %v416_v0, 4  ;;  %v436_v59 = vsel %vm7159_vm0, %v312_v60, 2147483647 }
  0x4e   :  { %v323_v5 = vrot.slane %v322_v13, 1  ;;  %v4149_v26 = vsel %vm341_vm10, %v339_v8, %v340_v18  ;;  %v359_v23 = vsel %vm4135_vm9, %v356_v37, %v357_v4  ;;  %v4155_v11 = vsel %vm7115_vm5, %v7320_v49, -inf }
  0x4f   :  { %7337 = vst [vmem:[#allocation66_spill] sm:$0xff] %v4155_v11  ;;  %v4158_v42 = vsel %vm351_vm11, %v349_v7, %v350_v20  ;;  %vm368_vm12 = vcmp.lt.s32.totalorder %v366_v44, %v367_v21  ;;  %v427_v31 = vrot.slane %v426_v6, 4  ;;  %vm378_vm13 = vcmp.lt.s32.totalorder %v376_v1, %v377_v56 }
  0x50   :  { %vm388_vm14 = vcmp.lt.s32.totalorder %v386_v14, %v387_v38  ;;  %vm398_vm15 = vcmp.lt.s32.totalorder %v396_v47, %v397_v19  ;;  %v437_v60 = vrot.slane %v436_v59, 4  ;;  %vm408_vm1 = vcmp.lt.s32.totalorder %v406_v51, %v407_v22 }
  0x51   :  { %vm418_vm2 = vcmp.lt.s32.totalorder %v416_v0, %v417_v63  ;;  %v446_v37 = vsel %vm7159_vm0, %v313_v39, 2147483647  ;;  %v360_v18 = vrot.slane %v359_v23, 2  ;;  %v369_v33 = vsel %vm368_vm12, %v366_v44, %v367_v21 }
  0x52   :  { %vm428_vm3 = vcmp.lt.s32.totalorder %v426_v6, %v427_v31  ;;  %v379_v34 = vsel %vm378_vm13, %v376_v1, %v377_v56  ;;  %v389_v7 = vsel %vm388_vm14, %v386_v14, %v387_v38  ;;  %v399_v20 = vsel %vm398_vm15, %v396_v47, %v397_v19 }
  0x53   :  { %vm438_vm4 = vcmp.lt.s32.totalorder %v436_v59, %v437_v60  ;;  %v409_v61 = vsel %vm408_vm1, %v406_v51, %v407_v22  ;;  %v419_v35 = vsel %vm418_vm2, %v416_v0, %v417_v63  ;;  %v447_v55 = vrot.slane %v446_v37, 4 }
  0x54   :  { %v456_v29 = vsel %vm7159_vm0, %v314_v28, 2147483647  ;;  %vm4164_vm6 = vcmp.lt.s32.totalorder %v322_v13, %v323_v5  ;;  %v370_v54 = vrot.slane %v369_v33, 2  ;;  %v429_v39 = vsel %vm428_vm3, %v426_v6, %v427_v31 }
  0x55   :  { %v457_v10 = vrot.slane %v456_v29, 4  ;;  %v380_v4 = vrot.slane %v379_v34, 2  ;;  %v390_v16 = vrot.slane %v389_v7, 2  ;;  %v439_v44 = vsel %vm438_vm4, %v436_v59, %v437_v60 }
  0x56   :  { %vm448_vm7 = vcmp.lt.s32.totalorder %v446_v37, %v447_v55  ;;  %v7340_v56 = vrot.slane %v4141_v30, 1  ;;  %vm361_vm9 = vcmp.lt.s32.totalorder %v359_v23, %v360_v18  ;;  %v400_v63 = vrot.slane %v399_v20, 2 }
  0x57   :  { %v410_v19 = vrot.slane %v409_v61, 2  ;;  %v420_v28 = vrot.slane %v419_v35, 2  ;;  %v7343_v1 = vrot.slane %v4149_v26, 1  ;;  %v430_v14 = vrot.slane %v429_v39, 2 }
  0x58   :  { %vm4171_vm8 = vcmp.lt.s32.totalorder %v4141_v30, %v7340_v56  ;;  %v449_v47 = vsel %vm448_vm7, %v446_v37, %v447_v55  ;;  %vm458_vm11 = vcmp.lt.s32.totalorder %v456_v29, %v457_v10  ;;  %v466_v21 = vsel %vm7159_vm0, %v315_v58, 2147483647 }
  0x59   :  { %vm4178_vm10 = vcmp.lt.s32.totalorder %v4149_v26, %v7343_v1  ;;  %v4185_v51 = vsel %vm4164_vm6, %v322_v13, %v323_v5  ;;  %v440_v0 = vrot.slane %v439_v44, 2  ;;  %v459_v38 = vsel %vm458_vm11, %v456_v29, %v457_v10 }
  0x5a   :  { %v467_v6 = vrot.slane %v466_v21, 4  ;;  %v362_v59 = vsel %vm361_vm9, %v359_v23, %v360_v18  ;;  %vm371_vm12 = vcmp.lt.s32.totalorder %v369_v33, %v370_v54  ;;  %vm381_vm13 = vcmp.lt.s32.totalorder %v379_v34, %v380_v4 }
  0x5b   :  { %vm391_vm14 = vcmp.lt.s32.totalorder %v389_v7, %v390_v16  ;;  %vm401_vm15 = vcmp.lt.s32.totalorder %v399_v20, %v400_v63  ;;  %vm411_vm1 = vcmp.lt.s32.totalorder %v409_v61, %v410_v19  ;;  %v450_v60 = vrot.slane %v449_v47, 2 }
  0x5c   :  { %vm468_vm2 = vcmp.lt.s32.totalorder %v466_v21, %v467_v6  ;;  %vm421_vm3 = vcmp.lt.s32.totalorder %v419_v35, %v420_v28  ;;  %vm431_vm4 = vcmp.lt.s32.totalorder %v429_v39, %v430_v14  ;;  %v460_v55 = vrot.slane %v459_v38, 2 }
  0x5d   :  { %v469_v37 = vsel %vm468_vm2, %v466_v21, %v467_v6  ;;  %v372_v58 = vsel %vm371_vm12, %v369_v33, %v370_v54  ;;  %v382_v56 = vsel %vm381_vm13, %v379_v34, %v380_v4  ;;  %vm441_vm7 = vcmp.lt.s32.totalorder %v439_v44, %v440_v0 }
  0x5e   :  { %v470_v13 = vrot.slane %v469_v37, 2  ;;  %v7346_v5 = vrot.slane %v4158_v42, 1  ;;  %v392_v29 = vsel %vm391_vm14, %v389_v7, %v390_v16  ;;  %v402_v23 = vsel %vm401_vm15, %v399_v20, %v400_v63 }
  0x5f   :  { %v412_v8 = vsel %vm411_vm1, %v409_v61, %v410_v19  ;;  %v363_v18 = vrot.slane %v362_v59, 1  ;;  %v422_v1 = vsel %vm421_vm3, %v419_v35, %v420_v28  ;;  %v432_v12 = vsel %vm431_vm4, %v429_v39, %v430_v14 }
  0x60   :  { %vm4190_vm6 = vcmp.lt.s32.totalorder %v4158_v42, %v7346_v5  ;;  %vm451_vm9 = vcmp.lt.s32.totalorder %v449_v47, %v450_v60  ;;  %v373_v57 = vrot.slane %v372_v58, 1  ;;  %v383_v21 = vrot.slane %v382_v56, 1 }
  0x61   :  { %v442_v54 = vsel %vm441_vm7, %v439_v44, %v440_v0  ;;  %vm461_vm11 = vcmp.lt.s32.totalorder %v459_v38, %v460_v55  ;;  %v393_v34 = vrot.slane %v392_v29, 1  ;;  %v403_v4 = vrot.slane %v402_v23, 1 }
  0x62   :  { %v413_v33 = vrot.slane %v412_v8, 1  ;;  %vm471_vm12 = vcmp.lt.s32.totalorder %v469_v37, %v470_v13  ;;  %v7349_v6 = vrot.slane %v4141_v30, 1  ;;  %v423_v61 = vrot.slane %v422_v1, 1 }
  0x63   :  { %v433_v7 = vrot.slane %v432_v12, 1  ;;  %v452_v35 = vsel %vm451_vm9, %v449_v47, %v450_v60  ;;  %v7350_v20 = vrot.slane %v4149_v26, 1  ;;  %vm364_vm13 = vcmp.lt.s32.totalorder %v362_v59, %v363_v18 }
  0x64   :  { %v4199_v16 = vsel %vm4171_vm8, %v4141_v30, %v7349_v6  ;;  %v443_v44 = vrot.slane %v442_v54, 1  ;;  %v462_v63 = vsel %vm461_vm11, %v459_v38, %v460_v55  ;;  %v7351_v19 = vmov %v7346_v5  ;;  %v7358_v6 = vld [vmem:[#allocation8_spill] sm:$0xff] }
  0x65   :  { %v4206_v39 = vsel %vm4178_vm10, %v4149_v26, %v7350_v20  ;;  %v4213_v30 = vsel %vm4190_vm6, %v4158_v42, %v7351_v19  ;;  %vm374_vm8 = vcmp.lt.s32.totalorder %v372_v58, %v373_v57  ;;  %vm384_vm14 = vcmp.lt.s32.totalorder %v382_v56, %v383_v21  ;;  %v7360_v20 = vld [vmem:[#allocation10_spill] sm:$0xff]  ;;  %v7361_v19 = vld [vmem:[#allocation11_spill] sm:$0xff] }
  0x66   :  { %v472_v22 = vsel %vm471_vm12, %v469_v37, %v470_v13  ;;  %vm394_vm15 = vcmp.lt.s32.totalorder %v392_v29, %v393_v34  ;;  %vm404_vm1 = vcmp.lt.s32.totalorder %v402_v23, %v403_v4  ;;  %vm414_vm2 = vcmp.lt.s32.totalorder %v412_v8, %v413_v33 }
  0x67   :  { %v453_v28 = vrot.slane %v452_v35, 1  ;;  %v4215_v31 = vsel %vm364_vm13, %v362_v59, %v363_v18  ;;  %vm424_vm10 = vcmp.lt.s32.totalorder %v422_v1, %v423_v61  ;;  %vm434_vm3 = vcmp.lt.s32.totalorder %v432_v12, %v433_v7  ;;  %v7355_v18 = vld [vmem:[#allocation5_spill] sm:$0xff] }
  0x68   :  { %v463_v26 = vrot.slane %v462_v63, 1  ;;  %v4217_v14 = vsel %vm374_vm8, %v372_v58, %v373_v57  ;;  %v4219_v47 = vsel %vm384_vm14, %v382_v56, %v383_v21  ;;  %vm444_vm4 = vcmp.lt.s32.totalorder %v442_v54, %v443_v44  ;;  %v7353_v56 = vld [vmem:[#allocation3_spill] sm:$0xff] }
  0x69   :  { %v473_v0 = vrot.slane %v472_v22, 1  ;;  %v4221_v42 = vsel %vm394_vm15, %v392_v29, %v393_v34  ;;  %v4223_v38 = vsel %vm404_vm1, %v402_v23, %v403_v4  ;;  %v4225_v60 = vsel %vm414_vm2, %v412_v8, %v413_v33  ;;  %v7354_v23 = vld [vmem:[#allocation4_spill] sm:$0xff]  ;;  %v7357_v4 = vld [vmem:[#allocation7_spill] sm:$0xff] }
  0x6a   :  { %vm476_vm7 = vcmp.eq.s32.totalorder %v7322_v41, %v4185_v51  ;;  %v4229_v59 = vsel %vm424_vm10, %v422_v1, %v423_v61  ;;  %v4231_v55 = vsel %vm434_vm3, %v432_v12, %v433_v7  ;;  %vm454_vm6 = vcmp.lt.s32.totalorder %v452_v35, %v453_v28  ;;  %v7352_v12 = vld [vmem:[#allocation2_spill] sm:$0xff]  ;;  %v7359_v7 = vld [vmem:[#allocation9_spill] sm:$0xff] }
  0x6b   :  { %vm477_vm9 = vcmp.eq.s32.totalorder %v7322_v41, %v4199_v16  ;;  %v4235_v57 = vsel %vm444_vm4, %v442_v54, %v443_v44  ;;  %vm464_vm11 = vcmp.lt.s32.totalorder %v462_v63, %v463_v26  ;;  %vm478_vm12 = vcmp.eq.s32.totalorder %v7322_v41, %v4206_v39  ;;  %v7356_v54 = vld [vmem:[#allocation6_spill] sm:$0xff]  ;;  %v3460_v16 = vld [vmem:[%s7049_s0 + $0x130] sm:$0xff] }
  0x6c   :  { %vm7116_vm13 = vcmp.eq.s32.totalorder %v7322_v41, %v4213_v30  ;;  %vm474_vm8 = vcmp.lt.s32.totalorder %v472_v22, %v473_v0  ;;  %vm480_vm14 = vcmp.eq.s32.totalorder %v7322_v41, %v4215_v31  ;;  %vm481_vm15 = vcmp.eq.s32.totalorder %v7322_v41, %v4217_v14 }
  0x6d   :  { %v492_v37 = vsel %vm476_vm7, %v7352_v12, 0.0  ;;  %v4249_v58 = vsel %vm454_vm6, %v452_v35, %v453_v28  ;;  %vm482_vm1 = vcmp.eq.s32.totalorder %v7322_v41, %v4219_v47  ;;  %vm483_vm2 = vcmp.eq.s32.totalorder %v7322_v41, %v4221_v42  ;;  %v7362_v12 = vld [vmem:[#allocation12_spill] sm:$0xff] }
  0x6e   :  { %v493_v13 = vsel %vm477_vm9, %v7353_v56, 0.0  ;;  %v4259_v5 = vsel %vm464_vm11, %v462_v63, %v463_v26  ;;  %vm484_vm10 = vcmp.eq.s32.totalorder %v7322_v41, %v4223_v38  ;;  %vm485_vm3 = vcmp.eq.s32.totalorder %v7322_v41, %v4225_v60  ;;  %v7363_v56 = vld [vmem:[#allocation14_spill] sm:$0xff]  ;;  %v3468_v38 = vld [vmem:[%s7049_s0 + $0x1b0] sm:$0xff] }
  0x6f   :  { %vm486_vm4 = vcmp.eq.s32.totalorder %v7322_v41, %v4229_v59  ;;  %v4267_v10 = vsel %vm474_vm8, %v472_v22, %v473_v0  ;;  %vm487_vm6 = vcmp.eq.s32.totalorder %v7322_v41, %v4231_v55  ;;  %vm488_vm5 = vcmp.eq.s32.totalorder %v7322_v41, %v4235_v57  ;;  %v3470_v55 = vld [vmem:[%s7049_s0 + $0x1d0] sm:$0xff] }
  0x70   :  { %v508_v29 = vsel %vm7159_vm0, %v492_v37, 0.0  ;;  %vm489_vm11 = vcmp.eq.s32.totalorder %v7322_v41, %v4249_v58  ;;  %v494_v8 = vsel %vm478_vm12, %v7354_v23, 0.0  ;;  %v495_v1 = vsel %vm7116_vm13, %v7355_v18, 0.0  ;;  %v7364_v23 = vld [vmem:[#allocation15_spill] sm:$0xff] }
  0x71   :  { %v515_v21 = vsel %vm7159_vm0, %v493_v13, 0.0  ;;  %vm490_vm8 = vcmp.eq.s32.totalorder %v7322_v41, %v4259_v5  ;;  %v496_v34 = vsel %vm480_vm14, %v7356_v54, 0.0  ;;  %v497_v33 = vsel %vm481_vm15, %v7357_v4, 0.0  ;;  %v7366_v4 = vld [vmem:[#allocation17_spill] sm:$0xff] }
  0x72   :  { %v498_v61 = vsel %vm482_vm1, %v7358_v6, 0.0  ;;  %vm491_vm13 = vcmp.eq.s32.totalorder %v7322_v41, %v4267_v10  ;;  %v499_v35 = vsel %vm483_vm2, %v7359_v7, 0.0  ;;  %v500_v44 = vsel %vm484_vm10, %v7360_v20, 0.0 }
  0x73   :  { %v509_v63 = vrot.slane %v508_v29, 4  ;;  %v501_v22 = vsel %vm485_vm3, %v7361_v19, 0.0  ;;  %v516_v28 = vrot.slane %v515_v21, 4  ;;  %v522_v26 = vsel %vm7159_vm0, %v494_v8, 0.0  ;;  %v7365_v8 = vld [vmem:[#allocation16_spill] sm:$0xff] }
  0x74   :  { %v529_v0 = vsel %vm7159_vm0, %v495_v1, 0.0  ;;  %v502_v37 = vsel %vm486_vm4, %v7362_v12, 0.0  ;;  %v503_v13 = vsel %vm487_vm6, %v7363_v56, 0.0  ;;  %v504_v18 = vsel %vm488_vm5, %v7364_v23, 0.0 }
  0x75   :  { %v536_v54 = vsel %vm7159_vm0, %v496_v34, 0.0  ;;  %v505_v1 = vsel %vm489_vm11, %v7365_v8, 0.0  ;;  %v506_v6 = vsel %vm490_vm8, %v7366_v4, 0.0  ;;  %v543_v7 = vsel %vm7159_vm0, %v497_v33, 0.0  ;;  %v7367_v34 = vld [vmem:[#allocation18_spill] sm:$0xff] }
  0x76   :  { %v550_v20 = vsel %vm7159_vm0, %v498_v61, 0.0  ;;  %v510_v19 = vadd.f32 %v509_v63, %v508_v29  ;;  %v523_v12 = vrot.slane %v522_v26, 4  ;;  %v530_v56 = vrot.slane %v529_v0, 4 }
  0x77   :  { %v557_v23 = vsel %vm7159_vm0, %v499_v35, 0.0  ;;  %v507_v53 = vsel %vm491_vm13, %v7367_v34, 0.0  ;;  %v517_v8 = vadd.f32 %v516_v28, %v515_v21  ;;  %v537_v49 = vrot.slane %v536_v54, 4 }
  0x78   :  { %v564_v40 = vsel %vm7159_vm0, %v500_v44, 0.0  ;;  %v544_v3 = vrot.slane %v543_v7, 4  ;;  %v551_v4 = vrot.slane %v550_v20, 4  ;;  %v571_v33 = vsel %vm7159_vm0, %v501_v22, 0.0 }
  0x79   :  { %v578_v61 = vsel %vm7159_vm0, %v502_v37, 0.0  ;;  %v558_v29 = vrot.slane %v557_v23, 4  ;;  %v585_v63 = vsel %vm7159_vm0, %v503_v13, 0.0  ;;  %v592_v35 = vsel %vm7159_vm0, %v504_v18, 0.0 }
  0x7a   :  { %v599_v52 = vsel %vm7159_vm0, %v505_v1, 0.0  ;;  %v511_v50 = vrot.slane %v510_v19, 2  ;;  %v524_v46 = vadd.f32 %v523_v12, %v522_v26  ;;  %v531_v34 = vadd.f32 %v530_v56, %v529_v0 }
  0x7b   :  { %v565_v21 = vrot.slane %v564_v40, 4  ;;  %v538_v28 = vadd.f32 %v537_v49, %v536_v54  ;;  %v572_v45 = vrot.slane %v571_v33, 4  ;;  %v579_v44 = vrot.slane %v578_v61, 4 }
  0x7c   :  { %v606_v43 = vsel %vm7159_vm0, %v506_v6, 0.0  ;;  %v586_v9 = vrot.slane %v585_v63, 4  ;;  %v593_v22 = vrot.slane %v592_v35, 4  ;;  %v600_v25 = vrot.slane %v599_v52, 4 }
  0x7d   :  { %v613_v37 = vsel %vm7159_vm0, %v507_v53, 0.0  ;;  %v518_v24 = vrot.slane %v517_v8, 2  ;;  %v545_v13 = vadd.f32 %v544_v3, %v543_v7  ;;  %v552_v36 = vadd.f32 %v551_v4, %v550_v20 }
  0x7e   :  { %v559_v18 = vadd.f32 %v558_v29, %v557_v23  ;;  %v525_v15 = vrot.slane %v524_v46, 2  ;;  %v532_v1 = vrot.slane %v531_v34, 2  ;;  %v566_v48 = vadd.f32 %v565_v21, %v564_v40 }
  0x7f   :  { %v607_v26 = vrot.slane %v606_v43, 4  ;;  %v512_v0 = vadd.f32 %v511_v50, %v510_v19  ;;  %v573_v12 = vadd.f32 %v572_v45, %v571_v33  ;;  %v580_v49 = vadd.f32 %v579_v44, %v578_v61 }
  0x80   :  { %v614_v54 = vrot.slane %v613_v37, 4  ;;  %v539_v56 = vrot.slane %v538_v28, 2  ;;  %v587_v32 = vadd.f32 %v586_v9, %v585_v63  ;;  %v594_v6 = vadd.f32 %v593_v22, %v592_v35 }
  0x81   :  { %v601_v2 = vadd.f32 %v600_v25, %v599_v52  ;;  %v519_v62 = vadd.f32 %v518_v24, %v517_v8  ;;  %v546_v17 = vrot.slane %v545_v13, 2  ;;  %v553_v27 = vrot.slane %v552_v36, 2 }
  0x82   :  { %v560_v53 = vrot.slane %v559_v18, 2  ;;  %v526_v11 = vadd.f32 %v525_v15, %v524_v46  ;;  %v533_v3 = vadd.f32 %v532_v1, %v531_v34  ;;  %v567_v7 = vrot.slane %v566_v48, 2 }
  0x83   :  { %v608_v20 = vadd.f32 %v607_v26, %v606_v43  ;;  %v513_v23 = vrot.slane %v512_v0, 1  ;;  %v574_v4 = vrot.slane %v573_v12, 2  ;;  %v581_v40 = vrot.slane %v580_v49, 2 }
  0x84   :  { %v615_v29 = vadd.f32 %v614_v54, %v613_v37  ;;  %v540_v50 = vadd.f32 %v539_v56, %v538_v28  ;;  %v588_v45 = vrot.slane %v587_v32, 2  ;;  %v595_v19 = vrot.slane %v594_v6, 2 }
  0x85   :  { %v602_v33 = vrot.slane %v601_v2, 2  ;;  %v520_v61 = vrot.slane %v519_v62, 1  ;;  %v547_v9 = vadd.f32 %v546_v17, %v545_v13  ;;  %v554_v63 = vadd.f32 %v553_v27, %v552_v36 }
  0x86   :  { %v561_v25 = vadd.f32 %v560_v53, %v559_v18  ;;  %v527_v24 = vrot.slane %v526_v11, 1  ;;  %v534_v52 = vrot.slane %v533_v3, 1  ;;  %v568_v8 = vadd.f32 %v567_v7, %v566_v48 }
  0x87   :  { %v609_v35 = vrot.slane %v608_v20, 2  ;;  %v4351_v15 = vadd.f32 %v513_v23, %v512_v0  ;;  %v575_v46 = vadd.f32 %v574_v4, %v573_v12  ;;  %v582_v43 = vadd.f32 %v581_v40, %v580_v49  ;;  %v3459_v23 = vld [vmem:[%s7049_s0 + $0x120] sm:$0xff] }
  0x88   :  { %v616_v34 = vrot.slane %v615_v29, 2  ;;  %v541_v21 = vrot.slane %v540_v50, 1  ;;  %v589_v44 = vadd.f32 %v588_v45, %v587_v32  ;;  %v596_v22 = vadd.f32 %v595_v19, %v594_v6  ;;  %v3457_v32 = vld [vmem:[%s7049_s0 + $0x100] sm:$0xff] }
  0x89   :  { %7368 = vst [vmem:[#allocation2_spill] sm:$0xff] %v4351_v15  ;;  %v603_v28 = vadd.f32 %v602_v33, %v601_v2  ;;  %v4353_v37 = vadd.f32 %v520_v61, %v519_v62  ;;  %v548_v1 = vrot.slane %v547_v9, 1  ;;  %v555_v26 = vrot.slane %v554_v63, 1 }
  0x8a   :  { %v562_v17 = vrot.slane %v561_v25, 1  ;;  %v4355_v36 = vadd.f32 %v527_v24, %v526_v11  ;;  %v4357_v27 = vadd.f32 %v534_v52, %v533_v3  ;;  %v569_v48 = vrot.slane %v568_v8, 1  ;;  %v3458_v3 = vld [vmem:[%s7049_s0 + $0x110] sm:$0xff] }
  0x8b   :  { %7369 = vst [vmem:[#allocation3_spill] sm:$0xff] %v4353_v37  ;;  %v610_v13 = vadd.f32 %v609_v35, %v608_v20  ;;  %v576_v18 = vrot.slane %v575_v46, 1  ;;  %v583_v0 = vrot.slane %v582_v43, 1  ;;  %v617_v12 = vadd.f32 %v616_v34, %v615_v29 }
  0x8c   :  { %7370 = vst [vmem:[#allocation4_spill] sm:$0xff] %v4355_v36  ;;  %7371 = vst [vmem:[#allocation5_spill] sm:$0xff] %v4357_v27  ;;  %v620_v2 = vsel %vm476_vm7, %v3457_v32, 0.0  ;;  %v4365_v62 = vadd.f32 %v541_v21, %v540_v50  ;;  %v590_v49 = vrot.slane %v589_v44, 1  ;;  %v597_v11 = vrot.slane %v596_v22, 1 }
  0x8d   :  { %v604_v54 = vrot.slane %v603_v28, 1  ;;  %v4367_v56 = vadd.f32 %v548_v1, %v547_v9  ;;  %v4369_v6 = vadd.f32 %v555_v26, %v554_v63  ;;  %v4371_v53 = vadd.f32 %v562_v17, %v561_v25  ;;  %v3461_v63 = vld [vmem:[%s7049_s0 + $0x140] sm:$0xff] }
  0x8e   :  { %7372 = vst [vmem:[#allocation6_spill] sm:$0xff] %v4365_v62  ;;  %v621_v51 = vsel %vm477_vm9, %v3458_v3, 0.0  ;;  %v4379_v7 = vadd.f32 %v569_v48, %v568_v8  ;;  %v611_v20 = vrot.slane %v610_v13, 1  ;;  %v622_v4 = vsel %vm478_vm12, %v3459_v23, 0.0  ;;  %v3467_v1 = vld [vmem:[%s7049_s0 + $0x1a0] sm:$0xff] }
  0x8f   :  { %7373 = vst [vmem:[#allocation7_spill] sm:$0xff] %v4367_v56  ;;  %7374 = vst [vmem:[#allocation8_spill] sm:$0xff] %v4369_v6  ;;  %v636_v40 = vsel %vm7159_vm0, %v620_v2, 0.0  ;;  %v4388_v29 = vadd.f32 %v576_v18, %v575_v46  ;;  %v4390_v50 = vadd.f32 %v583_v0, %v582_v43  ;;  %v618_v45 = vrot.slane %v617_v12, 1  ;;  %v3463_v46 = vld [vmem:[%s7049_s0 + $0x160] sm:$0xff]  ;;  %v3464_v43 = vld [vmem:[%s7049_s0 + $0x170] sm:$0xff] }
  0x90   :  { %7375 = vst [vmem:[#allocation9_spill] sm:$0xff] %v4371_v53  ;;  %7376 = vst [vmem:[#allocation10_spill] sm:$0xff] %v4379_v7  ;;  %vm7379_vm7 = vcmp.eq.s32.totalorder %v7322_v41, %v4213_v30  ;;  %v4398_v33 = vadd.f32 %v590_v49, %v589_v44  ;;  %v4400_v61 = vadd.f32 %v597_v11, %v596_v22  ;;  %v643_v9 = vsel %vm7159_vm0, %v621_v51, 0.0  ;;  %v3462_v30 = vld [vmem:[%s7049_s0 + $0x150] sm:$0xff]  ;;  %v3465_v44 = vld [vmem:[%s7049_s0 + $0x180] sm:$0xff] }
  0x91   :  { %7377 = vst [vmem:[#allocation11_spill] sm:$0xff] %v4388_v29  ;;  %7378 = vst [vmem:[#allocation12_spill] sm:$0xff] %v4390_v50  ;;  %v623_v19 = vsel %vm7379_vm7, %v3460_v16, 0.0  ;;  %v4402_v39 = vadd.f32 %v604_v54, %v603_v28  ;;  %v624_v25 = vsel %vm480_vm14, %v3461_v63, 0.0  ;;  %v625_v24 = vsel %vm481_vm15, %v3462_v30, 0.0  ;;  %v3466_v22 = vld [vmem:[%s7049_s0 + $0x190] sm:$0xff] }
  0x92   :  { %7380 = vst [vmem:[#allocation14_spill] sm:$0xff] %v4398_v33  ;;  %7381 = vst [vmem:[#allocation15_spill] sm:$0xff] %v4400_v61  ;;  %v637_v52 = vrot.slane %v636_v40, 4  ;;  %v650_v8 = vsel %vm7159_vm0, %v622_v4, 0.0  ;;  %v4418_v35 = vadd.f32 %v611_v20, %v610_v13  ;;  %v626_v31 = vsel %vm482_vm1, %v3463_v46, 0.0  ;;  %v3469_v13 = vld [vmem:[%s7049_s0 + $0x1c0] sm:$0xff] }
  0x93   :  { %7382 = vst [vmem:[#allocation16_spill] sm:$0xff] %v4402_v39  ;;  %v627_v14 = vsel %vm483_vm2, %v3464_v43, 0.0  ;;  %v657_v34 = vsel %vm7159_vm0, %v623_v19, 0.0  ;;  %v4433_v21 = vadd.f32 %v618_v45, %v617_v12  ;;  %v628_v47 = vsel %vm484_vm10, %v3465_v44, 0.0  ;;  %v3471_v2 = vld [vmem:[%s7049_s0 + $0x1e0] sm:$0xff]  ;;  %v3472_v54 = vld [vmem:[%s7049_s0 + $0x1f0] sm:$0xff] }
  0x94   :  { %7383 = vst [vmem:[#allocation17_spill] sm:$0xff] %v4418_v35  ;;  %v629_v42 = vsel %vm485_vm3, %v3466_v22, 0.0  ;;  %v644_v28 = vrot.slane %v643_v9, 4  ;;  %v630_v26 = vsel %vm486_vm4, %v3467_v1, 0.0  ;;  %v631_v17 = vsel %vm487_vm6, %v3468_v38, 0.0  ;;  %v7427_v39 = vld [vmem:[#allocation40_spill] sm:$0xff] }
  0x95   :  { %7384 = vst [vmem:[#allocation18_spill] sm:$0xff] %v4433_v21  ;;  %v651_v48 = vrot.slane %v650_v8, 4  ;;  %v664_v60 = vsel %vm7159_vm0, %v624_v25, 0.0  ;;  %v632_v59 = vsel %vm488_vm5, %v3469_v13, 0.0  ;;  %v638_v18 = vadd.f32 %v637_v52, %v636_v40  ;;  %v7432_v61 = vld [vmem:[#allocation43_spill] sm:$0xff]  ;;  %v7435_v29 = vld [vmem:[#allocation45_spill] sm:$0xff] }
  0x96   :  { %v658_v0 = vrot.slane %v657_v34, 4  ;;  %v671_v12 = vsel %vm7159_vm0, %v625_v24, 0.0  ;;  %v633_v32 = vsel %vm489_vm11, %v3470_v55, 0.0  ;;  %v634_v57 = vsel %vm490_vm8, %v3471_v2, 0.0  ;;  %v7438_v6 = vld [vmem:[#allocation47_spill] sm:$0xff] }
  0x97   :  { %v678_v49 = vsel %vm7159_vm0, %v626_v31, 0.0  ;;  %v685_v11 = vsel %vm7159_vm0, %v627_v14, 0.0  ;;  %v635_v58 = vsel %vm491_vm13, %v3472_v54, 0.0  ;;  %v645_v3 = vadd.f32 %v644_v28, %v643_v9 }
  0x98   :  { %v665_v51 = vrot.slane %v664_v60, 4  ;;  %v692_v20 = vsel %vm7159_vm0, %v628_v47, 0.0  ;;  %v652_v23 = vadd.f32 %v651_v48, %v650_v8  ;;  %v672_v4 = vrot.slane %v671_v12, 4 }
  0x99   :  { %v699_v5 = vsel %vm7159_vm0, %v629_v42, 0.0  ;;  %v706_v40 = vsel %vm7159_vm0, %v630_v26, 0.0  ;;  %v639_v45 = vrot.slane %v638_v18, 2  ;;  %v659_v16 = vadd.f32 %v658_v0, %v657_v34 }
  0x9a   :  { %v679_v19 = vrot.slane %v678_v49, 4  ;;  %v686_v63 = vrot.slane %v685_v11, 4  ;;  %v693_v25 = vrot.slane %v692_v20, 4  ;;  %v713_v30 = vsel %vm7159_vm0, %v631_v17, 0.0 }
  0x9b   :  { %v720_v10 = vsel %vm7159_vm0, %v632_v59, 0.0  ;;  %v727_v9 = vsel %vm7159_vm0, %v633_v32, 0.0  ;;  %v646_v24 = vrot.slane %v645_v3, 2  ;;  %v700_v52 = vrot.slane %v699_v5, 4 }
  0x9c   :  { %v707_v46 = vrot.slane %v706_v40, 4  ;;  %v734_v8 = vsel %vm7159_vm0, %v634_v57, 0.0  ;;  %v653_v31 = vrot.slane %v652_v23, 2  ;;  %v666_v43 = vadd.f32 %v665_v51, %v664_v60 }
  0x9d   :  { %v673_v14 = vadd.f32 %v672_v4, %v671_v12  ;;  %v741_v44 = vsel %vm7159_vm0, %v635_v58, 0.0  ;;  %v660_v34 = vrot.slane %v659_v16, 2  ;;  %v714_v47 = vrot.slane %v713_v30, 4 }
  0x9e   :  { %v721_v22 = vrot.slane %v720_v10, 4  ;;  %v728_v42 = vrot.slane %v727_v9, 4  ;;  %v680_v28 = vadd.f32 %v679_v19, %v678_v49  ;;  %v687_v1 = vadd.f32 %v686_v63, %v685_v11 }
  0x9f   :  { %v694_v26 = vadd.f32 %v693_v25, %v692_v20  ;;  %v735_v38 = vrot.slane %v734_v8, 4  ;;  %v640_v17 = vadd.f32 %v639_v45, %v638_v18  ;;  %v701_v48 = vadd.f32 %v700_v52, %v699_v5 }
  0xa0   :  { %v708_v13 = vadd.f32 %v707_v46, %v706_v40  ;;  %v742_v59 = vrot.slane %v741_v44, 4  ;;  %vm7204_vm5 = vcmask 59392   ;;  %v647_v0 = vadd.f32 %v646_v24, %v645_v3 }
  0xa1   :  { %v654_v55 = vadd.f32 %v653_v31, %v652_v23  ;;  %v667_v32 = vrot.slane %v666_v43, 2  ;;  %v674_v60 = vrot.slane %v673_v14, 2  ;;  %v661_v12 = vadd.f32 %v660_v34, %v659_v16 }
  0xa2   :  { %v715_v2 = vadd.f32 %v714_v47, %v713_v30  ;;  %v722_v57 = vadd.f32 %v721_v22, %v720_v10  ;;  %v729_v54 = vadd.f32 %v728_v42, %v727_v9  ;;  %v681_v58 = vrot.slane %v680_v28, 2  ;;  %v7387_v22 = vld [vmem:[#allocation23_spill] sm:$0xff] }
  0xa3   :  { %v688_v51 = vrot.slane %v687_v1, 2  ;;  %v695_v4 = vrot.slane %v694_v26, 2  ;;  %v736_v49 = vadd.f32 %v735_v38, %v734_v8  ;;  %v641_v11 = vrot.slane %v640_v17, 1 }
  0xa4   :  { %v702_v20 = vrot.slane %v701_v48, 2  ;;  %v709_v19 = vrot.slane %v708_v13, 2  ;;  %v743_v18 = vadd.f32 %v742_v59, %v741_v44  ;;  %v648_v5 = vrot.slane %v647_v0, 1 }
  0xa5   :  { %v655_v40 = vrot.slane %v654_v55, 1  ;;  %v668_v45 = vadd.f32 %v667_v32, %v666_v43  ;;  %v675_v63 = vadd.f32 %v674_v60, %v673_v14  ;;  %v662_v3 = vrot.slane %v661_v12, 1  ;;  %v7389_v60 = vld [vmem:[#allocation66_spill] sm:$0xff] }
  0xa6   :  { %v716_v23 = vrot.slane %v715_v2, 2  ;;  %v723_v25 = vrot.slane %v722_v57, 2  ;;  %v730_v24 = vrot.slane %v729_v54, 2  ;;  %v682_v16 = vadd.f32 %v681_v58, %v680_v28  ;;  %v7390_v58 = vld [vmem:[#allocation24_spill] sm:$0xff] }
  0xa7   :  { %v689_v30 = vadd.f32 %v688_v51, %v687_v1  ;;  %v696_v10 = vadd.f32 %v695_v4, %v694_v26  ;;  %v737_v9 = vrot.slane %v736_v49, 2  ;;  %v4495_v52 = vadd.f32 %v641_v11, %v640_v17  ;;  %v7392_v4 = vld [vmem:[#allocation25_spill] sm:$0xff] }
  0xa8   :  { %v703_v46 = vadd.f32 %v702_v20, %v701_v48  ;;  %v710_v8 = vadd.f32 %v709_v19, %v708_v13  ;;  %v744_v31 = vrot.slane %v743_v18, 2  ;;  %v4497_v34 = vadd.f32 %v648_v5, %v647_v0 }
  0xa9   :  { %7385 = vst [vmem:[#allocation67_spill] sm:$0xff] %v4495_v52  ;;  %v669_v44 = vrot.slane %v668_v45, 1  ;;  %v676_v47 = vrot.slane %v675_v63, 1  ;;  %v751_v43 = vsel %vm7204_vm5, %v7387_v22, -inf  ;;  %v4501_v14 = vadd.f32 %v655_v40, %v654_v55  ;;  %v7393_v55 = vld [vmem:[#allocation26_spill] sm:$0xff] }
  0xaa   :  { %7386 = vst [vmem:[#allocation68_spill] sm:$0xff] %v4497_v34  ;;  %v717_v42 = vadd.f32 %v716_v23, %v715_v2  ;;  %v724_v38 = vadd.f32 %v723_v25, %v722_v57  ;;  %v731_v28 = vadd.f32 %v730_v24, %v729_v54  ;;  %v683_v1 = vrot.slane %v682_v16, 1  ;;  %v7395_v57 = vld [vmem:[#allocation27_spill] sm:$0xff] }
  0xab   :  { %7388 = vst [vmem:[#allocation23_spill] sm:$0xff] %v4501_v14  ;;  %v690_v26 = vrot.slane %v689_v30, 1  ;;  %v697_v59 = vrot.slane %v696_v10, 1  ;;  %v738_v17 = vadd.f32 %v737_v9, %v736_v49  ;;  %v704_v32 = vrot.slane %v703_v46, 1  ;;  %v7444_v34 = vld [vmem:[#allocation19_spill] sm:$0xff] }
  0xac   :  { %v711_v48 = vrot.slane %v710_v8, 1  ;;  %v745_v13 = vadd.f32 %v744_v31, %v743_v18  ;;  %v752_v0 = vmax.f32 %v7389_v60, %v751_v43  ;;  %vm7391_vm9 = vcmask 64517  }
  0xad   :  { %v759_v51 = vsel %vm7391_vm9, %v7390_v58, -inf  ;;  %v760_v11 = vsel %vm7204_vm5, %v7392_v4, -inf  ;;  %vm7394_vm12 = vmmov %vm7391_vm9  ;;  %v769_v54 = vsel %vm7204_vm5, %v7395_v57, -inf  ;;  %v4512_v20 = vadd.f32 %v662_v3, %v661_v12 }
  0xae   :  { %v768_v2 = vsel %vm7394_vm12, %v7393_v55, -inf  ;;  %v718_v49 = vrot.slane %v717_v42, 1  ;;  %v725_v19 = vrot.slane %v724_v38, 1  ;;  %v732_v5 = vrot.slane %v731_v28, 1  ;;  %vm7408_vm13 = vmmov %vm7391_vm9 }
  0xaf   :  { %7396 = vst [vmem:[#allocation66_spill] sm:$0xff] %v4512_v20  ;;  %v4514_v18 = vadd.f32 %v669_v44, %v668_v45  ;;  %v4516_v40 = vadd.f32 %v676_v47, %v675_v63  ;;  %v4518_v23 = vadd.f32 %v683_v1, %v682_v16  ;;  %v739_v25 = vrot.slane %v738_v17, 1  ;;  %v7407_v16 = vld [vmem:[#allocation28_spill] sm:$0xff]  ;;  %v7410_v1 = vld [vmem:[#allocation29_spill] sm:$0xff]  ;;  %vm7412_vm14 = vmmov %vm7391_vm9 }
  0xb0   :  { %v746_v24 = vrot.slane %v745_v13, 1  ;;  %v753_v9 = vrot.slane %v752_v0, 4  ;;  %v761_v31 = vmax.f32 %v759_v51, %v760_v11  ;;  %v770_v43 = vmax.f32 %v768_v2, %v769_v54  ;;  %vm7416_vm15 = vmmov %vm7391_vm9  ;;  %v7417_v51 = vld [vmem:[#allocation33_spill] sm:$0xff]  ;;  %v7418_v11 = vld [vmem:[#allocation34_spill] sm:$0xff] }
  0xb1   :  { %7397 = vst [vmem:[#allocation24_spill] sm:$0xff] %v4514_v18  ;;  %7398 = vst [vmem:[#allocation25_spill] sm:$0xff] %v4516_v40  ;;  %v4520_v60 = vadd.f32 %v690_v26, %v689_v30  ;;  %v4522_v21 = vadd.f32 %v697_v59, %v696_v10  ;;  %v4524_v12 = vadd.f32 %v704_v32, %v703_v46  ;;  %v777_v44 = vsel %vm7408_vm13, %v7407_v16, -inf  ;;  %v7411_v10 = vld [vmem:[#allocation30_spill] sm:$0xff]  ;;  %v7413_v26 = vld [vmem:[#allocation31_spill] sm:$0xff] }
  0xb2   :  { %7399 = vst [vmem:[#allocation26_spill] sm:$0xff] %v4518_v23  ;;  %v4526_v3 = vadd.f32 %v711_v48, %v710_v8  ;;  %v4528_v35 = vadd.f32 %v718_v49, %v717_v42  ;;  %v4530_v45 = vadd.f32 %v725_v19, %v724_v38  ;;  %v4532_v63 = vadd.f32 %v732_v5, %v731_v28  ;;  %v7415_v32 = vld [vmem:[#allocation32_spill] sm:$0xff]  ;;  %vm7419_vm1 = vmmov %vm7391_vm9  ;;  %v7420_v54 = vld [vmem:[#allocation35_spill] sm:$0xff] }
  0xb3   :  { %7400 = vst [vmem:[#allocation27_spill] sm:$0xff] %v4520_v60  ;;  %7401 = vst [vmem:[#allocation69_spill] sm:$0xff] %v4522_v21  ;;  %v4536_v47 = vadd.f32 %v739_v25, %v738_v17  ;;  %v778_v30 = vsel %vm7204_vm5, %v7410_v1, -inf  ;;  %v786_v46 = vsel %vm7412_vm14, %v7411_v10, -inf  ;;  %v787_v8 = vsel %vm7204_vm5, %v7413_v26, -inf  ;;  %v7421_v25 = vld [vmem:[#allocation36_spill] sm:$0xff] }
  0xb4   :  { %7402 = vst [vmem:[#allocation70_spill] sm:$0xff] %v4524_v12  ;;  %7403 = vst [vmem:[#allocation71_spill] sm:$0xff] %v4526_v3  ;;  %v4544_v42 = vadd.f32 %v746_v24, %v745_v13  ;;  %v754_v38 = vmax.f32 %v752_v0, %v753_v9  ;;  %v762_v59 = vrot.slane %v761_v31, 4  ;;  %v771_v28 = vrot.slane %v770_v43, 4  ;;  %v7423_v0 = vld [vmem:[#allocation37_spill] sm:$0xff]  ;;  %v7424_v9 = vld [vmem:[#allocation38_spill] sm:$0xff] }
  0xb5   :  { %7404 = vst [vmem:[#allocation72_spill] sm:$0xff] %v4528_v35  ;;  %7405 = vst [vmem:[#allocation73_spill] sm:$0xff] %v4530_v45  ;;  %v795_v48 = vsel %vm7416_vm15, %v7415_v32, -inf  ;;  %v796_v17 = vsel %vm7204_vm5, %v7417_v51, -inf  ;;  %v804_v2 = vsel %vm7419_vm1, %v7418_v11, -inf  ;;  %v805_v49 = vsel %vm7204_vm5, %v7420_v54, -inf }
  0xb6   :  { %7406 = vst [vmem:[#allocation74_spill] sm:$0xff] %v4532_v63  ;;  %7409 = vst [vmem:[#allocation28_spill] sm:$0xff] %v4536_v47  ;;  %v779_v19 = vmax.f32 %v777_v44, %v778_v30  ;;  %v788_v5 = vmax.f32 %v786_v46, %v787_v8  ;;  %v814_v24 = vsel %vm7204_vm5, %v7423_v0, -inf  ;;  %v7426_v47 = vld [vmem:[#allocation39_spill] sm:$0xff]  ;;  %v7429_v35 = vld [vmem:[#allocation41_spill] sm:$0xff]  ;;  %v797_v44 = vmax.f32 %v795_v48, %v796_v17 }
  0xb7   :  { %7414 = vst [vmem:[#allocation29_spill] sm:$0xff] %v4544_v42  ;;  %vm7422_vm2 = vmmov %vm7419_vm1  ;;  %v823_v63 = vsel %vm7204_vm5, %v7426_v47, -inf  ;;  %v832_v3 = vsel %vm7204_vm5, %v7429_v35, -inf  ;;  %v806_v30 = vmax.f32 %v804_v2, %v805_v49  ;;  %v7430_v46 = vld [vmem:[#allocation42_spill] sm:$0xff]  ;;  %v841_v33 = vsel %vm7204_vm5, %v7432_v61, -inf  ;;  %v7433_v21 = vld [vmem:[#allocation44_spill] sm:$0xff] }
  0xb8   :  { %v813_v13 = vsel %vm7422_vm2, %v7421_v25, -inf  ;;  %vm7425_vm10 = vmmov %vm7419_vm1  ;;  %v763_v50 = vmax.f32 %v761_v31, %v762_v59  ;;  %v850_v7 = vsel %vm7204_vm5, %v7435_v29, -inf  ;;  %v755_v53 = vrot.slane %v754_v38, 2  ;;  %v7436_v2 = vld [vmem:[#allocation46_spill] sm:$0xff]  ;;  %v7439_v20 = vld [vmem:[#allocation48_spill] sm:$0xff] }
  0xb9   :  { %v822_v42 = vsel %vm7425_vm10, %v7424_v9, -inf  ;;  %vm7428_vm3 = vmmov %vm7419_vm1  ;;  %v815_v12 = vmax.f32 %v813_v13, %v814_v24  ;;  %v772_v23 = vmax.f32 %v770_v43, %v771_v28  ;;  %v859_v56 = vsel %vm7204_vm5, %v7438_v6, -inf  ;;  %v7441_v43 = vld [vmem:[#allocation49_spill] sm:$0xff]  ;;  %v7442_v28 = vld [vmem:[#allocation50_spill] sm:$0xff] }
  0xba   :  { %v831_v45 = vsel %vm7428_vm3, %v7427_v39, -inf  ;;  %vm7431_vm4 = vmmov %vm7419_vm1  ;;  %v824_v40 = vmax.f32 %v822_v42, %v823_v63  ;;  %v780_v31 = vrot.slane %v779_v19, 4  ;;  %v789_v59 = vrot.slane %v788_v5, 4  ;;  %v7447_v35 = vld [vmem:[#allocation21_spill] sm:$0xff] }
  0xbb   :  { %v840_v8 = vsel %vm7431_vm4, %v7430_v46, -inf  ;;  %vm7434_vm6 = vmmov %vm7419_vm1  ;;  %v833_v18 = vmax.f32 %v831_v45, %v832_v3  ;;  %v798_v13 = vrot.slane %v797_v44, 4  ;;  %v807_v24 = vrot.slane %v806_v30, 4 }
  0xbc   :  { %v849_v60 = vsel %vm7434_vm6, %v7433_v21, -inf  ;;  %v842_v48 = vmax.f32 %v840_v8, %v841_v33  ;;  %vm7437_vm11 = vmmov %vm7419_vm1  ;;  %v816_v62 = vrot.slane %v815_v12, 4  ;;  %v868_v3 = vsel %vm7204_vm5, %v7441_v43, -inf }
  0xbd   :  { %v851_v17 = vmax.f32 %v849_v60, %v850_v7  ;;  %v858_v49 = vsel %vm7437_vm11, %v7436_v2, -inf  ;;  %vm7440_vm8 = vmmov %vm7419_vm1  ;;  %v764_v33 = vrot.slane %v763_v50, 2  ;;  %v825_v7 = vrot.slane %v824_v40, 4 }
  0xbe   :  { %v860_v52 = vmax.f32 %v858_v49, %v859_v56  ;;  %v867_v14 = vsel %vm7440_vm8, %v7439_v20, -inf  ;;  %v834_v60 = vrot.slane %v833_v18, 4  ;;  %v843_v63 = vrot.slane %v842_v48, 4  ;;  %vm7443_vm7 = vmmov %vm7419_vm1 }
  0xbf   :  { %v869_v45 = vmax.f32 %v867_v14, %v868_v3  ;;  %v852_v42 = vrot.slane %v851_v17, 4  ;;  %v876_v8 = vsel %vm7443_vm7, %v7442_v28, -inf  ;;  %v877_v27 = vsel %vm7204_vm5, %v7444_v34, -inf  ;;  %v7445_v14 = vld [vmem:[#allocation20_spill] sm:$0xff]  ;;  %vm7446_vm9 = vmmov %vm7419_vm1 }
  0xc0   :  { %v756_v15 = vmax.f32 %v754_v38, %v755_v53  ;;  %v781_v56 = vmax.f32 %v779_v19, %v780_v31  ;;  %v790_v49 = vmax.f32 %v788_v5, %v789_v59  ;;  %v799_v36 = vmax.f32 %v797_v44, %v798_v13 }
  0xc1   :  { %v808_v37 = vmax.f32 %v806_v30, %v807_v24  ;;  %v817_v20 = vmax.f32 %v815_v12, %v816_v62  ;;  %v861_v6 = vrot.slane %v860_v52, 4  ;;  %v878_v43 = vmax.f32 %v876_v8, %v877_v27 }
  0xc2   :  { %v826_v2 = vmax.f32 %v824_v40, %v825_v7  ;;  %v835_v29 = vmax.f32 %v833_v18, %v834_v60  ;;  %v870_v21 = vrot.slane %v869_v45, 4  ;;  %v885_v3 = vsel %vm7446_vm9, %v7445_v14, -inf }
  0xc3   :  { %v773_v61 = vrot.slane %v772_v23, 2  ;;  %v844_v46 = vmax.f32 %v842_v48, %v843_v63  ;;  %v853_v28 = vmax.f32 %v851_v17, %v852_v42  ;;  %v886_v34 = vsel %vm7204_vm5, %v7447_v35, -inf }
  0xc4   :  { %v782_v53 = vrot.slane %v781_v56, 2  ;;  %v791_v38 = vrot.slane %v790_v49, 2  ;;  %v800_v19 = vrot.slane %v799_v36, 2  ;;  %v879_v5 = vrot.slane %v878_v43, 4 }
  0xc5   :  { %v809_v44 = vrot.slane %v808_v37, 2  ;;  %v818_v62 = vrot.slane %v817_v20, 2  ;;  %v862_v12 = vmax.f32 %v860_v52, %v861_v6  ;;  %v887_v27 = vmax.f32 %v885_v3, %v886_v34 }
  0xc6   :  { %v765_v40 = vmax.f32 %v763_v50, %v764_v33  ;;  %v827_v18 = vrot.slane %v826_v2, 2  ;;  %v836_v30 = vrot.slane %v835_v29, 2  ;;  %v871_v31 = vmax.f32 %v869_v45, %v870_v21 }
  0xc7   :  { %v774_v59 = vmax.f32 %v772_v23, %v773_v61  ;;  %v845_v13 = vrot.slane %v844_v46, 2  ;;  %v854_v24 = vrot.slane %v853_v28, 2  ;;  %v888_v48 = vrot.slane %v887_v27, 4 }
  0xc8   :  { %v783_v17 = vmax.f32 %v781_v56, %v782_v53  ;;  %v792_v7 = vmax.f32 %v790_v49, %v791_v38  ;;  %v801_v60 = vmax.f32 %v799_v36, %v800_v19  ;;  %v880_v63 = vmax.f32 %v878_v43, %v879_v5 }
  0xc9   :  { %v810_v42 = vmax.f32 %v808_v37, %v809_v44  ;;  %v819_v8 = vmax.f32 %v817_v20, %v818_v62  ;;  %v863_v35 = vrot.slane %v862_v12, 2  ;;  %v889_v14 = vmax.f32 %v887_v27, %v888_v48 }
  0xca   :  { %v757_v39 = vrot.slane %v756_v15, 1  ;;  %v828_v47 = vmax.f32 %v826_v2, %v827_v18  ;;  %v837_v6 = vmax.f32 %v835_v29, %v836_v30  ;;  %v872_v52 = vrot.slane %v871_v31, 2  ;;  %v7458_v30 = vld [vmem:[#allocation22_spill] sm:$0xff] }
  0xcb   :  { %v766_v50 = vrot.slane %v765_v40, 1  ;;  %v775_v34 = vrot.slane %v774_v59, 1  ;;  %v846_v33 = vmax.f32 %v844_v46, %v845_v13  ;;  %v855_v21 = vmax.f32 %v853_v28, %v854_v24 }
  0xcc   :  { %v784_v61 = vrot.slane %v783_v17, 1  ;;  %v793_v23 = vrot.slane %v792_v7, 1  ;;  %v802_v45 = vrot.slane %v801_v60, 1  ;;  %v881_v3 = vrot.slane %v880_v63, 2 }
  0xcd   :  { %v811_v56 = vrot.slane %v810_v42, 1  ;;  %v820_v49 = vrot.slane %v819_v8, 1  ;;  %v864_v36 = vmax.f32 %v862_v12, %v863_v35  ;;  %v890_v43 = vrot.slane %v889_v14, 2 }
  0xce   :  { %v4590_v37 = vmax.f32 %v756_v15, %v757_v39  ;;  %v829_v20 = vrot.slane %v828_v47, 1  ;;  %v838_v53 = vrot.slane %v837_v6, 1  ;;  %v873_v38 = vmax.f32 %v871_v31, %v872_v52 }
  0xcf   :  { %v4592_v2 = vmax.f32 %v765_v40, %v766_v50  ;;  %v4594_v29 = vmax.f32 %v774_v59, %v775_v34  ;;  %v847_v19 = vrot.slane %v846_v33, 1  ;;  %v856_v46 = vrot.slane %v855_v21, 1  ;;  %v7466_v50 = vld [vmem:[#allocation39_spill] sm:$0xff]  ;;  %v7467_v34 = vld [vmem:[#allocation40_spill] sm:$0xff] }
  0xd0   :  { %7448 = vst [vmem:[#allocation30_spill] sm:$0xff] %v4590_v37  ;;  %v4596_v28 = vmax.f32 %v783_v17, %v784_v61  ;;  %v4598_v5 = vmax.f32 %v792_v7, %v793_v23  ;;  %v4600_v44 = vmax.f32 %v801_v60, %v802_v45  ;;  %v882_v62 = vmax.f32 %v880_v63, %v881_v3  ;;  %v7470_v45 = vld [vmem:[#allocation42_spill] sm:$0xff] }
  0xd1   :  { %7449 = vst [vmem:[#allocation31_spill] sm:$0xff] %v4592_v2  ;;  %7450 = vst [vmem:[#allocation32_spill] sm:$0xff] %v4594_v29  ;;  %v4602_v35 = vmax.f32 %v810_v42, %v811_v56  ;;  %v4604_v15 = vmax.f32 %v819_v8, %v820_v49  ;;  %v865_v39 = vrot.slane %v864_v36, 1  ;;  %v891_v12 = vmax.f32 %v889_v14, %v890_v43  ;;  %v7473_v49 = vld [vmem:[#allocation43_spill] sm:$0xff] }
  0xd2   :  { %7451 = vst [vmem:[#allocation33_spill] sm:$0xff] %v4596_v28  ;;  %7452 = vst [vmem:[#allocation34_spill] sm:$0xff] %v4598_v5  ;;  %v4606_v27 = vmax.f32 %v828_v47, %v829_v20  ;;  %v4608_v40 = vmax.f32 %v837_v6, %v838_v53  ;;  %v874_v18 = vrot.slane %v873_v38, 1  ;;  %vm894_vm12 = vcmp.eq.f32.partialorder %v7458_v30, %v4590_v37  ;;  %v7475_v53 = vld [vmem:[#allocation44_spill] sm:$0xff] }
  0xd3   :  { %7453 = vst [vmem:[#allocation35_spill] sm:$0xff] %v4600_v44  ;;  %7454 = vst [vmem:[#allocation36_spill] sm:$0xff] %v4602_v35  ;;  %v4612_v31 = vmax.f32 %v846_v33, %v847_v19  ;;  %v4614_v59 = vmax.f32 %v855_v21, %v856_v46  ;;  %vm895_vm13 = vcmp.eq.f32.partialorder %v7387_v22, %v4590_v37  ;;  %v883_v13 = vrot.slane %v882_v62, 1  ;;  %v7468_v33 = vld [vmem:[#allocation41_spill] sm:$0xff]  ;;  %v7477_v19 = vld [vmem:[#allocation46_spill] sm:$0xff] }
  0xd4   :  { %7455 = vst [vmem:[#allocation37_spill] sm:$0xff] %v4604_v15  ;;  %7456 = vst [vmem:[#allocation38_spill] sm:$0xff] %v4606_v27  ;;  %vm896_vm14 = vcmp.eq.f32.partialorder %v7390_v58, %v4592_v2  ;;  %vm897_vm15 = vcmp.eq.f32.partialorder %v7392_v4, %v4592_v2  ;;  %vm898_vm1 = vcmp.eq.f32.partialorder %v7393_v55, %v4594_v29  ;;  %v4625_v47 = vrot.slane %v7322_v41, 3  ;;  %v7478_v46 = vld [vmem:[#allocation47_spill] sm:$0xff]  ;;  %v3497_v2 = vld [vmem:[%s7049_s0 + $0xc0] sm:$0xff] }
  0xd5   :  { %7457 = vst [vmem:[#allocation75_spill] sm:$0xff] %v4608_v40  ;;  %7459 = vst [vmem:[#allocation22_spill] sm:$0xff] %v4612_v31  ;;  %v4627_v14 = vmax.f32 %v864_v36, %v865_v39  ;;  %v892_v24 = vrot.slane %v891_v12, 1  ;;  %vm899_vm2 = vcmp.eq.f32.partialorder %v7395_v57, %v4594_v29  ;;  %vm900_vm10 = vcmp.eq.f32.partialorder %v7407_v16, %v4596_v28  ;;  %v3498_v37 = vld [vmem:[%s7049_s0 + $0xc8] sm:$0xff] }
  0xd6   :  { %7460 = vst [vmem:[#allocation76_spill] sm:$0xff] %v4614_v59  ;;  %7461 = vst [vmem:[#allocation77_spill] sm:$0xff] %v4625_v47  ;;  %v4633_v48 = vmax.f32 %v873_v38, %v874_v18  ;;  %vm901_vm3 = vcmp.eq.f32.partialorder %v7410_v1, %v4596_v28  ;;  %vm902_vm4 = vcmp.eq.f32.partialorder %v7411_v10, %v4598_v5  ;;  %v927_v17 = vsel %vm894_vm12, %v4625_v47, 6  ;;  %v7476_v38 = vld [vmem:[#allocation45_spill] sm:$0xff]  ;;  %v7479_v18 = vld [vmem:[#allocation48_spill] sm:$0xff] }
  0xd7   :  { %7462 = vst [vmem:[#allocation78_spill] sm:$0xff] %v4627_v14  ;;  %vm903_vm6 = vcmp.eq.f32.partialorder %v7413_v26, %v4598_v5  ;;  %vm904_vm11 = vcmp.eq.f32.partialorder %v7415_v32, %v4600_v44  ;;  %vm905_vm8 = vcmp.eq.f32.partialorder %v7417_v51, %v4600_v44  ;;  %vm906_vm7 = vcmp.eq.f32.partialorder %v7418_v11, %v4602_v35 }
  0xd8   :  { %7463 = vst [vmem:[#allocation79_spill] sm:$0xff] %v4633_v48  ;;  %v928_v7 = vsel %vm895_vm13, %v4625_v47, 6  ;;  %v4655_v60 = vmax.f32 %v882_v62, %v883_v13  ;;  %vm907_vm9 = vcmp.eq.f32.partialorder %v7420_v54, %v4602_v35  ;;  %v929_v63 = vsel %vm896_vm14, %v4625_v47, 6 }
  0xd9   :  { %v930_v42 = vsel %vm897_vm15, %v4625_v47, 6  ;;  %v931_v8 = vsel %vm898_vm1, %v4625_v47, 6  ;;  %v4671_v6 = vmax.f32 %v891_v12, %v892_v24  ;;  %vm908_vm12 = vcmp.eq.f32.partialorder %v7421_v25, %v4604_v15 }
  0xda   :  { %7464 = vst [vmem:[#allocation80_spill] sm:$0xff] %v4655_v60  ;;  %vm909_vm13 = vcmp.eq.f32.partialorder %v7423_v0, %v4604_v15  ;;  %vm910_vm14 = vcmp.eq.f32.partialorder %v7424_v9, %v4606_v27  ;;  %v932_v58 = vsel %vm899_vm2, %v4625_v47, 6  ;;  %v933_v55 = vsel %vm900_vm10, %v4625_v47, 6 }
  0xdb   :  { %7465 = vst [vmem:[#allocation81_spill] sm:$0xff] %v4671_v6  ;;  %v934_v52 = vsel %vm901_vm3, %v4625_v47, 6  ;;  %v935_v16 = vsel %vm902_vm4, %v4625_v47, 6  ;;  %v936_v21 = vsel %vm903_vm6, %v4625_v47, 6  ;;  %vm7469_vm2 = vcmask 64517  }
  0xdc   :  { %v959_v61 = vsel %vm7469_vm2, %v927_v17, 2147483647  ;;  %v960_v23 = vsel %vm7204_vm5, %v928_v7, 2147483647  ;;  %vm7471_vm1 = vmmov %vm7469_vm2  ;;  %v973_v56 = vsel %vm7204_vm5, %v930_v42, 2147483647 }
  0xdd   :  { %vm961_vm3 = vcmp.lt.s32.totalorder %v959_v61, %v960_v23  ;;  %v972_v3 = vsel %vm7471_vm1, %v929_v63, 2147483647  ;;  %vm7472_vm0 = vmmov %vm7471_vm1  ;;  %v986_v43 = vsel %vm7204_vm5, %v932_v58, 2147483647  ;;  %v999_v12 = vsel %vm7204_vm5, %v934_v52, 2147483647 }
  0xde   :  { %v985_v10 = vsel %vm7472_vm0, %v931_v8, 2147483647  ;;  %v962_v36 = vsel %vm961_vm3, %v959_v61, %v960_v23  ;;  %vm974_vm15 = vcmp.lt.s32.totalorder %v972_v3, %v973_v56  ;;  %vm7474_vm6 = vmmov %vm7472_vm0  ;;  %v7481_v17 = vld [vmem:[#allocation49_spill] sm:$0xff]  ;;  %v1012_v42 = vsel %vm7204_vm5, %v936_v21, 2147483647  ;;  %v4748_v21 = vld [vmem:[%s7049_s0 + $0x8] sm:$0xff] }
  0xdf   :  { %v998_v20 = vsel %vm7474_vm6, %v933_v55, 2147483647  ;;  %v963_v62 = vrot.slane %v962_v36, 4  ;;  %v975_v39 = vsel %vm974_vm15, %v972_v3, %v973_v56  ;;  %vm987_vm3 = vcmp.lt.s32.totalorder %v985_v10, %v986_v43  ;;  %vm7480_vm4 = vmmov %vm7472_vm0  ;;  %v4754_v3 = vld [vmem:[%s7049_s0 + $0x10] sm:$0xff]  ;;  %v7490_v58 = vld [vmem:[#allocation19_spill] sm:$0xff] }
  0xe0   :  { %v976_v30 = vrot.slane %v975_v39, 4  ;;  %v988_v13 = vsel %vm987_vm3, %v985_v10, %v986_v43  ;;  %vm1000_vm2 = vcmp.lt.s32.totalorder %v998_v20, %v999_v12  ;;  %v1011_v24 = vsel %vm7480_vm4, %v935_v16, 2147483647  ;;  %v4742_v16 = vld [vmem:[%s7049_s0] sm:$0xff] }
  0xe1   :  { %vm921_vm10 = vcmp.eq.f32.partialorder %v7481_v17, %v4633_v48  ;;  %vm964_vm1 = vcmp.lt.s32.totalorder %v962_v36, %v963_v62  ;;  %v989_v7 = vrot.slane %v988_v13, 4  ;;  %v1001_v63 = vsel %vm1000_vm2, %v998_v20, %v999_v12  ;;  %v7486_v10 = vld [vmem:[#allocation50_spill] sm:$0xff] }
  0xe2   :  { %v965_v8 = vsel %vm964_vm1, %v962_v36, %v963_v62  ;;  %vm4731_vm15 = vcmp.lt.s32.totalorder %v975_v39, %v976_v30  ;;  %v1002_v55 = vrot.slane %v1001_v63, 4  ;;  %vm1013_vm6 = vcmp.lt.s32.totalorder %v1011_v24, %v1012_v42 }
  0xe3   :  { %vm4735_vm0 = vcmp.lt.s32.totalorder %v988_v13, %v989_v7  ;;  %vm922_vm4 = vcmp.eq.f32.partialorder %v7486_v10, %v4655_v60  ;;  %v937_v36 = vsel %vm904_vm11, %v4625_v47, 6  ;;  %v938_v43 = vsel %vm905_vm8, %v4625_v47, 6 }
  0xe4   :  { %v939_v20 = vsel %vm906_vm7, %v4625_v47, 6  ;;  %v1014_v62 = vsel %vm1013_vm6, %v1011_v24, %v1012_v42  ;;  %v940_v12 = vsel %vm907_vm9, %v4625_v47, 6  ;;  %v966_v56 = vrot.slane %v965_v8, 2 }
  0xe5   :  { %v978_v32 = vsel %vm4731_vm15, %v975_v39, %v976_v30  ;;  %vm1003_vm11 = vcmp.lt.s32.totalorder %v1001_v63, %v1002_v55  ;;  %v941_v61 = vsel %vm908_vm12, %v4625_v47, 6  ;;  %v942_v11 = vsel %vm909_vm13, %v4625_v47, 6 }
  0xe6   :  { %v943_v24 = vsel %vm910_vm14, %v4625_v47, 6  ;;  %v991_v42 = vsel %vm4735_vm0, %v988_v13, %v989_v7  ;;  %vm7487_vm8 = vcmp.eq.f32.partialorder %v7466_v50, %v4606_v27  ;;  %vm7488_vm7 = vcmp.eq.f32.partialorder %v7467_v34, %v4608_v40 }
  0xe7   :  { %v944_v39 = vsel %vm7487_vm8, %v4625_v47, 6  ;;  %v945_v25 = vsel %vm7488_vm7, %v4625_v47, 6  ;;  %vm7489_vm9 = vcmp.eq.f32.partialorder %v7468_v33, %v4608_v40  ;;  %v1015_v9 = vrot.slane %v1014_v62, 4 }
  0xe8   :  { %v946_v30 = vsel %vm7489_vm9, %v4625_v47, 6  ;;  %vm923_vm12 = vcmp.eq.f32.partialorder %v7490_v58, %v4655_v60  ;;  %vm7491_vm13 = vcmp.eq.f32.partialorder %v7470_v45, %v4612_v31  ;;  %v979_v7 = vrot.slane %v978_v32, 2 }
  0xe9   :  { %v947_v13 = vsel %vm7491_vm13, %v4625_v47, 6  ;;  %v1004_v52 = vsel %vm1003_vm11, %v1001_v63, %v1002_v55  ;;  %vm7492_vm14 = vcmask 64517   ;;  %vm7493_vm2 = vcmp.eq.f32.partialorder %v7473_v49, %v4612_v31 }
  0xea   :  { %v1024_v23 = vsel %vm7492_vm14, %v937_v36, 2147483647  ;;  %v948_v34 = vsel %vm7493_vm2, %v4625_v47, 6  ;;  %vm967_vm1 = vcmp.lt.s32.totalorder %v965_v8, %v966_v56  ;;  %v992_v40 = vrot.slane %v991_v42, 2 }
  0xeb   :  { %v1025_v27 = vsel %vm7204_vm5, %v938_v43, 2147483647  ;;  %vm7494_vm0 = vcmp.eq.f32.partialorder %v7475_v53, %v4614_v59  ;;  %vm7495_vm3 = vcmp.eq.f32.partialorder %v7476_v38, %v4614_v59  ;;  %vm7496_vm6 = vcmp.eq.f32.partialorder %v7477_v19, %v4627_v14  ;;  %v7499_v43 = vld [vmem:[#allocation20_spill] sm:$0xff]  ;;  %v7500_v19 = vld [vmem:[#allocation21_spill] sm:$0xff] }
  0xec   :  { %v4819_v15 = vsel %vm7494_vm0, %v4625_v47, 6  ;;  %v4825_v45 = vsel %vm7495_vm3, %v4625_v47, 6  ;;  %v4831_v63 = vsel %vm7496_vm6, %v4625_v47, 6  ;;  %vm7497_vm15 = vcmp.eq.f32.partialorder %v7478_v46, %v4627_v14 }
  0xed   :  { %v4837_v55 = vsel %vm7497_vm15, %v4625_v47, 6  ;;  %vm7498_vm11 = vcmp.eq.f32.partialorder %v7479_v18, %v4633_v48  ;;  %v1005_v36 = vrot.slane %v1004_v52, 2  ;;  %vm1016_vm8 = vcmp.lt.s32.totalorder %v1014_v62, %v1015_v9 }
  0xee   :  { %v4843_v53 = vsel %vm7498_vm11, %v4625_v47, 6  ;;  %vm1026_vm7 = vcmp.lt.s32.totalorder %v1024_v23, %v1025_v27  ;;  %vm924_vm9 = vcmp.eq.f32.partialorder %v7499_v43, %v4671_v6  ;;  %vm925_vm13 = vcmp.eq.f32.partialorder %v7500_v19, %v4671_v6 }
  0xef   :  { %v4853_v14 = vsel %vm921_vm10, %v4625_v47, 6  ;;  %v968_v59 = vsel %vm967_vm1, %v965_v8, %v966_v56  ;;  %vm980_vm14 = vcmp.lt.s32.totalorder %v978_v32, %v979_v7  ;;  %v1027_v18 = vsel %vm1026_vm7, %v1024_v23, %v1025_v27 }
  0xf0   :  { %vm993_vm2 = vcmp.lt.s32.totalorder %v991_v42, %v992_v40  ;;  %v1028_v31 = vrot.slane %v1027_v18, 4  ;;  %vm7501_vm0 = vcmask 64517   ;;  %v1038_v44 = vsel %vm7204_vm5, %v940_v12, 2147483647 }
  0xf1   :  { %v1037_v35 = vsel %vm7501_vm0, %v939_v20, 2147483647  ;;  %v1017_v5 = vsel %vm1016_vm8, %v1014_v62, %v1015_v9  ;;  %vm7502_vm6 = vmmov %vm7501_vm0  ;;  %v1051_v29 = vsel %vm7204_vm5, %v942_v11, 2147483647  ;;  %v4863_v48 = vsel %vm922_vm4, %v4625_v47, 6 }
  0xf2   :  { %vm1039_vm3 = vcmp.lt.s32.totalorder %v1037_v35, %v1038_v44  ;;  %v1050_v28 = vsel %vm7502_vm6, %v941_v61, 2147483647  ;;  %v969_v8 = vrot.slane %v968_v59, 1  ;;  %vm1006_vm10 = vcmp.lt.s32.totalorder %v1004_v52, %v1005_v36  ;;  %vm7503_vm15 = vmmov %vm7501_vm0 }
  0xf3   :  { %v1040_v27 = vsel %vm1039_vm3, %v1037_v35, %v1038_v44  ;;  %v981_v23 = vsel %vm980_vm14, %v978_v32, %v979_v7  ;;  %v994_v56 = vsel %vm993_vm2, %v991_v42, %v992_v40  ;;  %vm1052_vm1 = vcmp.lt.s32.totalorder %v1050_v28, %v1051_v29  ;;  %vm7504_vm7 = vmmov %vm7501_vm0 }
  0xf4   :  { %v1063_v20 = vsel %vm7503_vm15, %v943_v24, 2147483647  ;;  %v1018_v62 = vrot.slane %v1017_v5, 2  ;;  %vm1029_vm11 = vcmp.lt.s32.totalorder %v1027_v18, %v1028_v31  ;;  %v1041_v12 = vrot.slane %v1040_v27, 4  ;;  %vm7505_vm4 = vmmov %vm7501_vm0 }
  0xf5   :  { %v1064_v61 = vsel %vm7204_vm5, %v944_v39, 2147483647  ;;  %v1007_v11 = vsel %vm1006_vm10, %v1004_v52, %v1005_v36  ;;  %v1076_v9 = vsel %vm7504_vm7, %v945_v25, 2147483647  ;;  %v1077_v10 = vsel %vm7204_vm5, %v946_v30, 2147483647  ;;  %vm7508_vm15 = vmmov %vm7505_vm4 }
  0xf6   :  { %vm1065_vm8 = vcmp.lt.s32.totalorder %v1063_v20, %v1064_v61  ;;  %v4873_v44 = vsel %vm923_vm12, %v4625_v47, 6  ;;  %v982_v35 = vrot.slane %v981_v23, 1  ;;  %v1053_v40 = vsel %vm1052_vm1, %v1050_v28, %v1051_v29 }
  0xf7   :  { %v1089_v32 = vsel %vm7505_vm4, %v947_v13, 2147483647  ;;  %vm4876_vm14 = vcmp.lt.s32.totalorder %v968_v59, %v969_v8  ;;  %v995_v42 = vrot.slane %v994_v56, 1  ;;  %v1030_v39 = vsel %vm1029_vm11, %v1027_v18, %v1028_v31 }
  0xf8   :  { %v1066_v7 = vsel %vm1065_vm8, %v1063_v20, %v1064_v61  ;;  %v1008_v25 = vrot.slane %v1007_v11, 1  ;;  %vm1042_vm2 = vcmp.lt.s32.totalorder %v1040_v27, %v1041_v12  ;;  %vm1078_vm0 = vcmp.lt.s32.totalorder %v1076_v9, %v1077_v10 }
  0xf9   :  { %v1090_v30 = vsel %vm7204_vm5, %v948_v34, 2147483647  ;;  %vm1019_vm3 = vcmp.lt.s32.totalorder %v1017_v5, %v1018_v62  ;;  %v1054_v52 = vrot.slane %v1053_v40, 4  ;;  %v1079_v36 = vsel %vm1078_vm0, %v1076_v9, %v1077_v10 }
  0xfa   :  { %vm1091_vm12 = vcmp.lt.s32.totalorder %v1089_v32, %v1090_v30  ;;  %v4885_v29 = vsel %vm924_vm9, %v4625_v47, 6  ;;  %v4891_v28 = vsel %vm925_vm13, %v4625_v47, 6  ;;  %v1031_v31 = vrot.slane %v1030_v39, 2 }
  0xfb   :  { %v1067_v13 = vrot.slane %v1066_v7, 4  ;;  %v4895_v34 = vsel %vm4876_vm14, %v968_v59, %v969_v8  ;;  %vm983_vm6 = vcmp.lt.s32.totalorder %v981_v23, %v982_v35  ;;  %vm996_vm10 = vcmp.lt.s32.totalorder %v994_v56, %v995_v42  ;;  %vm7509_vm14 = vmmov %vm7508_vm15 }
  0xfc   :  { %v1043_v18 = vsel %vm1042_vm2, %v1040_v27, %v1041_v12  ;;  %vm1009_vm1 = vcmp.lt.s32.totalorder %v1007_v11, %v1008_v25  ;;  %v4897_v20 = vsel %vm1019_vm3, %v1017_v5, %v1018_v62  ;;  %v1080_v43 = vrot.slane %v1079_v36, 4  ;;  %vm7510_vm3 = vmmov %vm7509_vm14 }
  0xfd   :  { %v1092_v61 = vsel %vm1091_vm12, %v1089_v32, %v1090_v30  ;;  %vm1055_vm9 = vcmp.lt.s32.totalorder %v1053_v40, %v1054_v52  ;;  %v1102_v10 = vsel %vm7508_vm15, %v4819_v15, 2147483647  ;;  %v1103_v6 = vsel %vm7204_vm5, %v4825_v45, 2147483647  ;;  %vm7515_vm15 = vmmov %vm7510_vm3 }
  0xfe   :  { %v1093_v9 = vrot.slane %v1092_v61, 4  ;;  %v4903_v60 = vsel %vm983_vm6, %v981_v23, %v982_v35  ;;  %vm1032_vm13 = vcmp.lt.s32.totalorder %v1030_v39, %v1031_v31  ;;  %v1044_v59 = vrot.slane %v1043_v18, 2 }
  0xff   :  { %vm1068_vm11 = vcmp.lt.s32.totalorder %v1066_v7, %v1067_v13  ;;  %v4905_v8 = vsel %vm996_vm10, %v994_v56, %v995_v42  ;;  %v4907_v27 = vsel %vm1009_vm1, %v1007_v11, %v1008_v25  ;;  %v7189_v5 = vrot.slane %v4897_v20, 1 }
 0x100   :  { %vm1081_vm8 = vcmp.lt.s32.totalorder %v1079_v36, %v1080_v43  ;;  %v1056_v62 = vsel %vm1055_vm9, %v1053_v40, %v1054_v52  ;;  %vm1094_vm7 = vcmp.lt.s32.totalorder %v1092_v61, %v1093_v9  ;;  %vm1104_vm4 = vcmp.lt.s32.totalorder %v1102_v10, %v1103_v6 }
 0x101   :  { %v1115_v15 = vsel %vm7509_vm14, %v4831_v63, 2147483647  ;;  %v4912_v12 = vsel %vm1032_vm13, %v1030_v39, %v1031_v31  ;;  %v1069_v45 = vsel %vm1068_vm11, %v1066_v7, %v1067_v13  ;;  %v1105_v23 = vsel %vm1104_vm4, %v1102_v10, %v1103_v6 }
 0x102   :  { %v1116_v35 = vsel %vm7204_vm5, %v4837_v55, 2147483647  ;;  %vm1045_vm2 = vcmp.lt.s32.totalorder %v1043_v18, %v1044_v59  ;;  %v1082_v56 = vsel %vm1081_vm8, %v1079_v36, %v1080_v43  ;;  %v1106_v11 = vrot.slane %v1105_v23, 4 }
 0x103   :  { %vm1117_vm0 = vcmp.lt.s32.totalorder %v1115_v15, %v1116_v35  ;;  %v1057_v32 = vrot.slane %v1056_v62, 2  ;;  %v1095_v24 = vsel %vm1094_vm7, %v1092_v61, %v1093_v9  ;;  %v1128_v40 = vsel %vm7510_vm3, %v4843_v53, 2147483647  ;;  %vm7522_vm7 = vmmov %vm7510_vm3 }
 0x104   :  { %v1118_v42 = vsel %vm1117_vm0, %v1115_v15, %v1116_v35  ;;  %v7188_v25 = vrot.slane %v4912_v12, 1  ;;  %v1070_v63 = vrot.slane %v1069_v45, 2  ;;  %vm1107_vm12 = vcmp.lt.s32.totalorder %v1105_v23, %v1106_v11 }
 0x105   :  { %v1119_v39 = vrot.slane %v1118_v42, 4  ;;  %v4919_v7 = vsel %vm1045_vm2, %v1043_v18, %v1044_v59  ;;  %v1083_v6 = vrot.slane %v1082_v56, 2  ;;  %v1108_v30 = vsel %vm1107_vm12, %v1105_v23, %v1106_v11 }
 0x106   :  { %v1129_v55 = vsel %vm7204_vm5, %v4853_v14, 2147483647  ;;  %vm4926_vm6 = vcmp.lt.s32.totalorder %v4897_v20, %v7189_v5  ;;  %v1096_v53 = vrot.slane %v1095_v24, 2  ;;  %v1109_v36 = vrot.slane %v1108_v30, 2 }
 0x107   :  { %vm1120_vm10 = vcmp.lt.s32.totalorder %v1118_v42, %v1119_v39  ;;  %vm1130_vm1 = vcmp.lt.s32.totalorder %v1128_v40, %v1129_v55  ;;  %vm4930_vm9 = vcmp.lt.s32.totalorder %v1056_v62, %v1057_v32  ;;  %v1141_v14 = vsel %vm7515_vm15, %v4863_v48, 2147483647 }
 0x108   :  { %v1121_v13 = vsel %vm1120_vm10, %v1118_v42, %v1119_v39  ;;  %v1131_v18 = vsel %vm1130_vm1, %v1128_v40, %v1129_v55  ;;  %vm4939_vm13 = vcmp.lt.s32.totalorder %v4912_v12, %v7188_v25  ;;  %v1047_v61 = vrot.slane %v4919_v7, 1 }
 0x109   :  { %vm4944_vm11 = vcmp.lt.s32.totalorder %v1069_v45, %v1070_v63  ;;  %v1122_v10 = vrot.slane %v1121_v13, 2  ;;  %v1132_v59 = vrot.slane %v1131_v18, 4  ;;  %vm4948_vm8 = vcmp.lt.s32.totalorder %v1082_v56, %v1083_v6 }
 0x10a   :  { %v1142_v48 = vsel %vm7204_vm5, %v4873_v44, 2147483647  ;;  %v1154_v23 = vsel %vm7522_vm7, %v4885_v29, 2147483647  ;;  %v1155_v35 = vsel %vm7204_vm5, %v4891_v28, 2147483647  ;;  %vm1097_vm4 = vcmp.lt.s32.totalorder %v1095_v24, %v1096_v53 }
 0x10b   :  { %vm1110_vm14 = vcmp.lt.s32.totalorder %v1108_v30, %v1109_v36  ;;  %vm1133_vm2 = vcmp.lt.s32.totalorder %v1131_v18, %v1132_v59  ;;  %vm1143_vm0 = vcmp.lt.s32.totalorder %v1141_v14, %v1142_v48  ;;  %vm1123_vm3 = vcmp.lt.s32.totalorder %v1121_v13, %v1122_v10 }
 0x10c   :  { %v1134_v11 = vsel %vm1133_vm2, %v1131_v18, %v1132_v59  ;;  %v1144_v42 = vsel %vm1143_vm0, %v1141_v14, %v1142_v48  ;;  %vm1156_vm12 = vcmp.lt.s32.totalorder %v1154_v23, %v1155_v35  ;;  %v1059_v40 = vsel %vm4930_vm9, %v1056_v62, %v1057_v32 }
 0x10d   :  { %v1072_v44 = vsel %vm4944_vm11, %v1069_v45, %v1070_v63  ;;  %v1135_v39 = vrot.slane %v1134_v11, 2  ;;  %v1145_v55 = vrot.slane %v1144_v42, 4  ;;  %v1085_v29 = vsel %vm4948_vm8, %v1082_v56, %v1083_v6 }
 0x10e   :  { %v1098_v28 = vsel %vm1097_vm4, %v1095_v24, %v1096_v53  ;;  %v1111_v25 = vsel %vm1110_vm14, %v1108_v30, %v1109_v36  ;;  %v1157_v5 = vsel %vm1156_vm12, %v1154_v23, %v1155_v35  ;;  %v1124_v47 = vsel %vm1123_vm3, %v1121_v13, %v1122_v10 }
 0x10f   :  { %vm1136_vm10 = vcmp.lt.s32.totalorder %v1134_v11, %v1135_v39  ;;  %vm1146_vm1 = vcmp.lt.s32.totalorder %v1144_v42, %v1145_v55  ;;  %v1158_v18 = vrot.slane %v1157_v5, 4  ;;  %v1060_v14 = vrot.slane %v1059_v40, 1 }
 0x110   :  { %v1073_v59 = vrot.slane %v1072_v44, 1  ;;  %v1137_v48 = vsel %vm1136_vm10, %v1134_v11, %v1135_v39  ;;  %v1147_v31 = vsel %vm1146_vm1, %v1144_v42, %v1145_v55  ;;  %v1086_v62 = vrot.slane %v1085_v29, 1  ;;  %v4993_v11 = vld [vmem:[%s7049_s0 + $0x18] sm:$0xff]  ;;  %v3477_v55 = vld [vmem:[%s7049_s0 + $0x20] sm:$0xff] }
 0x111   :  { %v1099_v32 = vrot.slane %v1098_v28, 1  ;;  %v1148_v9 = vrot.slane %v1147_v31, 2  ;;  %vm1159_vm9 = vcmp.lt.s32.totalorder %v1157_v5, %v1158_v18  ;;  %vm1215_vm15 = vcmask 1042432   ;;  %7525 = vst [vmem:[#allocation40_spill] sm:$0xff] %v4993_v11 }
 0x112   :  { %v7523_v45 = vrot.slane %v4897_v20, 1  ;;  %v1112_v24 = vrot.slane %v1111_v25, 1  ;;  %v1125_v63 = vrot.slane %v1124_v47, 1  ;;  %v1160_v6 = vsel %vm1159_vm9, %v1157_v5, %v1158_v18  ;;  %v5031_v18 = vld [vmem:[%s7049_s0 + $0x28] sm:$0xff] }
 0x113   :  { %vm1048_vm11 = vcmp.lt.s32.totalorder %v4919_v7, %v1047_v61  ;;  %v1138_v30 = vrot.slane %v1137_v48, 1  ;;  %vm1149_vm8 = vcmp.lt.s32.totalorder %v1147_v31, %v1148_v9  ;;  %v1161_v53 = vrot.slane %v1160_v6, 2  ;;  %7530 = vst [vmem:[#allocation42_spill] sm:$0xff] %v5031_v18 }
 0x114   :  { %v4969_v56 = vsel %vm4926_vm6, %v4897_v20, %v7523_v45  ;;  %v7524_v36 = vrot.slane %v4912_v12, 1  ;;  %vm1061_vm7 = vcmp.lt.s32.totalorder %v1059_v40, %v1060_v14  ;;  %vm1074_vm4 = vcmp.lt.s32.totalorder %v1072_v44, %v1073_v59 }
 0x115   :  { %v1150_v52 = vsel %vm1149_vm8, %v1147_v31, %v1148_v9  ;;  %vm1087_vm6 = vcmp.lt.s32.totalorder %v1085_v29, %v1086_v62  ;;  %vm1100_vm14 = vcmp.lt.s32.totalorder %v1098_v28, %v1099_v32  ;;  %vm1162_vm2 = vcmp.lt.s32.totalorder %v1160_v6, %v1161_v53  ;;  %v3481_v9 = vld [vmem:[%s7049_s0 + $0x40] sm:$0xff] }
 0x116   :  { %v4977_v13 = vsel %vm4939_vm13, %v4912_v12, %v7524_v36  ;;  %v1151_v20 = vrot.slane %v1150_v52, 1  ;;  %v4980_v5 = vsel %vm1048_vm11, %v4919_v7, %v1047_v61  ;;  %vm1113_vm0 = vcmp.lt.s32.totalorder %v1111_v25, %v1112_v24  ;;  %v3485_v36 = vld [vmem:[%s7049_s0 + $0x60] sm:$0xff] }
 0x117   :  { %vm1126_vm3 = vcmp.lt.s32.totalorder %v1124_v47, %v1125_v63  ;;  %v1163_v10 = vsel %vm1162_vm2, %v1160_v6, %v1161_v53  ;;  %v4982_v15 = vsel %vm1061_vm7, %v1059_v40, %v1060_v14  ;;  %v4984_v23 = vsel %vm1074_vm4, %v1072_v44, %v1073_v59  ;;  %v5040_v59 = vld [vmem:[%s7049_s0 + $0x38] sm:$0xff]  ;;  %v3483_v6 = vld [vmem:[%s7049_s0 + $0x50] sm:$0xff] }
 0x118   :  { %vm1139_vm12 = vcmp.lt.s32.totalorder %v1137_v48, %v1138_v30  ;;  %v1164_v12 = vrot.slane %v1163_v10, 1  ;;  %v4986_v43 = vsel %vm1087_vm6, %v1085_v29, %v1086_v62  ;;  %v4988_v35 = vsel %vm1100_vm14, %v1098_v28, %v1099_v32  ;;  %7531 = vst [vmem:[#allocation44_spill] sm:$0xff] %v5040_v59  ;;  %v3488_v40 = vld [vmem:[%s7049_s0 + $0x78] sm:$0xff] }
 0x119   :  { %vm1152_vm13 = vcmp.lt.s32.totalorder %v1150_v52, %v1151_v20  ;;  %v1220_v7 = vrot.slane %v4993_v11, 5  ;;  %v4996_v61 = vsel %vm1113_vm0, %v1111_v25, %v1112_v24  ;;  %v4998_v42 = vsel %vm1126_vm3, %v1124_v47, %v1125_v63  ;;  %v3482_v24 = vld [vmem:[%s7049_s0 + $0x48] sm:$0xff] }
 0x11a   :  { %vm5000_vm10 = vcmp.lt.s32.totalorder %v1163_v10, %v1164_v12  ;;  %vm1167_vm1 = vcmp.eq.s32.totalorder %v7322_v41, %v4895_v34  ;;  %v5006_v44 = vsel %vm1139_vm12, %v1137_v48, %v1138_v30  ;;  %vm7209_vm9 = vcmp.eq.s32.totalorder %v7322_v41, %v4903_v60 }
 0x11b   :  { %vm7207_vm11 = vcmp.eq.s32.totalorder %v7322_v41, %v4905_v8  ;;  %vm7206_vm8 = vcmp.eq.s32.totalorder %v7322_v41, %v4907_v27  ;;  %v7528_v47 = vrot.slane %v4748_v21, 5  ;;  %v7529_v25 = vrot.slane %v4742_v16, 5  ;;  %v3479_v21 = vld [vmem:[%s7049_s0 + $0x30] sm:$0xff] }
 0x11c   :  { %v1222_v29 = vrot.slane %v3477_v55, 5  ;;  %v5024_v28 = vsel %vm1152_vm13, %v1150_v52, %v1151_v20  ;;  %vm7205_vm7 = vcmp.eq.s32.totalorder %v7322_v41, %v4969_v56  ;;  %v1223_v16 = vrot.slane %v5031_v18, 5  ;;  %v3486_v20 = vld [vmem:[%s7049_s0 + $0x68] sm:$0xff] }
 0x11d   :  { %v5019_v39 = vsel %vm1215_vm15, %v7529_v25, %v7528_v47  ;;  %v1225_v14 = vrot.slane %v3479_v21, 5  ;;  %v1226_v48 = vrot.slane %v5040_v59, 5  ;;  %v5045_v31 = vsel %vm5000_vm10, %v1163_v10, %v1164_v12  ;;  %v3487_v12 = vld [vmem:[%s7049_s0 + $0x70] sm:$0xff]  ;;  %v3489_v25 = vld [vmem:[%s7049_s0 + $0x80] sm:$0xff]  ;;  %v3490_v21 = vld [vmem:[%s7049_s0 + $0x88] sm:$0xff] }
 0x11e   :  { %vm7208_vm4 = vcmp.eq.s32.totalorder %v7322_v41, %v4977_v13  ;;  %vm7210_vm6 = vcmp.eq.s32.totalorder %v7322_v41, %v4980_v5  ;;  %vm7211_vm14 = vcmp.eq.s32.totalorder %v7322_v41, %v4982_v15  ;;  %v7532_v62 = vrot.slane %v4754_v3, 5  ;;  %v3484_v3 = vld [vmem:[%s7049_s0 + $0x58] sm:$0xff] }
 0x11f   :  { %v1228_v45 = vrot.slane %v3481_v9, 5  ;;  %v1229_v63 = vrot.slane %v3482_v24, 5  ;;  %v1231_v30 = vrot.slane %v3483_v6, 5  ;;  %v1232_v53 = vrot.slane %v3484_v3, 5  ;;  %v3491_v9 = vld [vmem:[%s7049_s0 + $0x90] sm:$0xff]  ;;  %v3492_v6 = vld [vmem:[%s7049_s0 + $0x98] sm:$0xff] }
 0x120   :  { %v1221_v32 = vsel %vm1215_vm15, %v7532_v62, %v1220_v7  ;;  %v1234_v52 = vrot.slane %v3485_v36, 5  ;;  %v1235_v10 = vrot.slane %v3486_v20, 5  ;;  %v1237_v7 = vrot.slane %v3487_v12, 5  ;;  %v3493_v36 = vld [vmem:[%s7049_s0 + $0xa0] sm:$0xff]  ;;  %v3494_v12 = vld [vmem:[%s7049_s0 + $0xa8] sm:$0xff] }
 0x121   :  { %v1238_v47 = vrot.slane %v3488_v40, 5  ;;  %v1240_v55 = vrot.slane %v3489_v25, 5  ;;  %v1241_v62 = vrot.slane %v3490_v21, 5  ;;  %v1243_v24 = vrot.slane %v3491_v9, 5  ;;  %v3495_v25 = vld [vmem:[%s7049_s0 + $0xb0] sm:$0xff]  ;;  %v3496_v9 = vld [vmem:[%s7049_s0 + $0xb8] sm:$0xff] }
 0x122   :  { %v1244_v3 = vrot.slane %v3492_v6, 5  ;;  %v1246_v20 = vrot.slane %v3493_v36, 5  ;;  %v1247_v40 = vrot.slane %v3494_v12, 5  ;;  %v1249_v21 = vrot.slane %v3495_v25, 5 }
 0x123   :  { %v1250_v6 = vrot.slane %v3496_v9, 5  ;;  %v1252_v36 = vrot.slane %v3497_v2, 5  ;;  %v1253_v12 = vrot.slane %v3498_v37, 5  ;;  %v1224_v59 = vsel %vm1215_vm15, %v1222_v29, %v1223_v16  ;;  %v3499_v9 = vld [vmem:[%s7049_s0 + $0xd0] sm:$0xff]  ;;  %v3500_v2 = vld [vmem:[%s7049_s0 + $0xd8] sm:$0xff]  ;;  %v3501_v37 = vld [vmem:[%s7049_s0 + $0xe0] sm:$0xff] }
 0x124   :  { %v1227_v18 = vsel %vm1215_vm15, %v1225_v14, %v1226_v48  ;;  %v1230_v25 = vsel %vm1215_vm15, %v1228_v45, %v1229_v63  ;;  %v1233_v11 = vsel %vm1215_vm15, %v1231_v30, %v1232_v53  ;;  %v1255_v19 = vrot.slane %v3499_v9, 5  ;;  %v3502_v16 = vld [vmem:[%s7049_s0 + $0xe8] sm:$0xff] }
 0x125   :  { %v1256_v58 = vrot.slane %v3500_v2, 5  ;;  %v1258_v29 = vrot.slane %v3501_v37, 5  ;;  %v1259_v14 = vrot.slane %v3502_v16, 5  ;;  %v1236_v48 = vsel %vm1215_vm15, %v1234_v52, %v1235_v10  ;;  %v3503_v10 = vld [vmem:[%s7049_s0 + $0xf0] sm:$0xff] }
 0x126   :  { %v1239_v45 = vsel %vm1215_vm15, %v1237_v7, %v1238_v47  ;;  %v1242_v63 = vsel %vm1215_vm15, %v1240_v55, %v1241_v62  ;;  %v5130_v30 = vsel %vm1215_vm15, %v1243_v24, %v1244_v3  ;;  %v5133_v53 = vsel %vm1215_vm15, %v1246_v20, %v1247_v40 }
 0x127   :  { %v5136_v9 = vsel %vm1215_vm15, %v1249_v21, %v1250_v6  ;;  %v5139_v2 = vsel %vm1215_vm15, %v1252_v36, %v1253_v12  ;;  %v1280_v52 = vsel %vm1167_vm1, %v5019_v39, 0.0  ;;  %vm1175_vm2 = vcmp.eq.s32.totalorder %v7322_v41, %v4984_v23 }
 0x128   :  { %v1261_v7 = vrot.slane %v3503_v10, 5  ;;  %v1281_v47 = vsel %vm7209_vm9, %v1221_v32, 0.0  ;;  %v1282_v55 = vsel %vm7207_vm11, %v1224_v59, 0.0  ;;  %v1283_v39 = vsel %vm7206_vm8, %v1227_v18, 0.0  ;;  %v3504_v59 = vld [vmem:[%s7049_s0 + $0xf8] sm:$0xff] }
 0x129   :  { %vm1176_vm0 = vcmp.eq.s32.totalorder %v7322_v41, %v4986_v43  ;;  %vm1177_vm3 = vcmp.eq.s32.totalorder %v7322_v41, %v4988_v35  ;;  %vm1178_vm12 = vcmp.eq.s32.totalorder %v7322_v41, %v4996_v61  ;;  %v1257_v62 = vsel %vm1215_vm15, %v1255_v19, %v1256_v58 }
 0x12a   :  { %v1260_v32 = vsel %vm1215_vm15, %v1258_v29, %v1259_v14  ;;  %v1262_v24 = vrot.slane %v3504_v59, 5  ;;  %v1284_v18 = vsel %vm7205_vm7, %v1230_v25, 0.0  ;;  %vm1179_vm13 = vcmp.eq.s32.totalorder %v7322_v41, %v4998_v42 }
 0x12b   :  { %vm1180_vm10 = vcmp.eq.s32.totalorder %v7322_v41, %v5006_v44  ;;  %v1285_v58 = vsel %vm7208_vm4, %v1233_v11, 0.0  ;;  %v1286_v19 = vsel %vm7210_vm6, %v1236_v48, 0.0  ;;  %v1287_v3 = vsel %vm7211_vm14, %v1239_v45, 0.0 }
 0x12c   :  { %vm7533_vm5 = vcmask 62464   ;;  %vm1181_vm7 = vcmp.eq.s32.totalorder %v7322_v41, %v5024_v28  ;;  %vm7220_vm8 = vcmp.eq.s32.totalorder %v7322_v41, %v5045_v31 }
 0x12d   :  { %v1296_v20 = vsel %vm7533_vm5, %v1280_v52, 0.0  ;;  %vm7534_vm11 = vmmov %vm7533_vm5 }
 0x12e   :  { %v1297_v40 = vrot.slane %v1296_v20, 4  ;;  %v1303_v21 = vsel %vm7534_vm11, %v1281_v47, 0.0  ;;  %vm7535_vm4 = vmmov %vm7533_vm5 }
 0x12f   :  { %v1310_v11 = vsel %vm7535_vm4, %v1282_v55, 0.0  ;;  %vm7536_vm9 = vmmov %vm7535_vm4  ;;  %v1304_v36 = vrot.slane %v1303_v21, 4 }
 0x130   :  { %v1317_v6 = vsel %vm7536_vm9, %v1283_v39, 0.0  ;;  %v1311_v12 = vrot.slane %v1310_v11, 4  ;;  %vm7537_vm6 = vmmov %vm7535_vm4  ;;  %v1298_v29 = vadd.f32 %v1297_v40, %v1296_v20 }
 0x131   :  { %v1318_v25 = vrot.slane %v1317_v6, 4  ;;  %v1324_v37 = vsel %vm7537_vm6, %v1284_v18, 0.0  ;;  %vm7538_vm5 = vmmov %vm7535_vm4  ;;  %v1305_v45 = vadd.f32 %v1304_v36, %v1303_v21 }
 0x132   :  { %v1325_v16 = vrot.slane %v1324_v37, 4  ;;  %v1331_v14 = vsel %vm7538_vm5, %v1285_v58, 0.0  ;;  %vm7539_vm14 = vmmov %vm7535_vm4  ;;  %v1312_v52 = vadd.f32 %v1311_v12, %v1310_v11  ;;  %v1299_v47 = vrot.slane %v1298_v29, 2 }
 0x133   :  { %v1338_v48 = vsel %vm7539_vm14, %v1286_v19, 0.0  ;;  %v1319_v10 = vadd.f32 %v1318_v25, %v1317_v6  ;;  %v1332_v59 = vrot.slane %v1331_v14, 4  ;;  %vm7540_vm11 = vmmov %vm7535_vm4  ;;  %v1306_v46 = vrot.slane %v1305_v45, 2 }
 0x134   :  { %v1326_v17 = vadd.f32 %v1325_v16, %v1324_v37  ;;  %v1339_v55 = vrot.slane %v1338_v48, 4  ;;  %v1345_v39 = vsel %vm7540_vm11, %v1287_v3, 0.0  ;;  %v1313_v38 = vrot.slane %v1312_v52, 2  ;;  %vm7542_vm9 = vmmov %vm7535_vm4 }
 0x135   :  { %v1320_v49 = vrot.slane %v1319_v10, 2  ;;  %v1333_v33 = vadd.f32 %v1332_v59, %v1331_v14  ;;  %v1300_v18 = vadd.f32 %v1299_v47, %v1298_v29  ;;  %v1346_v50 = vrot.slane %v1345_v39, 4  ;;  %vm7543_vm6 = vmmov %vm7535_vm4 }
 0x136   :  { %v1327_v20 = vrot.slane %v1326_v17, 2  ;;  %v1340_v40 = vadd.f32 %v1339_v55, %v1338_v48  ;;  %v1263_v58 = vsel %vm1215_vm15, %v1261_v7, %v1262_v24  ;;  %v1307_v19 = vadd.f32 %v1306_v46, %v1305_v45  ;;  %vm7545_vm14 = vmmov %vm7535_vm4 }
 0x137   :  { %v1314_v21 = vadd.f32 %v1313_v38, %v1312_v52  ;;  %v1321_v11 = vadd.f32 %v1320_v49, %v1319_v10  ;;  %v1288_v6 = vsel %vm1175_vm2, %v1242_v63, 0.0  ;;  %v1301_v36 = vrot.slane %v1300_v18, 1  ;;  %vm7546_vm5 = vmmov %vm7535_vm4 }
 0x138   :  { %v1328_v12 = vadd.f32 %v1327_v20, %v1326_v17  ;;  %v1334_v3 = vrot.slane %v1333_v33, 2  ;;  %v1289_v25 = vsel %vm1176_vm0, %v5130_v30, 0.0  ;;  %v1290_v7 = vsel %vm1177_vm3, %v5133_v53, 0.0  ;;  %vm7547_vm11 = vmmov %vm7535_vm4 }
 0x139   :  { %v1291_v49 = vsel %vm1178_vm12, %v5136_v9, 0.0  ;;  %v1341_v38 = vrot.slane %v1340_v40, 2  ;;  %v1292_v46 = vsel %vm1179_vm13, %v5139_v2, 0.0  ;;  %v1293_v17 = vsel %vm1180_vm10, %v1257_v62, 0.0 }
 0x13a   :  { %v1308_v63 = vrot.slane %v1307_v19, 1  ;;  %v1347_v30 = vadd.f32 %v1346_v50, %v1345_v39  ;;  %v1294_v53 = vsel %vm1181_vm7, %v1260_v32, 0.0  ;;  %v1295_v9 = vsel %vm7220_vm8, %v1263_v58, 0.0 }
 0x13b   :  { %v1315_v24 = vrot.slane %v1314_v21, 1  ;;  %v1322_v37 = vrot.slane %v1321_v11, 1  ;;  %v5227_v29 = vadd.f32 %v1301_v36, %v1300_v18  ;;  %v1329_v16 = vrot.slane %v1328_v12, 1 }
 0x13c   :  { %v5229_v2 = vadd.f32 %v1334_v3, %v1333_v33  ;;  %v1352_v14 = vsel %vm7542_vm9, %v1288_v6, 0.0  ;;  %v5232_v62 = vadd.f32 %v1341_v38, %v1340_v40  ;;  %v1359_v48 = vsel %vm7535_vm4, %v1289_v25, 0.0  ;;  %vm7549_vm9 = vmmov %vm7535_vm4 }
 0x13d   :  { %7541 = vst [vmem:[#allocation46_spill] sm:$0xff] %v5227_v29  ;;  %v1353_v50 = vrot.slane %v1352_v14, 4  ;;  %v1366_v32 = vsel %vm7543_vm6, %v1290_v7, 0.0  ;;  %v5236_v45 = vadd.f32 %v1308_v63, %v1307_v19  ;;  %v1348_v52 = vrot.slane %v1347_v30, 2 }
 0x13e   :  { %v1360_v10 = vrot.slane %v1359_v48, 4  ;;  %v1367_v59 = vrot.slane %v1366_v32, 4  ;;  %v1373_v55 = vsel %vm7545_vm14, %v1291_v49, 0.0  ;;  %v1380_v33 = vsel %vm7546_vm5, %v1292_v46, 0.0 }
 0x13f   :  { %7544 = vst [vmem:[#allocation48_spill] sm:$0xff] %v5236_v45  ;;  %v1354_v47 = vadd.f32 %v1353_v50, %v1352_v14  ;;  %v1387_v39 = vsel %vm7547_vm11, %v1293_v17, 0.0  ;;  %v5241_v18 = vadd.f32 %v1315_v24, %v1314_v21  ;;  %v1374_v58 = vrot.slane %v1373_v55, 4 }
 0x140   :  { %v1361_v20 = vadd.f32 %v1360_v10, %v1359_v48  ;;  %v1368_v40 = vadd.f32 %v1367_v59, %v1366_v32  ;;  %v1381_v36 = vrot.slane %v1380_v33, 4  ;;  %v1388_v3 = vrot.slane %v1387_v39, 4 }
 0x141   :  { %7548 = vst [vmem:[#allocation50_spill] sm:$0xff] %v5241_v18  ;;  %v1355_v6 = vrot.slane %v1354_v47, 2  ;;  %v1394_v19 = vsel %vm7549_vm9, %v1294_v53, 0.0  ;;  %v1375_v38 = vadd.f32 %v1374_v58, %v1373_v55  ;;  %v1349_v14 = vadd.f32 %v1348_v52, %v1347_v30 }
 0x142   :  { %v1362_v25 = vrot.slane %v1361_v20, 2  ;;  %v1369_v7 = vrot.slane %v1368_v40, 2  ;;  %v1395_v63 = vrot.slane %v1394_v19, 4  ;;  %v1382_v49 = vadd.f32 %v1381_v36, %v1380_v33 }
 0x143   :  { %v1389_v50 = vadd.f32 %v1388_v3, %v1387_v39  ;;  %v1401_v46 = vsel %vm7535_vm4, %v1295_v9, 0.0  ;;  %v1356_v17 = vadd.f32 %v1355_v6, %v1354_v47  ;;  %v1376_v24 = vrot.slane %v1375_v38, 2 }
 0x144   :  { %v1363_v21 = vadd.f32 %v1362_v25, %v1361_v20  ;;  %v1396_v48 = vadd.f32 %v1395_v63, %v1394_v19  ;;  %v1370_v32 = vadd.f32 %v1369_v7, %v1368_v40  ;;  %v1383_v10 = vrot.slane %v1382_v49, 2 }
 0x145   :  { %v1390_v59 = vrot.slane %v1389_v50, 2  ;;  %v1402_v29 = vrot.slane %v1401_v46, 4  ;;  %v5245_v18 = vadd.f32 %v1322_v37, %v1321_v11  ;;  %v1336_v53 = vrot.slane %v5229_v2, 1 }
 0x146   :  { %v1377_v45 = vadd.f32 %v1376_v24, %v1375_v38  ;;  %v1397_v55 = vrot.slane %v1396_v48, 2  ;;  %v5248_v58 = vadd.f32 %v1329_v16, %v1328_v12  ;;  %v1384_v30 = vadd.f32 %v1383_v10, %v1382_v49  ;;  %v3505_v12 = vld [vmem:[%s7049_s0 + $0x100] sm:$0xff]  ;;  %v3507_v38 = vld [vmem:[%s7049_s0 + $0x110] sm:$0xff]  ;;  %v3508_v49 = vld [vmem:[%s7049_s0 + $0x118] sm:$0xff] }
 0x147   :  { %v1391_v52 = vadd.f32 %v1390_v59, %v1389_v50  ;;  %v1403_v33 = vadd.f32 %v1402_v29, %v1401_v46  ;;  %v1343_v9 = vrot.slane %v5232_v62, 1  ;;  %v1350_v47 = vrot.slane %v1349_v14, 1  ;;  %v3506_v29 = vld [vmem:[%s7049_s0 + $0x108] sm:$0xff] }
 0x148   :  { %7550 = vst [vmem:[#allocation20_spill] sm:$0xff] %v5248_v58  ;;  %v1357_v39 = vrot.slane %v1356_v17, 1  ;;  %v1398_v20 = vadd.f32 %v1397_v55, %v1396_v48  ;;  %v1364_v40 = vrot.slane %v1363_v21, 1  ;;  %v1371_v6 = vrot.slane %v1370_v32, 1  ;;  %v3509_v48 = vld [vmem:[%s7049_s0 + $0x120] sm:$0xff]  ;;  %v3510_v59 = vld [vmem:[%s7049_s0 + $0x128] sm:$0xff] }
 0x149   :  { %v1378_v36 = vrot.slane %v1377_v45, 1  ;;  %v1404_v3 = vrot.slane %v1403_v33, 2  ;;  %v1385_v11 = vrot.slane %v1384_v30, 1  ;;  %v1392_v37 = vrot.slane %v1391_v52, 1 }
 0x14a   :  { %v1399_v19 = vrot.slane %v1398_v20, 1  ;;  %v1440_v16 = vrot.slane %v3505_v12, 5  ;;  %v1441_v7 = vrot.slane %v3506_v29, 5  ;;  %v1443_v63 = vrot.slane %v3507_v38, 5 }
 0x14b   :  { %v5254_v25 = vadd.f32 %v1404_v3, %v1403_v33  ;;  %v1444_v50 = vrot.slane %v3508_v49, 5  ;;  %v5266_v46 = vadd.f32 %v1336_v53, %v5229_v2  ;;  %v5269_v24 = vadd.f32 %v1343_v9, %v5232_v62 }
 0x14c   :  { %v1446_v10 = vrot.slane %v3509_v48, 5  ;;  %v1447_v55 = vrot.slane %v3510_v59, 5  ;;  %v5277_v33 = vadd.f32 %v1350_v47, %v1349_v14  ;;  %v5279_v3 = vadd.f32 %v1357_v39, %v1356_v17  ;;  %v3511_v17 = vld [vmem:[%s7049_s0 + $0x130] sm:$0xff]  ;;  %v3514_v39 = vld [vmem:[%s7049_s0 + $0x148] sm:$0xff]  ;;  %v3520_v48 = vld [vmem:[%s7049_s0 + $0x178] sm:$0xff] }
 0x14d   :  { %7551 = vst [vmem:[#allocation82_spill] sm:$0xff] %v5266_v46  ;;  %7552 = vst [vmem:[#allocation83_spill] sm:$0xff] %v5269_v24  ;;  %v5281_v12 = vadd.f32 %v1364_v40, %v1363_v21  ;;  %v5283_v2 = vadd.f32 %v1371_v6, %v1370_v32  ;;  %v5285_v62 = vadd.f32 %v1378_v36, %v1377_v45  ;;  %v1406_v38 = vrot.slane %v5254_v25, 1  ;;  %v3512_v32 = vld [vmem:[%s7049_s0 + $0x138] sm:$0xff]  ;;  %v3515_v40 = vld [vmem:[%s7049_s0 + $0x150] sm:$0xff] }
 0x14e   :  { %7553 = vst [vmem:[#allocation84_spill] sm:$0xff] %v5277_v33  ;;  %7554 = vst [vmem:[#allocation85_spill] sm:$0xff] %v5279_v3  ;;  %v5287_v53 = vadd.f32 %v1385_v11, %v1384_v30  ;;  %v5289_v9 = vadd.f32 %v1392_v37, %v1391_v52  ;;  %v5291_v29 = vadd.f32 %v1399_v19, %v1398_v20  ;;  %v1449_v45 = vrot.slane %v3511_v17, 5  ;;  %v3513_v52 = vld [vmem:[%s7049_s0 + $0x140] sm:$0xff]  ;;  %v3516_v36 = vld [vmem:[%s7049_s0 + $0x158] sm:$0xff] }
 0x14f   :  { %7555 = vst [vmem:[#allocation86_spill] sm:$0xff] %v5281_v12  ;;  %7556 = vst [vmem:[#allocation87_spill] sm:$0xff] %v5283_v2  ;;  %v5295_v49 = vsel %vm1215_vm15, %v1440_v16, %v1441_v7  ;;  %v5298_v14 = vsel %vm1215_vm15, %v1443_v63, %v1444_v50  ;;  %v1448_v21 = vsel %vm1215_vm15, %v1446_v10, %v1447_v55  ;;  %v1450_v30 = vrot.slane %v3512_v32, 5  ;;  %v3517_v37 = vld [vmem:[%s7049_s0 + $0x160] sm:$0xff]  ;;  %v3518_v16 = vld [vmem:[%s7049_s0 + $0x168] sm:$0xff] }
 0x150   :  { %7557 = vst [vmem:[#allocation88_spill] sm:$0xff] %v5285_v62  ;;  %7558 = vst [vmem:[#allocation89_spill] sm:$0xff] %v5287_v53  ;;  %v1452_v47 = vrot.slane %v3513_v52, 5  ;;  %v1453_v20 = vrot.slane %v3514_v39, 5  ;;  %v1455_v6 = vrot.slane %v3515_v40, 5  ;;  %v1456_v11 = vrot.slane %v3516_v36, 5 }
 0x151   :  { %7559 = vst [vmem:[#allocation90_spill] sm:$0xff] %v5289_v9  ;;  %7560 = vst [vmem:[#allocation91_spill] sm:$0xff] %v5291_v29  ;;  %v1458_v19 = vrot.slane %v3517_v37, 5  ;;  %v1459_v7 = vrot.slane %v3518_v16, 5  ;;  %v3519_v63 = vld [vmem:[%s7049_s0 + $0x170] sm:$0xff]  ;;  %v1462_v10 = vrot.slane %v3520_v48, 5  ;;  %v5362_v53 = vadd.f32 %v1406_v38, %v5254_v25 }
 0x152   :  { %v1461_v50 = vrot.slane %v3519_v63, 5  ;;  %v3521_v59 = vld [vmem:[%s7049_s0 + $0x180] sm:$0xff]  ;;  %v3522_v17 = vld [vmem:[%s7049_s0 + $0x188] sm:$0xff]  ;;  %v3523_v52 = vld [vmem:[%s7049_s0 + $0x190] sm:$0xff]  ;;  %v1454_v62 = vsel %vm1215_vm15, %v1452_v47, %v1453_v20  ;;  %v1457_v2 = vsel %vm1215_vm15, %v1455_v6, %v1456_v11  ;;  %vm7562_vm6 = vcmp.eq.s32.totalorder %v7322_v41, %v4903_v60 }
 0x153   :  { %v1464_v55 = vrot.slane %v3521_v59, 5  ;;  %v1465_v32 = vrot.slane %v3522_v17, 5  ;;  %v1467_v39 = vrot.slane %v3523_v52, 5  ;;  %v3524_v40 = vld [vmem:[%s7049_s0 + $0x198] sm:$0xff]  ;;  %v3525_v37 = vld [vmem:[%s7049_s0 + $0x1a0] sm:$0xff]  ;;  %v3526_v63 = vld [vmem:[%s7049_s0 + $0x1a8] sm:$0xff]  ;;  %vm7563_vm14 = vcmp.eq.s32.totalorder %v7322_v41, %v4905_v8 }
 0x154   :  { %v1468_v36 = vrot.slane %v3524_v40, 5  ;;  %v1470_v16 = vrot.slane %v3525_v37, 5  ;;  %v1471_v48 = vrot.slane %v3526_v63, 5  ;;  %v3527_v59 = vld [vmem:[%s7049_s0 + $0x1b0] sm:$0xff]  ;;  %v3528_v52 = vld [vmem:[%s7049_s0 + $0x1b8] sm:$0xff]  ;;  %v3529_v29 = vld [vmem:[%s7049_s0 + $0x1c0] sm:$0xff]  ;;  %v1463_v47 = vsel %vm1215_vm15, %v1461_v50, %v1462_v10 }
 0x155   :  { %v1473_v17 = vrot.slane %v3527_v59, 5  ;;  %v1474_v40 = vrot.slane %v3528_v52, 5  ;;  %v1476_v37 = vrot.slane %v3529_v29, 5  ;;  %v3530_v9 = vld [vmem:[%s7049_s0 + $0x1c8] sm:$0xff]  ;;  %7561 = vst [vmem:[#allocation92_spill] sm:$0xff] %v5362_v53  ;;  %v1451_v59 = vsel %vm1215_vm15, %v1449_v45, %v1450_v30  ;;  %v3531_v52 = vld [vmem:[%s7049_s0 + $0x1d0] sm:$0xff] }
 0x156   :  { %v1477_v63 = vrot.slane %v3530_v9, 5  ;;  %v1479_v12 = vrot.slane %v3531_v52, 5  ;;  %v3532_v29 = vld [vmem:[%s7049_s0 + $0x1d8] sm:$0xff]  ;;  %v3533_v25 = vld [vmem:[%s7049_s0 + $0x1e0] sm:$0xff]  ;;  %v3534_v38 = vld [vmem:[%s7049_s0 + $0x1e8] sm:$0xff]  ;;  %v1460_v30 = vsel %vm1215_vm15, %v1458_v19, %v1459_v7  ;;  %v1466_v20 = vsel %vm1215_vm15, %v1464_v55, %v1465_v32 }
 0x157   :  { %v1480_v3 = vrot.slane %v3532_v29, 5  ;;  %v1482_v9 = vrot.slane %v3533_v25, 5  ;;  %v1483_v45 = vrot.slane %v3534_v38, 5  ;;  %v1469_v6 = vsel %vm1215_vm15, %v1467_v39, %v1468_v36  ;;  %v3535_v19 = vld [vmem:[%s7049_s0 + $0x1f0] sm:$0xff]  ;;  %v3536_v32 = vld [vmem:[%s7049_s0 + $0x1f8] sm:$0xff] }
 0x158   :  { %v1472_v11 = vsel %vm1215_vm15, %v1470_v16, %v1471_v48  ;;  %v1475_v52 = vsel %vm1215_vm15, %v1473_v17, %v1474_v40  ;;  %v1478_v29 = vsel %vm1215_vm15, %v1476_v37, %v1477_v63  ;;  %v1504_v25 = vsel %vm1167_vm1, %v5295_v49, 0.0 }
 0x159   :  { %v1485_v7 = vrot.slane %v3535_v19, 5  ;;  %v1505_v50 = vsel %vm7562_vm6, %v5298_v14, 0.0  ;;  %v1506_v10 = vsel %vm7563_vm14, %v1448_v21, 0.0  ;;  %vm7564_vm5 = vcmp.eq.s32.totalorder %v7322_v41, %v4907_v27 }
 0x15a   :  { %v1507_v55 = vsel %vm7564_vm5, %v1451_v59, 0.0  ;;  %v1481_v34 = vsel %vm1215_vm15, %v1479_v12, %v1480_v3  ;;  %v1484_v49 = vsel %vm1215_vm15, %v1482_v9, %v1483_v45  ;;  %v1486_v39 = vrot.slane %v3536_v32, 5 }
 0x15b   :  { %vm7565_vm1 = vcmp.eq.s32.totalorder %v7322_v41, %v4969_v56  ;;  %vm7566_vm11 = vcmp.eq.s32.totalorder %v7322_v41, %v4977_v13  ;;  %vm7567_vm9 = vcmp.eq.s32.totalorder %v7322_v41, %v4980_v5  ;;  %vm7568_vm4 = vcmp.eq.s32.totalorder %v7322_v41, %v4982_v15 }
 0x15c   :  { %v1508_v60 = vsel %vm7565_vm1, %v1454_v62, 0.0  ;;  %v1509_v8 = vsel %vm7566_vm11, %v1457_v2, 0.0  ;;  %v1510_v27 = vsel %vm7567_vm9, %v1460_v30, 0.0  ;;  %v1511_v3 = vsel %vm7568_vm4, %v1463_v47, 0.0 }
 0x15d   :  { %vm7569_vm6 = vcmask 62464   ;;  %v1516_v23 = vsel %vm1179_vm13, %v1478_v29, 0.0  ;;  %v1518_v35 = vsel %vm1181_vm7, %v1484_v49, 0.0 }
 0x15e   :  { %v1520_v12 = vsel %vm7569_vm6, %v1504_v25, 0.0  ;;  %vm7570_vm14 = vmmov %vm7569_vm6 }
 0x15f   :  { %v1521_v14 = vrot.slane %v1520_v12, 4  ;;  %v1527_v21 = vsel %vm7570_vm14, %v1505_v50, 0.0  ;;  %vm7571_vm5 = vmmov %vm7569_vm6  ;;  %vm1632_vm6 = vcmask 64514  }
 0x160   :  { %v1534_v56 = vsel %vm7571_vm5, %v1506_v10, 0.0  ;;  %vm7572_vm1 = vmmov %vm7571_vm5  ;;  %v1528_v36 = vrot.slane %v1527_v21, 4 }
 0x161   :  { %v1541_v62 = vsel %vm7572_vm1, %v1507_v55, 0.0  ;;  %v1535_v13 = vrot.slane %v1534_v56, 4  ;;  %vm7573_vm11 = vmmov %vm7572_vm1  ;;  %v1522_v5 = vadd.f32 %v1521_v14, %v1520_v12 }
 0x162   :  { %v1542_v2 = vrot.slane %v1541_v62, 4  ;;  %v1548_v16 = vsel %vm7573_vm11, %v1508_v60, 0.0  ;;  %vm7574_vm9 = vmmov %vm7572_vm1  ;;  %v1529_v40 = vadd.f32 %v1528_v36, %v1527_v21  ;;  %v1512_v21 = vsel %vm1175_vm2, %v1466_v20, 0.0 }
 0x163   :  { %v1549_v48 = vrot.slane %v1548_v16, 4  ;;  %v1555_v17 = vsel %vm7574_vm9, %v1509_v8, 0.0  ;;  %vm7575_vm8 = vmmov %vm7572_vm1  ;;  %v1536_v37 = vadd.f32 %v1535_v13, %v1534_v56  ;;  %v1523_v9 = vrot.slane %v1522_v5, 2 }
 0x164   :  { %v1562_v15 = vsel %vm7575_vm8, %v1510_v27, 0.0  ;;  %v1543_v63 = vadd.f32 %v1542_v2, %v1541_v62  ;;  %v1556_v59 = vrot.slane %v1555_v17, 4  ;;  %vm7576_vm4 = vmmov %vm7572_vm1  ;;  %v1530_v47 = vrot.slane %v1529_v40, 2 }
 0x165   :  { %v1550_v38 = vadd.f32 %v1549_v48, %v1548_v16  ;;  %v1563_v45 = vrot.slane %v1562_v15, 4  ;;  %v1569_v30 = vsel %vm7576_vm4, %v1511_v3, 0.0  ;;  %v1537_v25 = vrot.slane %v1536_v37, 2  ;;  %vm7579_vm8 = vmmov %vm7572_vm1 }
 0x166   :  { %v1544_v19 = vrot.slane %v1543_v63, 2  ;;  %v1557_v50 = vadd.f32 %v1556_v59, %v1555_v17  ;;  %v1524_v10 = vadd.f32 %v1523_v9, %v1522_v5  ;;  %v1570_v60 = vrot.slane %v1569_v30, 4  ;;  %vm7580_vm2 = vmmov %vm7572_vm1 }
 0x167   :  { %v1551_v55 = vrot.slane %v1550_v38, 2  ;;  %v1564_v32 = vadd.f32 %v1563_v45, %v1562_v15  ;;  %v1487_v8 = vsel %vm1215_vm15, %v1485_v7, %v1486_v39  ;;  %v1531_v27 = vadd.f32 %v1530_v47, %v1529_v40 }
 0x168   :  { %v1538_v12 = vadd.f32 %v1537_v25, %v1536_v37  ;;  %v1558_v14 = vrot.slane %v1557_v50, 2  ;;  %v1525_v56 = vrot.slane %v1524_v10, 1  ;;  %v1545_v62 = vadd.f32 %v1544_v19, %v1543_v63 }
 0x169   :  { %v1571_v3 = vadd.f32 %v1570_v60, %v1569_v30  ;;  %v1513_v36 = vsel %vm1176_vm0, %v1469_v6, 0.0  ;;  %v1514_v13 = vsel %vm1177_vm3, %v1472_v11, 0.0  ;;  %v1515_v7 = vsel %vm1178_vm12, %v1475_v52, 0.0  ;;  %vm7581_vm0 = vmmov %vm7572_vm1 }
 0x16a   :  { %v1552_v39 = vadd.f32 %v1551_v55, %v1550_v38  ;;  %v1517_v20 = vsel %vm1180_vm10, %v1481_v34, 0.0  ;;  %v1559_v2 = vadd.f32 %v1558_v14, %v1557_v50  ;;  %v1565_v43 = vrot.slane %v1564_v32, 2  ;;  %vm7582_vm7 = vmmov %vm7581_vm0 }
 0x16b   :  { %vm7577_vm15 = vcmp.eq.s32.totalorder %v7322_v41, %v5045_v31  ;;  %v1532_v6 = vrot.slane %v1531_v27, 1  ;;  %v1539_v11 = vrot.slane %v1538_v12, 1  ;;  %v5453_v52 = vadd.f32 %v1525_v56, %v1524_v10  ;;  %vm7583_vm3 = vmmov %vm7581_vm0 }
 0x16c   :  { %v1519_v61 = vsel %vm7577_vm15, %v1487_v8, 0.0  ;;  %v1546_v42 = vrot.slane %v1545_v62, 1  ;;  %v1572_v29 = vrot.slane %v1571_v3, 2  ;;  %v1576_v16 = vsel %vm7579_vm8, %v1512_v21, 0.0  ;;  %vm7584_vm12 = vmmov %vm7581_vm0 }
 0x16d   :  { %7578 = vst [vmem:[#allocation93_spill] sm:$0xff] %v5453_v52  ;;  %v1553_v44 = vrot.slane %v1552_v39, 1  ;;  %v1577_v34 = vrot.slane %v1576_v16, 4  ;;  %v1583_v5 = vsel %vm7580_vm2, %v1513_v36, 0.0  ;;  %v1590_v48 = vsel %vm7581_vm0, %v1514_v13, 0.0  ;;  %vm7585_vm13 = vmmov %vm7581_vm0 }
 0x16e   :  { %v1560_v28 = vrot.slane %v1559_v2, 1  ;;  %v1566_v49 = vadd.f32 %v1565_v43, %v1564_v32  ;;  %v1584_v17 = vrot.slane %v1583_v5, 4  ;;  %v1591_v15 = vrot.slane %v1590_v48, 4  ;;  %vm7586_vm10 = vmmov %vm7581_vm0 }
 0x16f   :  { %v1578_v31 = vadd.f32 %v1577_v34, %v1576_v16  ;;  %v1597_v40 = vsel %vm7582_vm7, %v1515_v7, 0.0  ;;  %v1604_v37 = vsel %vm7583_vm3, %v1516_v23, 0.0  ;;  %v1611_v63 = vsel %vm7584_vm12, %v1517_v20, 0.0 }
 0x170   :  { %v1573_v59 = vadd.f32 %v1572_v29, %v1571_v3  ;;  %v1585_v9 = vadd.f32 %v1584_v17, %v1583_v5  ;;  %v1592_v38 = vadd.f32 %v1591_v15, %v1590_v48  ;;  %v1598_v45 = vrot.slane %v1597_v40, 4 }
 0x171   :  { %v1579_v30 = vrot.slane %v1578_v31, 2  ;;  %v1605_v47 = vrot.slane %v1604_v37, 4  ;;  %v1612_v25 = vrot.slane %v1611_v63, 4  ;;  %v1618_v19 = vsel %vm7585_vm13, %v1518_v35, 0.0 }
 0x172   :  { %v1586_v50 = vrot.slane %v1585_v9, 2  ;;  %v1593_v10 = vrot.slane %v1592_v38, 2  ;;  %v1599_v55 = vadd.f32 %v1598_v45, %v1597_v40  ;;  %v1619_v32 = vrot.slane %v1618_v19, 4 }
 0x173   :  { %v1580_v60 = vadd.f32 %v1579_v30, %v1578_v31  ;;  %v1606_v8 = vadd.f32 %v1605_v47, %v1604_v37  ;;  %v1613_v14 = vadd.f32 %v1612_v25, %v1611_v63  ;;  %v1625_v21 = vsel %vm7586_vm10, %v1519_v61, 0.0 }
 0x174   :  { %v1567_v56 = vrot.slane %v1566_v49, 1  ;;  %v1574_v36 = vrot.slane %v1573_v59, 1  ;;  %v1600_v3 = vrot.slane %v1599_v55, 2  ;;  %v1620_v13 = vadd.f32 %v1619_v32, %v1618_v19 }
 0x175   :  { %v1587_v7 = vadd.f32 %v1586_v50, %v1585_v9  ;;  %v1607_v23 = vrot.slane %v1606_v8, 2  ;;  %v1614_v20 = vrot.slane %v1613_v14, 2  ;;  %v1626_v43 = vrot.slane %v1625_v21, 4 }
 0x176   :  { %v5463_v29 = vadd.f32 %v1532_v6, %v1531_v27  ;;  %v5465_v35 = vadd.f32 %v1539_v11, %v1538_v12  ;;  %v1581_v16 = vrot.slane %v1580_v60, 1  ;;  %v1594_v34 = vadd.f32 %v1593_v10, %v1592_v38 }
 0x177   :  { %v5467_v5 = vadd.f32 %v1546_v42, %v1545_v62  ;;  %v1601_v48 = vadd.f32 %v1600_v3, %v1599_v55  ;;  %v1621_v17 = vrot.slane %v1620_v13, 2  ;;  %v1627_v15 = vadd.f32 %v1626_v43, %v1625_v21 }
 0x178   :  { %7587 = vst [vmem:[#allocation94_spill] sm:$0xff] %v5463_v29  ;;  %7588 = vst [vmem:[#allocation95_spill] sm:$0xff] %v5465_v35  ;;  %v5469_v61 = vadd.f32 %v1553_v44, %v1552_v39  ;;  %v5471_v31 = vadd.f32 %v1560_v28, %v1559_v2  ;;  %v5473_v40 = vadd.f32 %v1567_v56, %v1566_v49  ;;  %v1588_v27 = vrot.slane %v1587_v7, 1 }
 0x179   :  { %7589 = vst [vmem:[#allocation96_spill] sm:$0xff] %v5467_v5  ;;  %v1608_v37 = vadd.f32 %v1607_v23, %v1606_v8  ;;  %v5475_v63 = vadd.f32 %v1574_v36, %v1573_v59  ;;  %v1615_v6 = vadd.f32 %v1614_v20, %v1613_v14  ;;  %v5477_v12 = vadd.f32 %v1581_v16, %v1580_v60 }
 0x17a   :  { %7590 = vst [vmem:[#allocation97_spill] sm:$0xff] %v5469_v61  ;;  %7591 = vst [vmem:[#allocation98_spill] sm:$0xff] %v5471_v31  ;;  %v1595_v11 = vrot.slane %v1594_v34, 1  ;;  %v1633_v62 = vsel %vm1632_vm6, %v7387_v22, -inf  ;;  %v1640_v39 = vsel %vm1632_vm6, %v7392_v4, -inf  ;;  %v1602_v42 = vrot.slane %v1601_v48, 1 }
 0x17b   :  { %7592 = vst [vmem:[#allocation99_spill] sm:$0xff] %v5473_v40  ;;  %7593 = vst [vmem:[#allocation100_spill] sm:$0xff] %v5475_v63  ;;  %v1622_v2 = vadd.f32 %v1621_v17, %v1620_v13  ;;  %v1628_v44 = vrot.slane %v1627_v15, 2  ;;  %v1634_v28 = vrot.slane %v1633_v62, 4  ;;  %v1609_v49 = vrot.slane %v1608_v37, 1 }
 0x17c   :  { %7594 = vst [vmem:[#allocation101_spill] sm:$0xff] %v5477_v12  ;;  %v1641_v9 = vrot.slane %v1640_v39, 4  ;;  %v1647_v59 = vsel %vm1632_vm6, %v7395_v57, -inf  ;;  %v1654_v38 = vsel %vm1632_vm6, %v7410_v1, -inf  ;;  %v1616_v45 = vrot.slane %v1615_v6, 1  ;;  %v7609_v12 = vld [vmem:[#allocation21_spill] sm:$0xff] }
 0x17d   :  { %v1635_v30 = vmax.f32 %v1633_v62, %v1634_v28  ;;  %v1648_v47 = vrot.slane %v1647_v59, 4  ;;  %v1655_v25 = vrot.slane %v1654_v38, 4  ;;  %v1661_v50 = vsel %vm1632_vm6, %v7413_v26, -inf }
 0x17e   :  { %v1642_v19 = vmax.f32 %v1640_v39, %v1641_v9  ;;  %v1668_v10 = vsel %vm1632_vm6, %v7417_v51, -inf  ;;  %v1675_v55 = vsel %vm1632_vm6, %v7420_v54, -inf  ;;  %v1629_v32 = vadd.f32 %v1628_v44, %v1627_v15 }
 0x17f   :  { %v1636_v60 = vrot.slane %v1635_v30, 2  ;;  %v1649_v8 = vmax.f32 %v1647_v59, %v1648_v47  ;;  %v1656_v14 = vmax.f32 %v1654_v38, %v1655_v25  ;;  %v1662_v56 = vrot.slane %v1661_v50, 4 }
 0x180   :  { %v1643_v21 = vrot.slane %v1642_v19, 2  ;;  %v1669_v36 = vrot.slane %v1668_v10, 4  ;;  %v1676_v3 = vrot.slane %v1675_v55, 4  ;;  %v1682_v43 = vsel %vm1632_vm6, %v7423_v0, -inf }
 0x181   :  { %v1637_v13 = vmax.f32 %v1635_v30, %v1636_v60  ;;  %v1650_v23 = vrot.slane %v1649_v8, 2  ;;  %v1657_v20 = vrot.slane %v1656_v14, 2  ;;  %v1663_v17 = vmax.f32 %v1661_v50, %v1662_v56 }
 0x182   :  { %v1644_v16 = vmax.f32 %v1642_v19, %v1643_v21  ;;  %v1670_v62 = vmax.f32 %v1668_v10, %v1669_v36  ;;  %v1677_v39 = vmax.f32 %v1675_v55, %v1676_v3  ;;  %v5495_v28 = vadd.f32 %v1588_v27, %v1587_v7 }
 0x183   :  { %v1623_v15 = vrot.slane %v1622_v2, 1  ;;  %v1630_v44 = vrot.slane %v1629_v32, 1  ;;  %v1683_v9 = vrot.slane %v1682_v43, 4  ;;  %v1638_v59 = vrot.slane %v1637_v13, 1 }
 0x184   :  { %7595 = vst [vmem:[#allocation102_spill] sm:$0xff] %v5495_v28  ;;  %v5497_v38 = vmax.f32 %v1649_v8, %v1650_v23  ;;  %v5499_v47 = vmax.f32 %v1656_v14, %v1657_v20  ;;  %v1664_v30 = vrot.slane %v1663_v17, 2  ;;  %v5501_v25 = vadd.f32 %v1595_v11, %v1594_v34  ;;  %v7602_v14 = vld [vmem:[#allocation39_spill] sm:$0xff] }
 0x185   :  { %v5503_v60 = vadd.f32 %v1602_v42, %v1601_v48  ;;  %v5505_v53 = vadd.f32 %v1609_v49, %v1608_v37  ;;  %v1684_v19 = vmax.f32 %v1682_v43, %v1683_v9  ;;  %v5507_v50 = vadd.f32 %v1616_v45, %v1615_v6  ;;  %v7603_v42 = vld [vmem:[#allocation41_spill] sm:$0xff]  ;;  %v7604_v45 = vld [vmem:[#allocation43_spill] sm:$0xff] }
 0x186   :  { %7596 = vst [vmem:[#allocation103_spill] sm:$0xff] %v5501_v25  ;;  %v1645_v7 = vrot.slane %v1644_v16, 1  ;;  %v1671_v27 = vrot.slane %v1670_v62, 2  ;;  %v1678_v10 = vrot.slane %v1677_v39, 2  ;;  %v5509_v55 = vadd.f32 %v1623_v15, %v1622_v2 }
 0x187   :  { %7597 = vst [vmem:[#allocation104_spill] sm:$0xff] %v5503_v60  ;;  %7598 = vst [vmem:[#allocation105_spill] sm:$0xff] %v5505_v53  ;;  %v5511_v21 = vadd.f32 %v1630_v44, %v1629_v32  ;;  %v1665_v8 = vmax.f32 %v1663_v17, %v1664_v30  ;;  %v1689_v56 = vsel %vm1632_vm6, %v7602_v14, -inf  ;;  %v5515_v34 = vmax.f32 %v1637_v13, %v1638_v59  ;;  %v7605_v32 = vld [vmem:[#allocation45_spill] sm:$0xff]  ;;  %v7606_v59 = vld [vmem:[#allocation47_spill] sm:$0xff] }
 0x188   :  { %7599 = vst [vmem:[#allocation106_spill] sm:$0xff] %v5507_v50  ;;  %7600 = vst [vmem:[#allocation107_spill] sm:$0xff] %v5509_v55  ;;  %v1652_v48 = vrot.slane %v5497_v38, 1  ;;  %v1659_v37 = vrot.slane %v5499_v47, 1  ;;  %v1690_v11 = vrot.slane %v1689_v56, 4  ;;  %v1685_v6 = vrot.slane %v1684_v19, 2 }
 0x189   :  { %7601 = vst [vmem:[#allocation108_spill] sm:$0xff] %v5511_v21  ;;  %v1696_v49 = vsel %vm1632_vm6, %v7603_v42, -inf  ;;  %v1703_v2 = vsel %vm1632_vm6, %v7604_v45, -inf  ;;  %v1710_v36 = vsel %vm1632_vm6, %v7605_v32, -inf  ;;  %v5525_v3 = vmax.f32 %v1644_v16, %v1645_v7  ;;  %v7607_v21 = vld [vmem:[#allocation49_spill] sm:$0xff]  ;;  %v7608_v50 = vld [vmem:[#allocation19_spill] sm:$0xff] }
 0x18a   :  { %v1672_v23 = vmax.f32 %v1670_v62, %v1671_v27  ;;  %v1679_v13 = vmax.f32 %v1677_v39, %v1678_v10  ;;  %v1691_v20 = vmax.f32 %v1689_v56, %v1690_v11  ;;  %v1666_v43 = vrot.slane %v1665_v8, 1 }
 0x18b   :  { %v1697_v17 = vrot.slane %v1696_v49, 4  ;;  %v1704_v15 = vrot.slane %v1703_v2, 4  ;;  %v1711_v44 = vrot.slane %v1710_v36, 4  ;;  %v1717_v30 = vsel %vm1632_vm6, %v7606_v59, -inf }
 0x18c   :  { %v1692_v9 = vrot.slane %v1691_v20, 2  ;;  %v1724_v55 = vsel %vm1632_vm6, %v7607_v21, -inf  ;;  %v1731_v53 = vsel %vm1632_vm6, %v7608_v50, -inf  ;;  %v1686_v60 = vmax.f32 %v1684_v19, %v1685_v6 }
 0x18d   :  { %v1698_v16 = vmax.f32 %v1696_v49, %v1697_v17  ;;  %v1705_v7 = vmax.f32 %v1703_v2, %v1704_v15  ;;  %v1712_v62 = vmax.f32 %v1710_v36, %v1711_v44  ;;  %v1718_v27 = vrot.slane %v1717_v30, 4 }
 0x18e   :  { %v1693_v39 = vmax.f32 %v1691_v20, %v1692_v9  ;;  %v1725_v10 = vrot.slane %v1724_v55, 4  ;;  %v1732_v56 = vrot.slane %v1731_v53, 4  ;;  %v1738_v63 = vsel %vm1632_vm6, %v7609_v12, -inf }
 0x18f   :  { %v1699_v11 = vrot.slane %v1698_v16, 2  ;;  %v1706_v25 = vrot.slane %v1705_v7, 2  ;;  %v1713_v28 = vrot.slane %v1712_v62, 2  ;;  %v1673_v33 = vrot.slane %v1672_v23, 1 }
 0x190   :  { %v1719_v40 = vmax.f32 %v1717_v30, %v1718_v27  ;;  %v1726_v31 = vmax.f32 %v1724_v55, %v1725_v10  ;;  %v1733_v61 = vmax.f32 %v1731_v53, %v1732_v56  ;;  %v1739_v6 = vrot.slane %v1738_v63, 4  ;;  %v7624_v10 = vld [vmem:[#allocation44_spill] sm:$0xff] }
 0x191   :  { %v1700_v24 = vmax.f32 %v1698_v16, %v1699_v11  ;;  %v1707_v46 = vmax.f32 %v1705_v7, %v1706_v25  ;;  %v1714_v19 = vmax.f32 %v1712_v62, %v1713_v28  ;;  %v1680_v49 = vrot.slane %v1679_v13, 1 }
 0x192   :  { %v1720_v2 = vrot.slane %v1719_v40, 2  ;;  %v1727_v36 = vrot.slane %v1726_v31, 2  ;;  %v1734_v20 = vrot.slane %v1733_v61, 2  ;;  %v1687_v17 = vrot.slane %v1686_v60, 1 }
 0x193   :  { %v1694_v15 = vrot.slane %v1693_v39, 1  ;;  %v1701_v44 = vrot.slane %v1700_v24, 1  ;;  %v1740_v9 = vmax.f32 %v1738_v63, %v1739_v6  ;;  %v1708_v58 = vrot.slane %v1707_v46, 1 }
 0x194   :  { %v1721_v52 = vmax.f32 %v1719_v40, %v1720_v2  ;;  %v1728_v5 = vmax.f32 %v1726_v31, %v1727_v36  ;;  %v1735_v35 = vmax.f32 %v1733_v61, %v1734_v20  ;;  %v5536_v30 = vmax.f32 %v5497_v38, %v1652_v48 }
 0x195   :  { %v5539_v53 = vmax.f32 %v5499_v47, %v1659_v37  ;;  %v1715_v28 = vrot.slane %v1714_v19, 1  ;;  %v1741_v25 = vrot.slane %v1740_v9, 2  ;;  %v5541_v55 = vmax.f32 %v1665_v8, %v1666_v43  ;;  %v7623_v43 = vld [vmem:[#allocation42_spill] sm:$0xff] }
 0x196   :  { %v5543_v16 = vmax.f32 %v1672_v23, %v1673_v33  ;;  %v1722_v7 = vrot.slane %v1721_v52, 1  ;;  %v1729_v62 = vrot.slane %v1728_v5, 1  ;;  %v5545_v27 = vmax.f32 %v1679_v13, %v1680_v49 }
 0x197   :  { %7610 = vst [vmem:[#allocation39_spill] sm:$0xff] %v5541_v55  ;;  %v5547_v63 = vmax.f32 %v1686_v60, %v1687_v17  ;;  %v1736_v31 = vrot.slane %v1735_v35, 1  ;;  %v1742_v61 = vmax.f32 %v1740_v9, %v1741_v25  ;;  %v5549_v40 = vmax.f32 %v1693_v39, %v1694_v15 }
 0x198   :  { %7611 = vst [vmem:[#allocation41_spill] sm:$0xff] %v5543_v16  ;;  %7612 = vst [vmem:[#allocation43_spill] sm:$0xff] %v5545_v27  ;;  %v5551_v38 = vmax.f32 %v1700_v24, %v1701_v44  ;;  %v5553_v47 = vmax.f32 %v1707_v46, %v1708_v58  ;;  %vm1745_vm14 = vcmp.eq.f32.partialorder %v7387_v22, %v5515_v34  ;;  %v5578_v46 = vrot.slane %v7322_v41, 6 }
 0x199   :  { %7613 = vst [vmem:[#allocation45_spill] sm:$0xff] %v5547_v63  ;;  %7614 = vst [vmem:[#allocation47_spill] sm:$0xff] %v5549_v40  ;;  %v5557_v8 = vmax.f32 %v1714_v19, %v1715_v28  ;;  %v1743_v33 = vrot.slane %v1742_v61, 1  ;;  %vm1746_vm5 = vcmp.eq.f32.partialorder %v7392_v4, %v5525_v3  ;;  %vm1747_vm1 = vcmp.eq.f32.partialorder %v7395_v57, %v5536_v30 }
 0x19a   :  { %7615 = vst [vmem:[#allocation49_spill] sm:$0xff] %v5551_v38  ;;  %7616 = vst [vmem:[#allocation19_spill] sm:$0xff] %v5553_v47  ;;  %v5563_v60 = vmax.f32 %v1721_v52, %v1722_v7  ;;  %v5565_v48 = vmax.f32 %v1728_v5, %v1729_v62  ;;  %vm1748_vm11 = vcmp.eq.f32.partialorder %v7410_v1, %v5539_v53  ;;  %v5595_v52 = vld [vmem:[%s7049_s0 + $0x8] sm:$0xff]  ;;  %v7622_v5 = vld [vmem:[#allocation40_spill] sm:$0xff]  ;;  %v1762_v23 = vsel %vm1745_vm14, %v5578_v46, 6 }
 0x19b   :  { %7617 = vst [vmem:[#allocation21_spill] sm:$0xff] %v5557_v8  ;;  %vm1749_vm9 = vcmp.eq.f32.partialorder %v7413_v26, %v5541_v55  ;;  %v5571_v58 = vmax.f32 %v1735_v35, %v1736_v31  ;;  %vm1750_vm4 = vcmp.eq.f32.partialorder %v7417_v51, %v5543_v16  ;;  %vm1751_vm15 = vcmp.eq.f32.partialorder %v7420_v54, %v5545_v27 }
 0x19c   :  { %7618 = vst [vmem:[#allocation109_spill] sm:$0xff] %v5563_v60  ;;  %7619 = vst [vmem:[#allocation110_spill] sm:$0xff] %v5565_v48  ;;  %vm1752_vm8 = vcmp.eq.f32.partialorder %v7423_v0, %v5547_v63  ;;  %vm1753_vm2 = vcmp.eq.f32.partialorder %v7602_v14, %v5549_v40  ;;  %vm1754_vm0 = vcmp.eq.f32.partialorder %v7603_v42, %v5551_v38  ;;  %v1763_v13 = vsel %vm1746_vm5, %v5578_v46, 6 }
 0x19d   :  { %7620 = vst [vmem:[#allocation111_spill] sm:$0xff] %v5571_v58  ;;  %vm1755_vm7 = vcmp.eq.f32.partialorder %v7604_v45, %v5553_v47  ;;  %v5588_v24 = vmax.f32 %v1742_v61, %v1743_v33  ;;  %vm1756_vm3 = vcmp.eq.f32.partialorder %v7605_v32, %v5557_v8  ;;  %v1764_v11 = vsel %vm1747_vm1, %v5578_v46, 6 }
 0x19e   :  { %v1765_v22 = vsel %vm1748_vm11, %v5578_v46, 6  ;;  %v1766_v4 = vsel %vm1749_vm9, %v5578_v46, 6  ;;  %v1767_v19 = vsel %vm1750_vm4, %v5578_v46, 6  ;;  %vm1757_vm12 = vcmp.eq.f32.partialorder %v7606_v59, %v5563_v60 }
 0x19f   :  { %7621 = vst [vmem:[#allocation112_spill] sm:$0xff] %v5588_v24  ;;  %vm1758_vm13 = vcmp.eq.f32.partialorder %v7607_v21, %v5565_v48  ;;  %v1768_v57 = vsel %vm1751_vm15, %v5578_v46, 6  ;;  %v1769_v1 = vsel %vm1752_vm8, %v5578_v46, 6  ;;  %v5641_v26 = vsel %vm1753_vm2, %v5578_v46, 6 }
 0x1a0   :  { %v5647_v51 = vsel %vm1754_vm0, %v5578_v46, 6  ;;  %vm1759_vm10 = vcmp.eq.f32.partialorder %v7608_v50, %v5571_v58  ;;  %v5655_v54 = vsel %vm1755_vm7, %v5578_v46, 6  ;;  %v5661_v0 = vsel %vm1756_vm3, %v5578_v46, 6 }
 0x1a1   :  { %v1778_v14 = vsel %vm1632_vm6, %v1762_v23, 2147483647  ;;  %v1788_v42 = vsel %vm1632_vm6, %v1763_v13, 2147483647  ;;  %vm1760_vm14 = vcmp.eq.f32.partialorder %v7609_v12, %v5588_v24  ;;  %v1798_v2 = vsel %vm1632_vm6, %v1764_v11, 2147483647 }
 0x1a2   :  { %v1779_v6 = vrot.slane %v1778_v14, 4  ;;  %v1789_v49 = vrot.slane %v1788_v42, 4  ;;  %v1808_v45 = vsel %vm1632_vm6, %v1765_v22, 2147483647  ;;  %v1799_v36 = vrot.slane %v1798_v2, 4 }
 0x1a3   :  { %v1809_v20 = vrot.slane %v1808_v45, 4  ;;  %v1818_v17 = vsel %vm1632_vm6, %v1766_v4, 2147483647  ;;  %v1828_v32 = vsel %vm1632_vm6, %v1767_v19, 2147483647  ;;  %v5694_v59 = vsel %vm1760_vm14, %v5578_v46, 6 }
 0x1a4   :  { %vm1780_vm5 = vcmp.lt.s32.totalorder %v1778_v14, %v1779_v6  ;;  %vm1790_vm1 = vcmp.lt.s32.totalorder %v1788_v42, %v1789_v49  ;;  %v1819_v15 = vrot.slane %v1818_v17, 4  ;;  %v1829_v44 = vrot.slane %v1828_v32, 4 }
 0x1a5   :  { %v1781_v9 = vsel %vm1780_vm5, %v1778_v14, %v1779_v6  ;;  %v1791_v28 = vsel %vm1790_vm1, %v1788_v42, %v1789_v49  ;;  %vm1800_vm11 = vcmp.lt.s32.totalorder %v1798_v2, %v1799_v36  ;;  %vm1810_vm9 = vcmp.lt.s32.totalorder %v1808_v45, %v1809_v20 }
 0x1a6   :  { %v1782_v25 = vrot.slane %v1781_v9, 2  ;;  %v1792_v7 = vrot.slane %v1791_v28, 2  ;;  %v1801_v62 = vsel %vm1800_vm11, %v1798_v2, %v1799_v36  ;;  %v1811_v31 = vsel %vm1810_vm9, %v1808_v45, %v1809_v20 }
 0x1a7   :  { %v1802_v61 = vrot.slane %v1801_v62, 2  ;;  %v1812_v33 = vrot.slane %v1811_v31, 2  ;;  %vm1820_vm4 = vcmp.lt.s32.totalorder %v1818_v17, %v1819_v15  ;;  %vm1830_vm15 = vcmp.lt.s32.totalorder %v1828_v32, %v1829_v44 }
 0x1a8   :  { %vm1783_vm8 = vcmp.lt.s32.totalorder %v1781_v9, %v1782_v25  ;;  %vm1793_vm2 = vcmp.lt.s32.totalorder %v1791_v28, %v1792_v7  ;;  %v1821_v23 = vsel %vm1820_vm4, %v1818_v17, %v1819_v15  ;;  %v1831_v13 = vsel %vm1830_vm15, %v1828_v32, %v1829_v44  ;;  %v5699_v15 = vld [vmem:[%s7049_s0 + $0x48] sm:$0xff] }
 0x1a9   :  { %v1784_v11 = vsel %vm1783_vm8, %v1781_v9, %v1782_v25  ;;  %v5671_v22 = vsel %vm1793_vm2, %v1791_v28, %v1792_v7  ;;  %vm1803_vm0 = vcmp.lt.s32.totalorder %v1801_v62, %v1802_v61  ;;  %vm1813_vm7 = vcmp.lt.s32.totalorder %v1811_v31, %v1812_v33 }
 0x1aa   :  { %v1785_v4 = vrot.slane %v1784_v11, 1  ;;  %v1795_v19 = vrot.slane %v5671_v22, 1  ;;  %v1804_v14 = vsel %vm1803_vm0, %v1801_v62, %v1802_v61  ;;  %v1814_v42 = vsel %vm1813_vm7, %v1811_v31, %v1812_v33 }
 0x1ab   :  { %v1774_v6 = vsel %vm1757_vm12, %v5578_v46, 6  ;;  %v1775_v49 = vsel %vm1758_vm13, %v5578_v46, 6  ;;  %v1822_v2 = vrot.slane %v1821_v23, 2  ;;  %v1832_v45 = vrot.slane %v1831_v13, 2 }
 0x1ac   :  { %v5686_v36 = vsel %vm1759_vm10, %v5578_v46, 6  ;;  %vm1786_vm3 = vcmp.lt.s32.totalorder %v1784_v11, %v1785_v4  ;;  %v1838_v20 = vsel %vm1632_vm6, %v1768_v57, 2147483647  ;;  %v1848_v17 = vsel %vm1632_vm6, %v1769_v1, 2147483647 }
 0x1ad   :  { %v1805_v21 = vrot.slane %v1804_v14, 1  ;;  %v1815_v32 = vrot.slane %v1814_v42, 1  ;;  %v5702_v44 = vsel %vm1786_vm3, %v1784_v11, %v1785_v4  ;;  %vm5705_vm12 = vcmp.lt.s32.totalorder %v5671_v22, %v1795_v19 }
 0x1ae   :  { %vm1823_vm13 = vcmp.lt.s32.totalorder %v1821_v23, %v1822_v2  ;;  %vm1833_vm10 = vcmp.lt.s32.totalorder %v1831_v13, %v1832_v45  ;;  %v1839_v1 = vrot.slane %v1838_v20, 4  ;;  %v1849_v9 = vrot.slane %v1848_v17, 4 }
 0x1af   :  { %v1824_v12 = vsel %vm1823_vm13, %v1821_v23, %v1822_v2  ;;  %v1834_v46 = vsel %vm1833_vm10, %v1831_v13, %v1832_v45  ;;  %v1858_v7 = vsel %vm1632_vm6, %v5641_v26, 2147483647  ;;  %v1868_v62 = vsel %vm1632_vm6, %v5647_v51, 2147483647 }
 0x1b0   :  { %v1825_v28 = vrot.slane %v1824_v12, 1  ;;  %v1835_v25 = vrot.slane %v1834_v46, 1  ;;  %vm1840_vm14 = vcmp.lt.s32.totalorder %v1838_v20, %v1839_v1  ;;  %vm1850_vm5 = vcmp.lt.s32.totalorder %v1848_v17, %v1849_v9 }
 0x1b1   :  { %v1859_v31 = vrot.slane %v1858_v7, 4  ;;  %v1869_v61 = vrot.slane %v1868_v62, 4  ;;  %vm5713_vm1 = vcmp.lt.s32.totalorder %v1804_v14, %v1805_v21  ;;  %vm5717_vm11 = vcmp.lt.s32.totalorder %v1814_v42, %v1815_v32 }
 0x1b2   :  { %v1841_v13 = vsel %vm1840_vm14, %v1838_v20, %v1839_v1  ;;  %v1851_v11 = vsel %vm1850_vm5, %v1848_v17, %v1849_v9  ;;  %vm5721_vm9 = vcmp.lt.s32.totalorder %v1824_v12, %v1825_v28  ;;  %vm5725_vm4 = vcmp.lt.s32.totalorder %v1834_v46, %v1835_v25 }
 0x1b3   :  { %v1842_v51 = vrot.slane %v1841_v13, 2  ;;  %v1852_v2 = vrot.slane %v1851_v11, 2  ;;  %vm1860_vm15 = vcmp.lt.s32.totalorder %v1858_v7, %v1859_v31  ;;  %vm1870_vm8 = vcmp.lt.s32.totalorder %v1868_v62, %v1869_v61 }
 0x1b4   :  { %v1878_v45 = vsel %vm1632_vm6, %v5655_v54, 2147483647  ;;  %v1888_v50 = vsel %vm1632_vm6, %v5661_v0, 2147483647  ;;  %v1861_v20 = vsel %vm1860_vm15, %v1858_v7, %v1859_v31  ;;  %v1871_v17 = vsel %vm1870_vm8, %v1868_v62, %v1869_v61 }
 0x1b5   :  { %vm1843_vm2 = vcmp.lt.s32.totalorder %v1841_v13, %v1842_v51  ;;  %vm1853_vm0 = vcmp.lt.s32.totalorder %v1851_v11, %v1852_v2  ;;  %v1862_v56 = vrot.slane %v1861_v20, 2  ;;  %v1872_v39 = vrot.slane %v1871_v17, 2 }
 0x1b6   :  { %v1844_v1 = vsel %vm1843_vm2, %v1841_v13, %v1842_v51  ;;  %v1854_v9 = vsel %vm1853_vm0, %v1851_v11, %v1852_v2  ;;  %v1879_v24 = vrot.slane %v1878_v45, 4  ;;  %v1889_v58 = vrot.slane %v1888_v50, 4 }
 0x1b7   :  { %v1845_v37 = vrot.slane %v1844_v1, 1  ;;  %v1855_v35 = vrot.slane %v1854_v9, 1  ;;  %vm1863_vm7 = vcmp.lt.s32.totalorder %v1861_v20, %v1862_v56  ;;  %vm1873_vm3 = vcmp.lt.s32.totalorder %v1871_v17, %v1872_v39 }
 0x1b8   :  { %v1898_v48 = vsel %vm1632_vm6, %v1774_v6, 2147483647  ;;  %v1908_v54 = vsel %vm1632_vm6, %v1775_v49, 2147483647  ;;  %v5738_v0 = vsel %vm5705_vm12, %v5671_v22, %v1795_v19  ;;  %v5742_v7 = vsel %vm5713_vm1, %v1804_v14, %v1805_v21 }
 0x1b9   :  { %v5746_v62 = vsel %vm5717_vm11, %v1814_v42, %v1815_v32  ;;  %v1864_v31 = vsel %vm1863_vm7, %v1861_v20, %v1862_v56  ;;  %v5750_v61 = vsel %vm5721_vm9, %v1824_v12, %v1825_v28  ;;  %v5754_v6 = vsel %vm5725_vm4, %v1834_v46, %v1835_v25 }
 0x1ba   :  { %v1865_v49 = vrot.slane %v1864_v31, 1  ;;  %v1874_v22 = vsel %vm1873_vm3, %v1871_v17, %v1872_v39  ;;  %vm1880_vm12 = vcmp.lt.s32.totalorder %v1878_v45, %v1879_v24  ;;  %vm1890_vm13 = vcmp.lt.s32.totalorder %v1888_v50, %v1889_v58 }
 0x1bb   :  { %v1899_v19 = vrot.slane %v1898_v48, 4  ;;  %v1909_v14 = vrot.slane %v1908_v54, 4  ;;  %vm5756_vm10 = vcmp.lt.s32.totalorder %v1844_v1, %v1845_v37  ;;  %vm5760_vm14 = vcmp.lt.s32.totalorder %v1854_v9, %v1855_v35 }
 0x1bc   :  { %v1881_v42 = vsel %vm1880_vm12, %v1878_v45, %v1879_v24  ;;  %v1891_v32 = vsel %vm1890_vm13, %v1888_v50, %v1889_v58  ;;  %vm5764_vm5 = vcmp.lt.s32.totalorder %v1864_v31, %v1865_v49  ;;  %v1875_v12 = vrot.slane %v1874_v22, 1 }
 0x1bd   :  { %v1882_v39 = vrot.slane %v1881_v42, 2  ;;  %v1892_v46 = vrot.slane %v1891_v32, 2  ;;  %vm1900_vm1 = vcmp.lt.s32.totalorder %v1898_v48, %v1899_v19  ;;  %vm1910_vm11 = vcmp.lt.s32.totalorder %v1908_v54, %v1909_v14 }
 0x1be   :  { %v1918_v28 = vsel %vm1632_vm6, %v5686_v36, 2147483647  ;;  %v1928_v25 = vsel %vm1632_vm6, %v5694_v59, 2147483647  ;;  %v1901_v33 = vsel %vm1900_vm1, %v1898_v48, %v1899_v19  ;;  %v1911_v24 = vsel %vm1910_vm11, %v1908_v54, %v1909_v14 }
 0x1bf   :  { %vm1883_vm9 = vcmp.lt.s32.totalorder %v1881_v42, %v1882_v39  ;;  %vm1893_vm4 = vcmp.lt.s32.totalorder %v1891_v32, %v1892_v46  ;;  %v1902_v23 = vrot.slane %v1901_v33, 2  ;;  %v1912_v13 = vrot.slane %v1911_v24, 2 }
 0x1c0   :  { %v1884_v58 = vsel %vm1883_vm9, %v1881_v42, %v1882_v39  ;;  %v1894_v50 = vsel %vm1893_vm4, %v1891_v32, %v1892_v46  ;;  %v1919_v26 = vrot.slane %v1918_v28, 4  ;;  %v1929_v51 = vrot.slane %v1928_v25, 4  ;;  %v3539_v32 = vld [vmem:[%s7049_s0 + $0x58] sm:$0xff] }
 0x1c1   :  { %v1885_v11 = vrot.slane %v1884_v58, 1  ;;  %v1895_v4 = vrot.slane %v1894_v50, 1  ;;  %v5774_v2 = vsel %vm5756_vm10, %v1844_v1, %v1845_v37  ;;  %vm1876_vm15 = vcmp.lt.s32.totalorder %v1874_v22, %v1875_v12  ;;  %v3541_v46 = vld [vmem:[%s7049_s0 + $0x78] sm:$0xff] }
 0x1c2   :  { %vm1903_vm8 = vcmp.lt.s32.totalorder %v1901_v33, %v1902_v23  ;;  %vm1913_vm2 = vcmp.lt.s32.totalorder %v1911_v24, %v1912_v13  ;;  %v5778_v36 = vsel %vm5760_vm14, %v1854_v9, %v1855_v35  ;;  %v5782_v48 = vsel %vm5764_vm5, %v1864_v31, %v1865_v49 }
 0x1c3   :  { %v1904_v59 = vsel %vm1903_vm8, %v1901_v33, %v1902_v23  ;;  %v1914_v45 = vsel %vm1913_vm2, %v1911_v24, %v1912_v13  ;;  %vm1886_vm6 = vcmp.lt.s32.totalorder %v1884_v58, %v1885_v11  ;;  %vm1896_vm0 = vcmp.lt.s32.totalorder %v1894_v50, %v1895_v4  ;;  %v3543_v24 = vld [vmem:[%s7049_s0 + $0x98] sm:$0xff] }
 0x1c4   :  { %v1905_v20 = vrot.slane %v1904_v59, 1  ;;  %v1915_v17 = vrot.slane %v1914_v45, 1  ;;  %v5784_v54 = vsel %vm1876_vm15, %v1874_v22, %v1875_v12  ;;  %vm1920_vm7 = vcmp.lt.s32.totalorder %v1918_v28, %v1919_v26  ;;  %v3540_v12 = vld [vmem:[%s7049_s0 + $0x68] sm:$0xff] }
 0x1c5   :  { %vm1930_vm3 = vcmp.lt.s32.totalorder %v1928_v25, %v1929_v51  ;;  %vm1938_vm12 = vcmp.eq.s32.totalorder %v7322_v41, %v5702_v44  ;;  %v1921_v35 = vsel %vm1920_vm7, %v1918_v28, %v1919_v26  ;;  %vm1939_vm14 = vcmp.eq.s32.totalorder %v7322_v41, %v5738_v0 }
 0x1c6   :  { %vm1906_vm13 = vcmp.lt.s32.totalorder %v1904_v59, %v1905_v20  ;;  %vm1916_vm10 = vcmp.lt.s32.totalorder %v1914_v45, %v1915_v17  ;;  %v1931_v37 = vsel %vm1930_vm3, %v1928_v25, %v1929_v51  ;;  %v5790_v1 = vsel %vm1886_vm6, %v1884_v58, %v1885_v11  ;;  %v3542_v25 = vld [vmem:[%s7049_s0 + $0x88] sm:$0xff] }
 0x1c7   :  { %v5792_v9 = vsel %vm1896_vm0, %v1894_v50, %v1895_v4  ;;  %v1922_v31 = vrot.slane %v1921_v35, 2  ;;  %v1932_v49 = vrot.slane %v1931_v37, 2  ;;  %v5794_v22 = vsel %vm1906_vm13, %v1904_v59, %v1905_v20  ;;  %v3544_v50 = vld [vmem:[%s7049_s0 + $0xa8] sm:$0xff]  ;;  %v3545_v4 = vld [vmem:[%s7049_s0 + $0xb8] sm:$0xff] }
 0x1c8   :  { %v5796_v19 = vsel %vm1916_vm10, %v1914_v45, %v1915_v17  ;;  %vm1940_vm5 = vcmp.eq.s32.totalorder %v7322_v41, %v5742_v7  ;;  %vm1941_vm1 = vcmp.eq.s32.totalorder %v7322_v41, %v5746_v62  ;;  %vm1942_vm4 = vcmp.eq.s32.totalorder %v7322_v41, %v5750_v61  ;;  %v3546_v51 = vld [vmem:[%s7049_s0 + $0xc8] sm:$0xff]  ;;  %v3547_v45 = vld [vmem:[%s7049_s0 + $0xd8] sm:$0xff] }
 0x1c9   :  { %vm1923_vm11 = vcmp.lt.s32.totalorder %v1921_v35, %v1922_v31  ;;  %vm1933_vm9 = vcmp.lt.s32.totalorder %v1931_v37, %v1932_v49  ;;  %vm1943_vm15 = vcmp.eq.s32.totalorder %v7322_v41, %v5754_v6  ;;  %vm7238_vm8 = vcmp.eq.s32.totalorder %v7322_v41, %v5774_v2  ;;  %v5856_v17 = vld [vmem:[%s7049_s0 + $0xe8] sm:$0xff] }
 0x1ca   :  { %v1924_v14 = vsel %vm1923_vm11, %v1921_v35, %v1922_v31  ;;  %v1934_v21 = vsel %vm1933_vm9, %v1931_v37, %v1932_v49  ;;  %vm7237_vm2 = vcmp.eq.s32.totalorder %v7322_v41, %v5778_v36  ;;  %vm7236_vm6 = vcmp.eq.s32.totalorder %v7322_v41, %v5782_v48  ;;  %v5862_v37 = vld [vmem:[%s7049_s0 + $0xf8] sm:$0xff] }
 0x1cb   :  { %v1925_v56 = vrot.slane %v1924_v14, 1  ;;  %v1935_v42 = vrot.slane %v1934_v21, 1  ;;  %vm7234_vm0 = vcmp.eq.s32.totalorder %v7322_v41, %v5784_v54  ;;  %vm7232_vm7 = vcmp.eq.s32.totalorder %v7322_v41, %v5790_v1 }
 0x1cc   :  { %vm7233_vm3 = vcmp.eq.s32.totalorder %v7322_v41, %v5792_v9  ;;  %vm7235_vm13 = vcmp.eq.s32.totalorder %v7322_v41, %v5794_v22  ;;  %vm1951_vm10 = vcmp.eq.s32.totalorder %v7322_v41, %v5796_v19  ;;  %v1959_v57 = vrot.slane %v3539_v32, 2 }
 0x1cd   :  { %vm1926_vm11 = vcmp.lt.s32.totalorder %v1924_v14, %v1925_v56  ;;  %vm1936_vm9 = vcmp.lt.s32.totalorder %v1934_v21, %v1935_v42  ;;  %v1960_v39 = vrot.slane %v3540_v12, 2  ;;  %v1961_v28 = vrot.slane %v3541_v46, 2 }
 0x1ce   :  { %v1962_v33 = vrot.slane %v3542_v25, 2  ;;  %v1963_v58 = vrot.slane %v3543_v24, 2  ;;  %v1964_v23 = vrot.slane %v3544_v50, 2  ;;  %v5840_v13 = vsel %vm1926_vm11, %v1924_v14, %v1925_v56 }
 0x1cf   :  { %v5842_v11 = vsel %vm1936_vm9, %v1934_v21, %v1935_v42  ;;  %v1965_v26 = vrot.slane %v3545_v4, 2  ;;  %v1966_v59 = vrot.slane %v3546_v51, 2  ;;  %v1967_v20 = vrot.slane %v3547_v45, 2 }
 0x1d0   :  { %v1968_v35 = vrot.slane %v5856_v17, 2  ;;  %v1969_v31 = vrot.slane %v5862_v37, 2  ;;  %v7641_v49 = vrot.slane %v5595_v52, 2  ;;  %v7642_v21 = vrot.slane %v7622_v5, 2 }
 0x1d1   :  { %v7643_v42 = vrot.slane %v7623_v43, 2  ;;  %v7644_v12 = vrot.slane %v7624_v10, 2  ;;  %v7645_v46 = vrot.slane %v5699_v15, 2  ;;  %v1991_v43 = vsel %vm1943_vm15, %v1959_v57, 0.0 }
 0x1d2   :  { %v1986_v14 = vsel %vm1938_vm12, %v7641_v49, 0.0  ;;  %v1987_v56 = vsel %vm1939_vm14, %v7642_v21, 0.0  ;;  %v1992_v25 = vsel %vm7238_vm8, %v1960_v39, 0.0  ;;  %v1993_v10 = vsel %vm7237_vm2, %v1961_v28, 0.0 }
 0x1d3   :  { %v1988_v32 = vsel %vm1940_vm5, %v7643_v42, 0.0  ;;  %v1989_v52 = vsel %vm1941_vm1, %v7644_v12, 0.0  ;;  %v1990_v5 = vsel %vm1942_vm4, %v7645_v46, 0.0  ;;  %v1994_v15 = vsel %vm7236_vm6, %v1962_v33, 0.0 }
 0x1d4   :  { %v1995_v24 = vsel %vm7234_vm0, %v1963_v58, 0.0  ;;  %v1996_v57 = vsel %vm7232_vm7, %v1964_v23, 0.0  ;;  %v5911_v39 = vsel %vm7233_vm3, %v1965_v26, 0.0  ;;  %v5916_v28 = vsel %vm7235_vm13, %v1966_v59, 0.0 }
 0x1d5   :  { %vm1952_vm11 = vcmp.eq.s32.totalorder %v7322_v41, %v5840_v13  ;;  %vm1953_vm9 = vcmp.eq.s32.totalorder %v7322_v41, %v5842_v11  ;;  %v5925_v33 = vsel %vm1951_vm10, %v1967_v20, 0.0  ;;  %vm7646_vm7 = vcmask 62464  }
 0x1d6   :  { %v2002_v58 = vsel %vm7646_vm7, %v1986_v14, 0.0  ;;  %vm7647_vm3 = vmmov %vm7646_vm7 }
 0x1d7   :  { %v2009_v50 = vsel %vm7647_vm3, %v1987_v56, 0.0  ;;  %vm7648_vm0 = vmmov %vm7647_vm3  ;;  %v2003_v4 = vrot.slane %v2002_v58, 4 }
 0x1d8   :  { %v2016_v23 = vsel %vm7648_vm0, %v1988_v32, 0.0  ;;  %v2010_v26 = vrot.slane %v2009_v50, 4  ;;  %vm7649_vm13 = vmmov %vm7648_vm0  ;;  %v2051_v32 = vsel %vm7648_vm0, %v1993_v10, 0.0 }
 0x1d9   :  { %v2017_v51 = vrot.slane %v2016_v23, 4  ;;  %v2023_v59 = vsel %vm7649_vm13, %v1989_v52, 0.0  ;;  %vm7650_vm6 = vmmov %vm7648_vm0  ;;  %v2004_v20 = vadd.f32 %v2003_v4, %v2002_v58  ;;  %v2052_v63 = vrot.slane %v2051_v32, 4 }
 0x1da   :  { %v2024_v45 = vrot.slane %v2023_v59, 4  ;;  %v2030_v17 = vsel %vm7650_vm6, %v1990_v5, 0.0  ;;  %vm7651_vm2 = vmmov %vm7648_vm0  ;;  %v2011_v21 = vadd.f32 %v2010_v26, %v2009_v50 }
 0x1db   :  { %v2037_v37 = vsel %vm7651_vm2, %v1991_v43, 0.0  ;;  %vm7652_vm8 = vmmov %vm7648_vm0  ;;  %v2018_v42 = vadd.f32 %v2017_v51, %v2016_v23  ;;  %v2031_v14 = vrot.slane %v2030_v17, 4  ;;  %v2005_v60 = vrot.slane %v2004_v20, 2 }
 0x1dc   :  { %v2044_v49 = vsel %vm7652_vm8, %v1992_v25, 0.0  ;;  %v2025_v12 = vadd.f32 %v2024_v45, %v2023_v59  ;;  %v2038_v56 = vrot.slane %v2037_v37, 4  ;;  %v2012_v8 = vrot.slane %v2011_v21, 2  ;;  %vm7653_vm8 = vmmov %vm7648_vm0 }
 0x1dd   :  { %v2045_v46 = vrot.slane %v2044_v49, 4  ;;  %v2019_v47 = vrot.slane %v2018_v42, 2  ;;  %v2032_v52 = vadd.f32 %v2031_v14, %v2030_v17  ;;  %v2006_v43 = vadd.f32 %v2005_v60, %v2004_v20  ;;  %vm7654_vm2 = vmmov %vm7648_vm0 }
 0x1de   :  { %v2026_v38 = vrot.slane %v2025_v12, 2  ;;  %v2039_v40 = vadd.f32 %v2038_v56, %v2037_v37  ;;  %v2013_v27 = vadd.f32 %v2012_v8, %v2011_v21  ;;  %v2053_v26 = vadd.f32 %v2052_v63, %v2051_v32  ;;  %vm7655_vm6 = vmmov %vm7648_vm0 }
 0x1df   :  { %v2046_v5 = vadd.f32 %v2045_v46, %v2044_v49  ;;  %v2020_v25 = vadd.f32 %v2019_v47, %v2018_v42  ;;  %v2033_v58 = vrot.slane %v2032_v52, 2  ;;  %v2007_v51 = vrot.slane %v2006_v43, 1  ;;  %vm7656_vm7 = vmmov %vm7648_vm0 }
 0x1e0   :  { %v2027_v50 = vadd.f32 %v2026_v38, %v2025_v12  ;;  %v2040_v23 = vrot.slane %v2039_v40, 2  ;;  %v2014_v59 = vrot.slane %v2013_v27, 1  ;;  %v2054_v17 = vrot.slane %v2053_v26, 2  ;;  %vm7657_vm3 = vmmov %vm7648_vm0 }
 0x1e1   :  { %v2047_v4 = vrot.slane %v2046_v5, 2  ;;  %v2021_v45 = vrot.slane %v2020_v25, 1  ;;  %v2034_v10 = vadd.f32 %v2033_v58, %v2032_v52  ;;  %v2000_v37 = vsel %vm1952_vm11, %v1968_v35, 0.0  ;;  %vm7658_vm13 = vmmov %vm7648_vm0 }
 0x1e2   :  { %v2028_v16 = vrot.slane %v2027_v50, 1  ;;  %v2041_v55 = vadd.f32 %v2040_v23, %v2039_v40  ;;  %v2001_v47 = vsel %vm1953_vm9, %v1969_v31, 0.0  ;;  %v5941_v38 = vadd.f32 %v2007_v51, %v2006_v43 }
 0x1e3   :  { %v2048_v29 = vadd.f32 %v2047_v4, %v2046_v5  ;;  %v2035_v8 = vrot.slane %v2034_v10, 1  ;;  %v5943_v63 = vadd.f32 %v2014_v59, %v2013_v27  ;;  %v5945_v60 = vadd.f32 %v2021_v45, %v2020_v25 }
 0x1e4   :  { %v2042_v49 = vrot.slane %v2041_v55, 1  ;;  %v2055_v20 = vadd.f32 %v2054_v17, %v2053_v26  ;;  %v5947_v40 = vadd.f32 %v2028_v16, %v2027_v50  ;;  %v2058_v21 = vsel %vm7653_vm8, %v1994_v15, 0.0  ;;  %vm7659_vm8 = vmmov %vm7648_vm0 }
 0x1e5   :  { %v2065_v42 = vsel %vm7654_vm2, %v1995_v24, 0.0  ;;  %v2072_v35 = vsel %vm7655_vm6, %v1996_v57, 0.0  ;;  %v5952_v14 = vadd.f32 %v2035_v8, %v2034_v10  ;;  %v2049_v12 = vrot.slane %v2048_v29, 1  ;;  %vm7673_vm6 = vmmov %vm7648_vm0 }
 0x1e6   :  { %v5954_v31 = vadd.f32 %v2042_v49, %v2041_v55  ;;  %v2059_v56 = vrot.slane %v2058_v21, 4  ;;  %v2066_v27 = vrot.slane %v2065_v42, 4  ;;  %v2073_v46 = vrot.slane %v2072_v35, 4 }
 0x1e7   :  { %v2079_v32 = vsel %vm7656_vm7, %v5911_v39, 0.0  ;;  %v2086_v16 = vsel %vm7657_vm3, %v5916_v28, 0.0  ;;  %v2056_v52 = vrot.slane %v2055_v20, 1  ;;  %v2093_v55 = vsel %vm7658_vm13, %v5925_v33, 0.0  ;;  %vm7674_vm7 = vmmov %vm7648_vm0 }
 0x1e8   :  { %v2060_v15 = vadd.f32 %v2059_v56, %v2058_v21  ;;  %v2080_v5 = vrot.slane %v2079_v32, 4  ;;  %v2087_v24 = vrot.slane %v2086_v16, 4  ;;  %v2067_v43 = vadd.f32 %v2066_v27, %v2065_v42  ;;  %vm7675_vm3 = vmmov %vm7648_vm0 }
 0x1e9   :  { %v2074_v57 = vadd.f32 %v2073_v46, %v2072_v35  ;;  %v2100_v25 = vsel %vm7648_vm0, %v2000_v37, 0.0  ;;  %v2094_v4 = vrot.slane %v2093_v55, 4  ;;  %v2107_v28 = vsel %vm7659_vm8, %v2001_v47, 0.0  ;;  %vm7676_vm13 = vmmov %vm7648_vm0 }
 0x1ea   :  { %v2061_v58 = vrot.slane %v2060_v15, 2  ;;  %v2081_v50 = vadd.f32 %v2080_v5, %v2079_v32  ;;  %v2088_v23 = vadd.f32 %v2087_v24, %v2086_v16  ;;  %v2068_v26 = vrot.slane %v2067_v43, 2  ;;  %vm7677_vm8 = vmmov %vm7648_vm0 }
 0x1eb   :  { %v2075_v39 = vrot.slane %v2074_v57, 2  ;;  %v2101_v51 = vrot.slane %v2100_v25, 4  ;;  %v2095_v17 = vadd.f32 %v2094_v4, %v2093_v55  ;;  %v2108_v42 = vrot.slane %v2107_v28, 4 }
 0x1ec   :  { %v2062_v59 = vadd.f32 %v2061_v58, %v2060_v15  ;;  %v2082_v45 = vrot.slane %v2081_v50, 2  ;;  %v2089_v10 = vrot.slane %v2088_v23, 2  ;;  %v2069_v8 = vadd.f32 %v2068_v26, %v2067_v43 }
 0x1ed   :  { %v2076_v49 = vadd.f32 %v2075_v39, %v2074_v57  ;;  %v2102_v21 = vadd.f32 %v2101_v51, %v2100_v25  ;;  %v2096_v56 = vrot.slane %v2095_v17, 2  ;;  %v2109_v16 = vadd.f32 %v2108_v42, %v2107_v28  ;;  %v3551_v51 = vld [vmem:[%s7049_s0 + $0x118] sm:$0xff] }
 0x1ee   :  { %v2063_v33 = vrot.slane %v2062_v59, 1  ;;  %v2083_v35 = vadd.f32 %v2082_v45, %v2081_v50  ;;  %v2090_v37 = vadd.f32 %v2089_v10, %v2088_v23  ;;  %v2070_v27 = vrot.slane %v2069_v8, 1  ;;  %v3553_v10 = vld [vmem:[%s7049_s0 + $0x138] sm:$0xff] }
 0x1ef   :  { %v2077_v46 = vrot.slane %v2076_v49, 1  ;;  %v2103_v32 = vrot.slane %v2102_v21, 2  ;;  %v5964_v5 = vadd.f32 %v2049_v12, %v2048_v29  ;;  %v2097_v15 = vadd.f32 %v2096_v56, %v2095_v17 }
 0x1f0   :  { %v2084_v24 = vrot.slane %v2083_v35, 1  ;;  %v2091_v47 = vrot.slane %v2090_v37, 1  ;;  %v5966_v58 = vadd.f32 %v2056_v52, %v2055_v20  ;;  %v5968_v55 = vadd.f32 %v2063_v33, %v2062_v59  ;;  %v3550_v20 = vld [vmem:[%s7049_s0 + $0x108] sm:$0xff]  ;;  %v3555_v33 = vld [vmem:[%s7049_s0 + $0x158] sm:$0xff] }
 0x1f1   :  { %v2104_v43 = vadd.f32 %v2103_v32, %v2102_v21  ;;  %v2110_v57 = vrot.slane %v2109_v16, 2  ;;  %v5970_v25 = vadd.f32 %v2070_v27, %v2069_v8  ;;  %v5972_v50 = vadd.f32 %v2077_v46, %v2076_v49  ;;  %v3552_v59 = vld [vmem:[%s7049_s0 + $0x128] sm:$0xff]  ;;  %v3557_v27 = vld [vmem:[%s7049_s0 + $0x178] sm:$0xff] }
 0x1f2   :  { %v5974_v23 = vadd.f32 %v2084_v24, %v2083_v35  ;;  %v2098_v4 = vrot.slane %v2097_v15, 1  ;;  %v5976_v26 = vadd.f32 %v2091_v47, %v2090_v37  ;;  %v2114_v52 = vrot.slane %v3550_v20, 2  ;;  %v3554_v21 = vld [vmem:[%s7049_s0 + $0x148] sm:$0xff]  ;;  %v3559_v24 = vld [vmem:[%s7049_s0 + $0x198] sm:$0xff] }
 0x1f3   :  { %7660 = vst [vmem:[#allocation40_spill] sm:$0xff] %v5972_v50  ;;  %v2105_v29 = vrot.slane %v2104_v43, 1  ;;  %v2111_v12 = vadd.f32 %v2110_v57, %v2109_v16  ;;  %v2115_v28 = vrot.slane %v3551_v51, 2  ;;  %v2116_v45 = vrot.slane %v3552_v59, 2  ;;  %v3556_v37 = vld [vmem:[%s7049_s0 + $0x168] sm:$0xff]  ;;  %v7737_v50 = vld [vmem:[#allocation6_spill] sm:$0xff] }
 0x1f4   :  { %7661 = vst [vmem:[#allocation42_spill] sm:$0xff] %v5974_v23  ;;  %7662 = vst [vmem:[#allocation44_spill] sm:$0xff] %v5976_v26  ;;  %v5981_v39 = vadd.f32 %v2098_v4, %v2097_v15  ;;  %v2117_v17 = vrot.slane %v3553_v10, 2  ;;  %v2118_v42 = vrot.slane %v3554_v21, 2  ;;  %v2119_v35 = vrot.slane %v3555_v33, 2  ;;  %v3558_v32 = vld [vmem:[%s7049_s0 + $0x188] sm:$0xff] }
 0x1f5   :  { %v5992_v8 = vadd.f32 %v2105_v29, %v2104_v43  ;;  %v2112_v49 = vrot.slane %v2111_v12, 1  ;;  %v2120_v56 = vrot.slane %v3556_v37, 2  ;;  %v2121_v46 = vrot.slane %v3557_v27, 2  ;;  %v3560_v43 = vld [vmem:[%s7049_s0 + $0x1a8] sm:$0xff]  ;;  %v3561_v4 = vld [vmem:[%s7049_s0 + $0x1b8] sm:$0xff] }
 0x1f6   :  { %7663 = vst [vmem:[#allocation113_spill] sm:$0xff] %v5981_v39  ;;  %v2122_v16 = vrot.slane %v3558_v32, 2  ;;  %v2123_v47 = vrot.slane %v3559_v24, 2  ;;  %v2124_v57 = vrot.slane %v3560_v43, 2  ;;  %v2125_v29 = vrot.slane %v3561_v4, 2  ;;  %v3562_v20 = vld [vmem:[%s7049_s0 + $0x1c8] sm:$0xff] }
 0x1f7   :  { %7664 = vst [vmem:[#allocation114_spill] sm:$0xff] %v5992_v8  ;;  %v6012_v15 = vadd.f32 %v2112_v49, %v2111_v12  ;;  %v2126_v51 = vrot.slane %v3562_v20, 2  ;;  %v3563_v12 = vld [vmem:[%s7049_s0 + $0x1d8] sm:$0xff]  ;;  %v3564_v10 = vld [vmem:[%s7049_s0 + $0x1e8] sm:$0xff]  ;;  %v2146_v37 = vsel %vm1938_vm12, %v2114_v52, 0.0  ;;  %v2147_v27 = vsel %vm1939_vm14, %v2115_v28, 0.0 }
 0x1f8   :  { %v2127_v59 = vrot.slane %v3563_v12, 2  ;;  %v2128_v49 = vrot.slane %v3564_v10, 2  ;;  %v3565_v21 = vld [vmem:[%s7049_s0 + $0x1f8] sm:$0xff]  ;;  %v2148_v32 = vsel %vm1940_vm5, %v2116_v45, 0.0  ;;  %v2149_v24 = vsel %vm1941_vm1, %v2117_v17, 0.0 }
 0x1f9   :  { %7665 = vst [vmem:[#allocation115_spill] sm:$0xff] %v6012_v15  ;;  %v2129_v33 = vrot.slane %v3565_v21, 2  ;;  %v2150_v43 = vsel %vm1942_vm4, %v2118_v42, 0.0  ;;  %v2151_v44 = vsel %vm1943_vm15, %v2119_v35, 0.0  ;;  %vm7666_vm12 = vcmp.eq.s32.totalorder %v7322_v41, %v5774_v2 }
 0x1fa   :  { %v2152_v0 = vsel %vm7666_vm12, %v2120_v56, 0.0  ;;  %vm7667_vm14 = vcmp.eq.s32.totalorder %v7322_v41, %v5778_v36  ;;  %vm7668_vm5 = vcmp.eq.s32.totalorder %v7322_v41, %v5782_v48  ;;  %vm7669_vm1 = vcmp.eq.s32.totalorder %v7322_v41, %v5784_v54  ;;  %vm7678_vm12 = vmmov %vm7648_vm0 }
 0x1fb   :  { %v2153_v7 = vsel %vm7667_vm14, %v2121_v46, 0.0  ;;  %v2154_v62 = vsel %vm7668_vm5, %v2122_v16, 0.0  ;;  %v2155_v61 = vsel %vm7669_vm1, %v2123_v47, 0.0  ;;  %vm7670_vm4 = vcmp.eq.s32.totalorder %v7322_v41, %v5790_v1  ;;  %vm7680_vm14 = vmmov %vm7648_vm0 }
 0x1fc   :  { %v2156_v6 = vsel %vm7670_vm4, %v2124_v57, 0.0  ;;  %vm7671_vm15 = vcmp.eq.s32.totalorder %v7322_v41, %v5792_v9  ;;  %vm7672_vm2 = vcmp.eq.s32.totalorder %v7322_v41, %v5794_v22  ;;  %v6078_v48 = vsel %vm1951_vm10, %v2127_v59, 0.0  ;;  %vm7679_vm10 = vmmov %vm7648_vm0 }
 0x1fd   :  { %v6068_v2 = vsel %vm7671_vm15, %v2125_v29, 0.0  ;;  %v6073_v36 = vsel %vm7672_vm2, %v2126_v51, 0.0  ;;  %v2162_v54 = vsel %vm7673_vm6, %v2146_v37, 0.0  ;;  %v2169_v1 = vsel %vm7674_vm7, %v2147_v27, 0.0  ;;  %vm7681_vm5 = vmmov %vm7648_vm0 }
 0x1fe   :  { %v2176_v52 = vsel %vm7675_vm3, %v2148_v32, 0.0  ;;  %v2163_v28 = vrot.slane %v2162_v54, 4  ;;  %v2170_v9 = vrot.slane %v2169_v1, 4  ;;  %v2183_v17 = vsel %vm7676_vm13, %v2149_v24, 0.0  ;;  %vm7684_vm1 = vmmov %vm7648_vm0 }
 0x1ff   :  { %v2177_v45 = vrot.slane %v2176_v52, 4  ;;  %v2184_v42 = vrot.slane %v2183_v17, 4  ;;  %v2190_v22 = vsel %vm7648_vm0, %v2150_v43, 0.0  ;;  %v2197_v35 = vsel %vm7677_vm8, %v2151_v44, 0.0  ;;  %vm7685_vm4 = vmmov %vm7648_vm0 }
 0x200   :  { %v2204_v19 = vsel %vm7678_vm12, %v2152_v0, 0.0  ;;  %v2164_v56 = vadd.f32 %v2163_v28, %v2162_v54  ;;  %v2171_v46 = vadd.f32 %v2170_v9, %v2169_v1  ;;  %v2191_v47 = vrot.slane %v2190_v22, 4  ;;  %vm7686_vm15 = vmmov %vm7648_vm0 }
 0x201   :  { %v2178_v16 = vadd.f32 %v2177_v45, %v2176_v52  ;;  %v2185_v57 = vadd.f32 %v2184_v42, %v2183_v17  ;;  %v2198_v4 = vrot.slane %v2197_v35, 4  ;;  %v2205_v29 = vrot.slane %v2204_v19, 4  ;;  %vm7687_vm2 = vmmov %vm7648_vm0 }
 0x202   :  { %v2211_v20 = vsel %vm7679_vm10, %v2153_v7, 0.0  ;;  %v2165_v51 = vrot.slane %v2164_v56, 2  ;;  %v2172_v12 = vrot.slane %v2171_v46, 2  ;;  %v2192_v10 = vadd.f32 %v2191_v47, %v2190_v22 }
 0x203   :  { %v2179_v59 = vrot.slane %v2178_v16, 2  ;;  %v2186_v21 = vrot.slane %v2185_v57, 2  ;;  %v2199_v37 = vadd.f32 %v2198_v4, %v2197_v35  ;;  %v2206_v27 = vadd.f32 %v2205_v29, %v2204_v19 }
 0x204   :  { %v2212_v32 = vrot.slane %v2211_v20, 4  ;;  %v2166_v24 = vadd.f32 %v2165_v51, %v2164_v56  ;;  %v2173_v43 = vadd.f32 %v2172_v12, %v2171_v46  ;;  %v2193_v0 = vrot.slane %v2192_v10, 2 }
 0x205   :  { %v2180_v44 = vadd.f32 %v2179_v59, %v2178_v16  ;;  %v2187_v54 = vadd.f32 %v2186_v21, %v2185_v57  ;;  %v2200_v1 = vrot.slane %v2199_v37, 2  ;;  %v2207_v52 = vrot.slane %v2206_v27, 2 }
 0x206   :  { %v2213_v28 = vadd.f32 %v2212_v32, %v2211_v20  ;;  %v2167_v9 = vrot.slane %v2166_v24, 1  ;;  %v2174_v45 = vrot.slane %v2173_v43, 1  ;;  %v2194_v7 = vadd.f32 %v2193_v0, %v2192_v10 }
 0x207   :  { %v2181_v17 = vrot.slane %v2180_v44, 1  ;;  %v2188_v42 = vrot.slane %v2187_v54, 1  ;;  %v2201_v15 = vadd.f32 %v2200_v1, %v2199_v37  ;;  %v2208_v8 = vadd.f32 %v2207_v52, %v2206_v27 }
 0x208   :  { %v2214_v22 = vrot.slane %v2213_v28, 2  ;;  %v2160_v35 = vsel %vm1952_vm11, %v2128_v49, 0.0  ;;  %v2161_v19 = vsel %vm1953_vm9, %v2129_v33, 0.0  ;;  %v6094_v56 = vadd.f32 %v2167_v9, %v2166_v24  ;;  %vm7682_vm11 = vmmov %vm7648_vm0 }
 0x209   :  { %v2195_v46 = vrot.slane %v2194_v7, 1  ;;  %v6096_v16 = vadd.f32 %v2174_v45, %v2173_v43  ;;  %v6098_v47 = vadd.f32 %v2181_v17, %v2180_v44  ;;  %v2202_v57 = vrot.slane %v2201_v15, 1  ;;  %vm7683_vm9 = vmmov %vm7648_vm0 }
 0x20a   :  { %v2215_v4 = vadd.f32 %v2214_v22, %v2213_v28  ;;  %v6100_v29 = vadd.f32 %v2188_v42, %v2187_v54  ;;  %v2218_v20 = vsel %vm7680_vm14, %v2154_v62, 0.0  ;;  %v2225_v13 = vsel %vm7681_vm5, %v2155_v61, 0.0 }
 0x20b   :  { %v2232_v49 = vsel %vm7682_vm11, %v2156_v6, 0.0  ;;  %v6105_v51 = vadd.f32 %v2195_v46, %v2194_v7  ;;  %v6107_v11 = vadd.f32 %v2202_v57, %v2201_v15  ;;  %v2209_v33 = vrot.slane %v2208_v8, 1 }
 0x20c   :  { %v2219_v12 = vrot.slane %v2218_v20, 4  ;;  %v2226_v59 = vrot.slane %v2225_v13, 4  ;;  %v2233_v10 = vrot.slane %v2232_v49, 4  ;;  %v2239_v21 = vsel %vm7683_vm9, %v6068_v2, 0.0 }
 0x20d   :  { %v2246_v37 = vsel %vm7684_vm1, %v6073_v36, 0.0  ;;  %v2216_v27 = vrot.slane %v2215_v4, 1  ;;  %v2240_v32 = vrot.slane %v2239_v21, 4  ;;  %v2253_v15 = vsel %vm7685_vm4, %v6078_v48, 0.0 }
 0x20e   :  { %v2220_v62 = vadd.f32 %v2219_v12, %v2218_v20  ;;  %v2247_v61 = vrot.slane %v2246_v37, 4  ;;  %v2227_v24 = vadd.f32 %v2226_v59, %v2225_v13  ;;  %v2234_v6 = vadd.f32 %v2233_v10, %v2232_v49 }
 0x20f   :  { %v2260_v43 = vsel %vm7686_vm15, %v2160_v35, 0.0  ;;  %v2241_v0 = vadd.f32 %v2240_v32, %v2239_v21  ;;  %v2254_v1 = vrot.slane %v2253_v15, 4  ;;  %v2267_v36 = vsel %vm7687_vm2, %v2161_v19, 0.0 }
 0x210   :  { %v2221_v44 = vrot.slane %v2220_v62, 2  ;;  %v2248_v54 = vadd.f32 %v2247_v61, %v2246_v37  ;;  %v2228_v52 = vrot.slane %v2227_v24, 2  ;;  %v2235_v2 = vrot.slane %v2234_v6, 2 }
 0x211   :  { %v2261_v28 = vrot.slane %v2260_v43, 4  ;;  %v2242_v45 = vrot.slane %v2241_v0, 2  ;;  %v2255_v7 = vadd.f32 %v2254_v1, %v2253_v15  ;;  %v2268_v57 = vrot.slane %v2267_v36, 4 }
 0x212   :  { %v2222_v9 = vadd.f32 %v2221_v44, %v2220_v62  ;;  %v2249_v17 = vrot.slane %v2248_v54, 2  ;;  %v2229_v42 = vadd.f32 %v2228_v52, %v2227_v24  ;;  %v2236_v22 = vadd.f32 %v2235_v2, %v2234_v6  ;;  %v7694_v52 = vld [vmem:[#allocation53_spill] sm:$0xff] }
 0x213   :  { %v2262_v46 = vadd.f32 %v2261_v28, %v2260_v43  ;;  %v2243_v20 = vadd.f32 %v2242_v45, %v2241_v0  ;;  %v2256_v13 = vrot.slane %v2255_v7, 2  ;;  %v2269_v10 = vadd.f32 %v2268_v57, %v2267_v36  ;;  %v7695_v28 = vld [vmem:[#allocation54_spill] sm:$0xff] }
 0x214   :  { %v2223_v48 = vrot.slane %v2222_v9, 1  ;;  %v2250_v35 = vadd.f32 %v2249_v17, %v2248_v54  ;;  %v2230_v49 = vrot.slane %v2229_v42, 1  ;;  %v2237_v12 = vrot.slane %v2236_v22, 1 }
 0x215   :  { %v2263_v59 = vrot.slane %v2262_v46, 2  ;;  %v6117_v21 = vadd.f32 %v2209_v33, %v2208_v8  ;;  %v2244_v37 = vrot.slane %v2243_v20, 1  ;;  %v2257_v62 = vadd.f32 %v2256_v13, %v2255_v7  ;;  %v7691_v33 = vld [vmem:[#allocation51_spill] sm:$0xff] }
 0x216   :  { %v2251_v19 = vrot.slane %v2250_v35, 1  ;;  %v6119_v32 = vadd.f32 %v2216_v27, %v2215_v4  ;;  %v6121_v61 = vadd.f32 %v2223_v48, %v2222_v9  ;;  %v2270_v6 = vrot.slane %v2269_v10, 2  ;;  %v7692_v4 = vld [vmem:[#allocation52_spill] sm:$0xff]  ;;  %v7696_v9 = vld [vmem:[#allocation30_spill] sm:$0xff] }
 0x217   :  { %v6123_v24 = vadd.f32 %v2263_v59, %v2262_v46  ;;  %v6125_v15 = vadd.f32 %v2230_v49, %v2229_v42  ;;  %v6127_v43 = vadd.f32 %v2237_v12, %v2236_v22  ;;  %v2258_v44 = vrot.slane %v2257_v62, 1  ;;  %v7698_v46 = vld [vmem:[#allocation31_spill] sm:$0xff]  ;;  %v7699_v48 = vld [vmem:[#allocation32_spill] sm:$0xff] }
 0x218   :  { %vm2274_vm6 = vcmask 57344   ;;  %v6129_v0 = vadd.f32 %v2244_v37, %v2243_v20  ;;  %v6131_v8 = vadd.f32 %v2270_v6, %v2269_v10  ;;  %v6137_v1 = vadd.f32 %v2251_v19, %v2250_v35  ;;  %v7700_v35 = vld [vmem:[#allocation33_spill] sm:$0xff] }
 0x219   :  { %7688 = vst [vmem:[#allocation116_spill] sm:$0xff] %v6125_v15  ;;  %7689 = vst [vmem:[#allocation117_spill] sm:$0xff] %v6127_v43  ;;  %v2275_v54 = vsel %vm2274_vm6, %v7691_v33, -inf  ;;  %v2276_v27 = vsel %vm2274_vm6, %v7692_v4, -inf  ;;  %v2277_v2 = vsel %vm2274_vm6, %v7694_v52, -inf  ;;  %v6143_v36 = vsel %vm2274_vm6, %v7695_v28, -inf }
 0x21a   :  { %7690 = vst [vmem:[#allocation118_spill] sm:$0xff] %v6129_v0  ;;  %7693 = vst [vmem:[#allocation51_spill] sm:$0xff] %v6137_v1  ;;  %v2282_v45 = vsel %vm2274_vm6, %v7696_v9, -inf  ;;  %v6147_v17 = vadd.f32 %v2258_v44, %v2257_v62  ;;  %v2278_v42 = vmax.f32 %v2275_v54, %v2277_v2  ;;  %v2280_v22 = vmax.f32 %v2276_v27, %v6143_v36 }
 0x21b   :  { %v2283_v57 = vsel %vm2274_vm6, %v7698_v46, -inf  ;;  %v2284_v20 = vsel %vm2274_vm6, %v7699_v48, -inf  ;;  %v6157_v13 = vsel %vm2274_vm6, %v7700_v35, -inf  ;;  %v2289_v49 = vsel %vm2274_vm6, %v5515_v34, -inf }
 0x21c   :  { %7697 = vst [vmem:[#allocation52_spill] sm:$0xff] %v6147_v17  ;;  %v2281_v59 = vmax.f32 %v2278_v42, %v2280_v22  ;;  %v2285_v10 = vmax.f32 %v2282_v45, %v2284_v20  ;;  %v2287_v37 = vmax.f32 %v2283_v57, %v6157_v13  ;;  %v2290_v19 = vsel %vm2274_vm6, %v5525_v3, -inf  ;;  %v7701_v57 = vld [vmem:[#allocation3_spill] sm:$0xff]  ;;  %v7702_v17 = vld [vmem:[#allocation4_spill] sm:$0xff] }
 0x21d   :  { %v2291_v62 = vsel %vm2274_vm6, %v5536_v30, -inf  ;;  %v6169_v6 = vsel %vm2274_vm6, %v5539_v53, -inf  ;;  %v6172_v44 = vsub.s32 0, %v7322_v41  ;;  %v6176_v45 = vrot.slane %v7322_v41, 1 }
 0x21e   :  { %v2288_v54 = vmax.f32 %v2285_v10, %v2287_v37  ;;  %v2292_v27 = vmax.f32 %v2289_v49, %v2291_v62  ;;  %v2294_v2 = vmax.f32 %v2290_v19, %v6169_v6  ;;  %v6180_v22 = vrot.slane %v7322_v41, 2  ;;  %v7704_v19 = vld [vmem:[#allocation2_spill] sm:$0xff] }
 0x21f   :  { %v2299_v42 = vrot.slane %v2281_v59, %v6172_v44  ;;  %v2391_v20 = vrot.slane %v7701_v57, 7  ;;  %vm2392_vm7 = vcmask 1041409   ;;  %v2394_v39 = vrot.slane %v7702_v17, 6 }
 0x220   :  { %v2295_v12 = vmax.f32 %v2292_v27, %v2294_v2  ;;  %v2303_v7 = vrot.slane %v2288_v54, %v6172_v44  ;;  %vm2395_vm3 = vcmask 1042434   ;;  %v2464_v0 = vrot.slane %v6096_v16, 7 }
 0x221   :  { %vm2308_vm13 = vcmp.eq.f32.partialorder %v7691_v33, %v2299_v42  ;;  %vm2309_vm0 = vcmp.eq.f32.partialorder %v7692_v4, %v2299_v42  ;;  %vm2310_vm8 = vcmp.eq.f32.partialorder %v7694_v52, %v2299_v42  ;;  %vm2311_vm12 = vcmp.eq.f32.partialorder %v7695_v28, %v2299_v42  ;;  %v7703_v52 = vld [vmem:[#allocation77_spill] sm:$0xff] }
 0x222   :  { %v2307_v49 = vrot.slane %v2295_v12, %v6172_v44  ;;  %vm2312_vm10 = vcmp.eq.f32.partialorder %v7696_v9, %v2303_v7  ;;  %vm2313_vm14 = vcmp.eq.f32.partialorder %v7698_v46, %v2303_v7  ;;  %vm2314_vm5 = vcmp.eq.f32.partialorder %v7699_v48, %v2303_v7 }
 0x223   :  { %vm2315_vm11 = vcmp.eq.f32.partialorder %v7700_v35, %v2303_v7  ;;  %v2322_v17 = vsel %vm2308_vm13, %v7322_v41, 4  ;;  %v2323_v33 = vsel %vm2309_vm0, %v6176_v45, 4  ;;  %v2324_v4 = vsel %vm2310_vm8, %v6180_v22, 4 }
 0x224   :  { %vm2316_vm9 = vcmp.eq.f32.partialorder %v5515_v34, %v2307_v49  ;;  %vm2317_vm1 = vcmp.eq.f32.partialorder %v5525_v3, %v2307_v49  ;;  %vm2318_vm4 = vcmp.eq.f32.partialorder %v5536_v30, %v2307_v49  ;;  %vm2319_vm15 = vcmp.eq.f32.partialorder %v5539_v53, %v2307_v49 }
 0x225   :  { %v2325_v9 = vsel %vm2311_vm12, %v7703_v52, 4  ;;  %v2326_v46 = vsel %vm2312_vm10, %v7322_v41, 4  ;;  %v2327_v7 = vsel %vm2313_vm14, %v6176_v45, 4  ;;  %v2328_v48 = vsel %vm2314_vm5, %v6180_v22, 4 }
 0x226   :  { %v2329_v12 = vsel %vm2315_vm11, %v7703_v52, 4  ;;  %v2330_v59 = vsel %vm2316_vm9, %v7322_v41, 4  ;;  %v2331_v34 = vsel %vm2317_vm1, %v6176_v45, 4  ;;  %v2332_v3 = vsel %vm2318_vm4, %v6180_v22, 4 }
 0x227   :  { %v2333_v30 = vsel %vm2319_vm15, %v7703_v52, 4  ;;  %v2334_v10 = vsel %vm2274_vm6, %v2322_v17, 2147483647  ;;  %v2335_v37 = vsel %vm2274_vm6, %v2323_v33, 2147483647  ;;  %v2393_v62 = vsel %vm2392_vm7, %v2391_v20, %v7704_v19 }
 0x228   :  { %v2336_v54 = vsel %vm2274_vm6, %v2324_v4, 2147483647  ;;  %v2339_v27 = vsel %vm2274_vm6, %v2325_v9, 2147483647  ;;  %v2344_v2 = vsel %vm2274_vm6, %v2326_v46, 2147483647  ;;  %v2396_v42 = vsel %vm2395_vm3, %v2394_v39, %v2393_v62 }
 0x229   :  { %vm2337_vm2 = vcmp.lt.s32.totalorder %v2334_v10, %v2336_v54  ;;  %vm2340_vm13 = vcmp.lt.s32.totalorder %v2335_v37, %v2339_v27  ;;  %v2345_v57 = vsel %vm2274_vm6, %v2327_v7, 2147483647  ;;  %v2346_v49 = vsel %vm2274_vm6, %v2328_v48, 2147483647 }
 0x22a   :  { %v2338_v17 = vsel %vm2337_vm2, %v2334_v10, %v2336_v54  ;;  %v2341_v1 = vsel %vm2340_vm13, %v2335_v37, %v2339_v27  ;;  %vm2347_vm0 = vcmp.lt.s32.totalorder %v2344_v2, %v2346_v49  ;;  %v2349_v33 = vsel %vm2274_vm6, %v2329_v12, 2147483647  ;;  %v7705_v12 = vld [vmem:[#allocation5_spill] sm:$0xff]  ;;  %v7709_v27 = vld [vmem:[#allocation50_spill] sm:$0xff] }
 0x22b   :  { %vm2342_vm8 = vcmp.lt.s32.totalorder %v2338_v17, %v2341_v1  ;;  %v2348_v20 = vsel %vm2347_vm0, %v2344_v2, %v2346_v49  ;;  %vm2350_vm12 = vcmp.lt.s32.totalorder %v2345_v57, %v2349_v33  ;;  %v2354_v4 = vsel %vm2274_vm6, %v2330_v59, 2147483647 }
 0x22c   :  { %v2343_v9 = vsel %vm2342_vm8, %v2338_v17, %v2341_v1  ;;  %v2351_v46 = vsel %vm2350_vm12, %v2345_v57, %v2349_v33  ;;  %v2355_v39 = vsel %vm2274_vm6, %v2331_v34, 2147483647  ;;  %v2356_v19 = vsel %vm2274_vm6, %v2332_v3, 2147483647  ;;  %v7708_v3 = vld [vmem:[#allocation48_spill] sm:$0xff] }
 0x22d   :  { %vm2352_vm10 = vcmp.lt.s32.totalorder %v2348_v20, %v2351_v46  ;;  %vm2357_vm14 = vcmp.lt.s32.totalorder %v2354_v4, %v2356_v19  ;;  %v2359_v7 = vsel %vm2274_vm6, %v2333_v30, 2147483647  ;;  %v2367_v48 = vrot.slane %v2343_v9, %v6172_v44 }
 0x22e   :  { %v2353_v10 = vsel %vm2352_vm10, %v2348_v20, %v2351_v46  ;;  %v2358_v37 = vsel %vm2357_vm14, %v2354_v4, %v2356_v19  ;;  %vm2360_vm5 = vcmp.lt.s32.totalorder %v2355_v39, %v2359_v7  ;;  %v2397_v62 = vrot.slane %v7705_v12, 5  ;;  %v7712_v4 = vld [vmem:[#allocation46_spill] sm:$0xff] }
 0x22f   :  { %v2361_v54 = vsel %vm2360_vm5, %v2355_v39, %v2359_v7  ;;  %v2371_v59 = vrot.slane %v2353_v10, %v6172_v44  ;;  %vm6229_vm11 = vcmp.eq.s32.totalorder %v7322_v41, %v2367_v48  ;;  %vm2398_vm9 = vcmask 1043459  }
 0x230   :  { %vm2362_vm1 = vcmp.lt.s32.totalorder %v2358_v37, %v2361_v54  ;;  %v2399_v34 = vsel %vm2398_vm9, %v2397_v62, %v2396_v42  ;;  %v2400_v30 = vrot.slane %v7708_v3, 7  ;;  %v2402_v2 = vrot.slane %v7709_v27, 6 }
 0x231   :  { %v2363_v57 = vsel %vm2362_vm1, %v2358_v37, %v2361_v54  ;;  %vm6237_vm4 = vcmp.eq.s32.totalorder %v7322_v41, %v2371_v59  ;;  %v2404_v17 = vrot.slane %v5245_v18, 5  ;;  %v2406_v33 = vrot.slane %v5943_v63, 7  ;;  %v7715_v54 = vld [vmem:[#allocation68_spill] sm:$0xff] }
 0x232   :  { %v2375_v20 = vrot.slane %v2363_v57, %v6172_v44  ;;  %v2401_v9 = vsel %vm2392_vm7, %v2400_v30, %v7712_v4  ;;  %v2408_v42 = vrot.slane %v5945_v60, 6  ;;  %v2410_v46 = vrot.slane %v5947_v40, 5  ;;  %v7716_v30 = vld [vmem:[#allocation23_spill] sm:$0xff] }
 0x233   :  { %v2403_v39 = vsel %vm2395_vm3, %v2402_v2, %v2401_v9  ;;  %v2407_v19 = vsel %vm2392_vm7, %v2406_v33, %v5941_v38  ;;  %v2415_v7 = vsel %vm6229_vm11, %v2399_v34, 0.0  ;;  %vm7260_vm15 = vcmask 60416   ;;  %v7717_v2 = vld [vmem:[#allocation66_spill] sm:$0xff]  ;;  %v7718_v4 = vld [vmem:[#allocation67_spill] sm:$0xff] }
 0x234   :  { %vm6254_vm2 = vcmp.eq.s32.totalorder %v7322_v41, %v2375_v20  ;;  %v2405_v48 = vsel %vm2398_vm9, %v2404_v17, %v2403_v39  ;;  %v2409_v60 = vsel %vm2395_vm3, %v2408_v42, %v2407_v19  ;;  %v2419_v10 = vsel %vm7260_vm15, %v2415_v7, 0.0  ;;  %v7719_v39 = vld [vmem:[#allocation94_spill] sm:$0xff]  ;;  %v7720_v7 = vld [vmem:[#allocation95_spill] sm:$0xff] }
 0x235   :  { %v2411_v37 = vsel %vm2398_vm9, %v2410_v46, %v2409_v60  ;;  %v2416_v38 = vsel %vm6237_vm4, %v2405_v48, 0.0  ;;  %v2420_v62 = vrot.slane %v2419_v10, 4  ;;  %v2452_v59 = vrot.slane %v7715_v54, 7  ;;  %v7721_v54 = vld [vmem:[#allocation96_spill] sm:$0xff] }
 0x236   :  { %v2417_v34 = vsel %vm6254_vm2, %v2411_v37, 0.0  ;;  %v2426_v3 = vsel %vm7260_vm15, %v2416_v38, 0.0  ;;  %v2454_v27 = vrot.slane %v7716_v30, 6  ;;  %v2456_v57 = vrot.slane %v7717_v2, 5 }
 0x237   :  { %v2421_v17 = vadd.f32 %v2420_v62, %v2419_v10  ;;  %v2427_v33 = vrot.slane %v2426_v3, 4  ;;  %v2433_v20 = vsel %vm7260_vm15, %v2417_v34, 0.0  ;;  %v2453_v9 = vsel %vm2392_vm7, %v2452_v59, %v7718_v4  ;;  %v7722_v62 = vld [vmem:[#allocation93_spill] sm:$0xff] }
 0x238   :  { %v2434_v42 = vrot.slane %v2433_v20, 4  ;;  %v2455_v46 = vsel %vm2395_vm3, %v2454_v27, %v2453_v9  ;;  %v2458_v19 = vrot.slane %v7719_v39, 7  ;;  %v2460_v48 = vrot.slane %v7720_v7, 6 }
 0x239   :  { %v2422_v60 = vrot.slane %v2421_v17, 2  ;;  %v2428_v37 = vadd.f32 %v2427_v33, %v2426_v3  ;;  %v2457_v38 = vsel %vm2398_vm9, %v2456_v57, %v2455_v46  ;;  %v2462_v30 = vrot.slane %v7721_v54, 5 }
 0x23a   :  { %v2435_v10 = vadd.f32 %v2434_v42, %v2433_v20  ;;  %v2459_v34 = vsel %vm2392_vm7, %v2458_v19, %v7722_v62  ;;  %v2466_v59 = vrot.slane %v6098_v47, 6  ;;  %v2468_v39 = vrot.slane %v6100_v29, 5  ;;  %v7728_v62 = vld [vmem:[#allocation13_spill] sm:$0xff] }
 0x23b   :  { %v2423_v4 = vadd.f32 %v2422_v60, %v2421_v17  ;;  %v2429_v27 = vrot.slane %v2428_v37, 2  ;;  %v2461_v9 = vsel %vm2395_vm3, %v2460_v48, %v2459_v34  ;;  %v2465_v57 = vsel %vm2392_vm7, %v2464_v0, %v6094_v56 }
 0x23c   :  { %v2436_v7 = vrot.slane %v2435_v10, 2  ;;  %v2463_v3 = vsel %vm2398_vm9, %v2462_v30, %v2461_v9  ;;  %v2473_v33 = vsel %vm6229_vm11, %v2457_v38, 0.0  ;;  %v2467_v16 = vsel %vm2395_vm3, %v2466_v59, %v2465_v57  ;;  %v7729_v9 = vld [vmem:[#allocation55_spill] sm:$0xff] }
 0x23d   :  { %v2424_v20 = vrot.slane %v2423_v4, 1  ;;  %v2430_v42 = vadd.f32 %v2429_v27, %v2428_v37  ;;  %v2474_v47 = vsel %vm6237_vm4, %v2463_v3, 0.0  ;;  %v2469_v46 = vsel %vm2398_vm9, %v2468_v39, %v2467_v16  ;;  %v7730_v3 = vld [vmem:[#allocation56_spill] sm:$0xff]  ;;  %v7731_v16 = vld [vmem:[#allocation34_spill] sm:$0xff] }
 0x23e   :  { %v2437_v17 = vadd.f32 %v2436_v7, %v2435_v10  ;;  %v2476_v19 = vsel %vm7260_vm15, %v2473_v33, 0.0  ;;  %v2483_v48 = vsel %vm7260_vm15, %v2474_v47, 0.0  ;;  %v7723_v56 = vrot.slane %v6123_v24, 1 }
 0x23f   :  { %v7725_v1 = vrot.slane %v6131_v8, 1  ;;  %v2475_v49 = vsel %vm6254_vm2, %v2469_v46, 0.0  ;;  %v2477_v37 = vrot.slane %v2476_v19, 4  ;;  %v6307_v38 = vadd.f32 %v2424_v20, %v2423_v4 }
 0x240   :  { %v6298_v0 = vadd.f32 %v7723_v56, %v6123_v24  ;;  %v2484_v30 = vrot.slane %v2483_v48, 4  ;;  %v2490_v10 = vsel %vm7260_vm15, %v2475_v49, 0.0  ;;  %v2497_v34 = vsel %vm2274_vm6, %v7728_v62, -inf }
 0x241   :  { %v6303_v60 = vadd.f32 %v7725_v1, %v6131_v8  ;;  %7727 = vst [vmem:[#allocation30_spill] sm:$0xff] %v6307_v38  ;;  %v2431_v59 = vrot.slane %v2430_v42, 1  ;;  %v2478_v24 = vadd.f32 %v2477_v37, %v2476_v19  ;;  %v2491_v27 = vrot.slane %v2490_v10, 4  ;;  %v7732_v19 = vld [vmem:[#allocation35_spill] sm:$0xff]  ;;  %v7733_v1 = vld [vmem:[#allocation36_spill] sm:$0xff]  ;;  %v7735_v38 = vld [vmem:[#allocation41_spill] sm:$0xff] }
 0x242   :  { %7724 = vst [vmem:[#allocation53_spill] sm:$0xff] %v6298_v0  ;;  %v2498_v39 = vsel %vm2274_vm6, %v7729_v9, -inf  ;;  %v2438_v8 = vrot.slane %v2437_v17, 1  ;;  %v2485_v7 = vadd.f32 %v2484_v30, %v2483_v48  ;;  %v6317_v4 = vsel %vm2274_vm6, %v7730_v3, -inf  ;;  %v7736_v0 = vld [vmem:[#allocation43_spill] sm:$0xff] }
 0x243   :  { %7726 = vst [vmem:[#allocation54_spill] sm:$0xff] %v6303_v60  ;;  %v2499_v63 = vmax.f32 %v6143_v36, %v2498_v39  ;;  %v2479_v57 = vrot.slane %v2478_v24, 2  ;;  %v2492_v33 = vadd.f32 %v2491_v27, %v2490_v10  ;;  %v2501_v20 = vmax.f32 %v2497_v34, %v6317_v4  ;;  %v7734_v36 = vld [vmem:[#allocation39_spill] sm:$0xff] }
 0x244   :  { %v2503_v47 = vsel %vm2274_vm6, %v7731_v16, -inf  ;;  %v2486_v46 = vrot.slane %v2485_v7, 2  ;;  %v2504_v56 = vsel %vm2274_vm6, %v7732_v19, -inf  ;;  %v6326_v48 = vsel %vm2274_vm6, %v7733_v1, -inf }
 0x245   :  { %v2509_v49 = vsel %vm2274_vm6, %v7734_v36, -inf  ;;  %v2480_v37 = vadd.f32 %v2479_v57, %v2478_v24  ;;  %v2493_v30 = vrot.slane %v2492_v33, 2  ;;  %v2502_v39 = vmax.f32 %v2499_v63, %v2501_v20 }
 0x246   :  { %v2505_v10 = vmax.f32 %v6157_v13, %v2504_v56  ;;  %v6331_v34 = vadd.f32 %v2486_v46, %v2485_v7  ;;  %v2507_v27 = vmax.f32 %v2503_v47, %v6326_v48  ;;  %v2510_v60 = vsel %vm2274_vm6, %v7735_v38, -inf }
 0x247   :  { %v6338_v43 = vsel %vm2274_vm6, %v7736_v0, -inf  ;;  %v2481_v26 = vrot.slane %v2480_v37, 1  ;;  %v6340_v23 = vadd.f32 %v2493_v30, %v2492_v33  ;;  %v2511_v24 = vmax.f32 %v6169_v6, %v2510_v60 }
 0x248   :  { %v2513_v63 = vmax.f32 %v2509_v49, %v6338_v43  ;;  %v6344_v57 = vadd.f32 %v2431_v59, %v2430_v42  ;;  %v6346_v13 = vadd.f32 %v2438_v8, %v2437_v17  ;;  %v2508_v7 = vmax.f32 %v2505_v10, %v2507_v27  ;;  %v7738_v42 = vld [vmem:[#allocation7_spill] sm:$0xff] }
 0x249   :  { %v2518_v20 = vrot.slane %v2502_v39, %v6172_v44  ;;  %v6349_v47 = vadd.f32 %v2481_v26, %v2480_v37  ;;  %v2488_v46 = vrot.slane %v6331_v34, 1  ;;  %v2605_v15 = vrot.slane %v7737_v50, 7 }
 0x24a   :  { %v2514_v56 = vmax.f32 %v2511_v24, %v2513_v63  ;;  %v2495_v33 = vrot.slane %v6340_v23, 1  ;;  %v2522_v6 = vrot.slane %v2508_v7, %v6172_v44  ;;  %v2607_v60 = vrot.slane %v7738_v42, 6 }
 0x24b   :  { %vm2527_vm13 = vcmp.eq.f32.partialorder %v7695_v28, %v2518_v20  ;;  %vm2528_vm0 = vcmp.eq.f32.partialorder %v7728_v62, %v2518_v20  ;;  %vm2529_vm8 = vcmp.eq.f32.partialorder %v7729_v9, %v2518_v20  ;;  %vm2530_vm12 = vcmp.eq.f32.partialorder %v7730_v3, %v2518_v20 }
 0x24c   :  { %v2526_v17 = vrot.slane %v2514_v56, %v6172_v44  ;;  %vm2531_vm10 = vcmp.eq.f32.partialorder %v7700_v35, %v2522_v6  ;;  %vm2532_vm14 = vcmp.eq.f32.partialorder %v7731_v16, %v2522_v6  ;;  %vm2533_vm5 = vcmp.eq.f32.partialorder %v7732_v19, %v2522_v6 }
 0x24d   :  { %vm2534_vm11 = vcmp.eq.f32.partialorder %v7733_v1, %v2522_v6  ;;  %v2539_v50 = vsel %vm2527_vm13, %v7322_v41, 4  ;;  %v2540_v26 = vsel %vm2528_vm0, %v6176_v45, 4  ;;  %v2541_v28 = vsel %vm2529_vm8, %v6180_v22, 4 }
 0x24e   :  { %vm2535_vm1 = vcmp.eq.f32.partialorder %v5539_v53, %v2526_v17  ;;  %vm2536_vm4 = vcmp.eq.f32.partialorder %v7734_v36, %v2526_v17  ;;  %vm2537_vm2 = vcmp.eq.f32.partialorder %v7735_v38, %v2526_v17  ;;  %vm2538_vm15 = vcmp.eq.f32.partialorder %v7736_v0, %v2526_v17 }
 0x24f   :  { %v2542_v35 = vsel %vm2530_vm12, %v7703_v52, 4  ;;  %v2543_v62 = vsel %vm2531_vm10, %v7322_v41, 4  ;;  %v2544_v59 = vsel %vm2532_vm14, %v6176_v45, 4  ;;  %v2545_v53 = vsel %vm2533_vm5, %v6180_v22, 4 }
 0x250   :  { %v2546_v9 = vsel %vm2534_vm11, %v7703_v52, 4  ;;  %v2547_v38 = vsel %vm2535_vm1, %v7322_v41, 4  ;;  %v2548_v8 = vsel %vm2536_vm4, %v6176_v45, 4  ;;  %v2549_v16 = vsel %vm2537_vm2, %v6180_v22, 4 }
 0x251   :  { %v2550_v19 = vsel %vm2538_vm15, %v7703_v52, 4  ;;  %v2551_v36 = vsel %vm2274_vm6, %v2539_v50, 2147483647  ;;  %v2552_v49 = vsel %vm2274_vm6, %v2540_v26, 2147483647  ;;  %v2606_v30 = vsel %vm2392_vm7, %v2605_v15, %v7705_v12 }
 0x252   :  { %v2553_v37 = vsel %vm2274_vm6, %v2541_v28, 2147483647  ;;  %v2556_v39 = vsel %vm2274_vm6, %v2542_v35, 2147483647  ;;  %v2561_v10 = vsel %vm2274_vm6, %v2543_v62, 2147483647 }
 0x253   :  { %vm2554_vm13 = vcmp.lt.s32.totalorder %v2551_v36, %v2553_v37  ;;  %v2562_v27 = vsel %vm2274_vm6, %v2544_v59, 2147483647  ;;  %vm2557_vm0 = vcmp.lt.s32.totalorder %v2552_v49, %v2556_v39  ;;  %v2563_v63 = vsel %vm2274_vm6, %v2545_v53, 2147483647 }
 0x254   :  { %v2555_v24 = vsel %vm2554_vm13, %v2551_v36, %v2553_v37  ;;  %v2566_v7 = vsel %vm2274_vm6, %v2546_v9, 2147483647  ;;  %v2558_v20 = vsel %vm2557_vm0, %v2552_v49, %v2556_v39  ;;  %vm2564_vm15 = vcmp.lt.s32.totalorder %v2561_v10, %v2563_v63  ;;  %v7745_v37 = vld [vmem:[#allocation82_spill] sm:$0xff] }
 0x255   :  { %vm2567_vm8 = vcmp.lt.s32.totalorder %v2562_v27, %v2566_v7  ;;  %v2571_v56 = vsel %vm2274_vm6, %v2547_v38, 2147483647  ;;  %vm2559_vm12 = vcmp.lt.s32.totalorder %v2555_v24, %v2558_v20  ;;  %v2565_v15 = vsel %vm2564_vm15, %v2561_v10, %v2563_v63  ;;  %v7741_v38 = vld [vmem:[#allocation8_spill] sm:$0xff]  ;;  %v7746_v10 = vld [vmem:[#allocation83_spill] sm:$0xff] }
 0x256   :  { %v2568_v12 = vsel %vm2567_vm8, %v2562_v27, %v2566_v7  ;;  %v2572_v6 = vsel %vm2274_vm6, %v2548_v8, 2147483647  ;;  %v2560_v42 = vsel %vm2559_vm12, %v2555_v24, %v2558_v20  ;;  %v2573_v17 = vsel %vm2274_vm6, %v2549_v16, 2147483647  ;;  %v7742_v16 = vld [vmem:[#allocation20_spill] sm:$0xff] }
 0x257   :  { %vm2569_vm10 = vcmp.lt.s32.totalorder %v2565_v15, %v2568_v12  ;;  %v2576_v50 = vsel %vm2274_vm6, %v2550_v19, 2147483647  ;;  %vm2574_vm14 = vcmp.lt.s32.totalorder %v2571_v56, %v2573_v17  ;;  %v2584_v28 = vrot.slane %v2560_v42, %v6172_v44 }
 0x258   :  { %v2570_v26 = vsel %vm2569_vm10, %v2565_v15, %v2568_v12  ;;  %vm2577_vm5 = vcmp.lt.s32.totalorder %v2572_v6, %v2576_v50  ;;  %v2575_v35 = vsel %vm2574_vm14, %v2571_v56, %v2573_v17  ;;  %v2608_v53 = vsel %vm2395_vm3, %v2607_v60, %v2606_v30 }
 0x259   :  { %v2578_v62 = vsel %vm2577_vm5, %v2572_v6, %v2576_v50  ;;  %v2588_v59 = vrot.slane %v2570_v26, %v6172_v44  ;;  %vm6399_vm1 = vcmp.eq.s32.totalorder %v7322_v41, %v2584_v28  ;;  %v2609_v8 = vrot.slane %v7741_v38, 5  ;;  %v7750_v50 = vld [vmem:[#allocation24_spill] sm:$0xff] }
 0x25a   :  { %vm2579_vm11 = vcmp.lt.s32.totalorder %v2575_v35, %v2578_v62  ;;  %v2611_v19 = vrot.slane %v7742_v16, 7  ;;  %v2613_v39 = vrot.slane %v7745_v37, 6  ;;  %v2615_v60 = vrot.slane %v7746_v10, 5 }
 0x25b   :  { %v2580_v36 = vsel %vm2579_vm11, %v2575_v35, %v2578_v62  ;;  %vm6406_vm4 = vcmp.eq.s32.totalorder %v7322_v41, %v2588_v59  ;;  %v2610_v27 = vsel %vm2398_vm9, %v2609_v8, %v2608_v53  ;;  %v2617_v63 = vrot.slane %v5952_v14, 7  ;;  %v7752_v62 = vld [vmem:[#allocation25_spill] sm:$0xff]  ;;  %v7753_v53 = vld [vmem:[#allocation26_spill] sm:$0xff] }
 0x25c   :  { %v2592_v30 = vrot.slane %v2580_v36, %v6172_v44  ;;  %v2612_v24 = vsel %vm2392_vm7, %v2611_v19, %v5245_v18  ;;  %v2619_v20 = vrot.slane %v5954_v31, 6  ;;  %v2621_v56 = vrot.slane %v5964_v5, 5 }
 0x25d   :  { %v2614_v7 = vsel %vm2395_vm3, %v2613_v39, %v2612_v24  ;;  %v2626_v15 = vsel %vm6399_vm1, %v2610_v27, 0.0  ;;  %v2618_v18 = vsel %vm2392_vm7, %v2617_v63, %v5947_v40  ;;  %vm7749_vm13 = vcmask 60416   ;;  %v7756_v27 = vld [vmem:[#allocation98_spill] sm:$0xff] }
 0x25e   :  { %vm6423_vm2 = vcmp.eq.s32.totalorder %v7322_v41, %v2592_v30  ;;  %v2616_v6 = vsel %vm2398_vm9, %v2615_v60, %v2614_v7  ;;  %v2629_v14 = vsel %vm7749_vm13, %v2626_v15, 0.0  ;;  %v2620_v42 = vsel %vm2395_vm3, %v2619_v20, %v2618_v18  ;;  %vm7751_vm0 = vmmov %vm7749_vm13  ;;  %v7755_v60 = vld [vmem:[#allocation97_spill] sm:$0xff] }
 0x25f   :  { %v2627_v31 = vsel %vm6406_vm4, %v2616_v6, 0.0  ;;  %v2630_v17 = vrot.slane %v2629_v14, 4  ;;  %v2659_v26 = vrot.slane %v7750_v50, 7  ;;  %v2622_v28 = vsel %vm2398_vm9, %v2621_v56, %v2620_v42  ;;  %vm7754_vm15 = vmmov %vm7751_vm0  ;;  %v7757_v6 = vld [vmem:[#allocation99_spill] sm:$0xff] }
 0x260   :  { %v2636_v35 = vsel %vm7751_vm0, %v2627_v31, 0.0  ;;  %v2661_v59 = vrot.slane %v7752_v62, 6  ;;  %v2663_v8 = vrot.slane %v7753_v53, 5  ;;  %v2628_v40 = vsel %vm6423_vm2, %v2622_v28, 0.0  ;;  %vm7758_vm8 = vmmov %vm7751_vm0 }
 0x261   :  { %v2631_v16 = vadd.f32 %v2630_v17, %v2629_v14  ;;  %v2637_v19 = vrot.slane %v2636_v35, 4  ;;  %v2660_v36 = vsel %vm2392_vm7, %v2659_v26, %v7717_v2  ;;  %v2643_v37 = vsel %vm7754_vm15, %v2628_v40, 0.0  ;;  %vm7761_vm12 = vmmov %vm7751_vm0 }
 0x262   :  { %v2662_v39 = vsel %vm2395_vm3, %v2661_v59, %v2660_v36  ;;  %v2665_v30 = vrot.slane %v7755_v60, 7  ;;  %v2667_v24 = vrot.slane %v7756_v27, 6  ;;  %v2644_v20 = vrot.slane %v2643_v37, 4  ;;  %vm7762_vm10 = vmmov %vm7751_vm0  ;;  %v7763_v60 = vld [vmem:[#allocation58_spill] sm:$0xff] }
 0x263   :  { %v2632_v63 = vrot.slane %v2631_v16, 2  ;;  %v2638_v7 = vadd.f32 %v2637_v19, %v2636_v35  ;;  %v2664_v56 = vsel %vm2398_vm9, %v2663_v8, %v2662_v39  ;;  %v2669_v18 = vrot.slane %v7757_v6, 5 }
 0x264   :  { %v2666_v15 = vsel %vm2392_vm7, %v2665_v30, %v7721_v54  ;;  %v2671_v2 = vrot.slane %v6105_v51, 7  ;;  %v2673_v14 = vrot.slane %v6107_v11, 6  ;;  %v2645_v17 = vadd.f32 %v2644_v20, %v2643_v37  ;;  %v7760_v37 = vld [vmem:[#allocation57_spill] sm:$0xff]  ;;  %v7764_v20 = vld [vmem:[#allocation59_spill] sm:$0xff] }
 0x265   :  { %v2633_v42 = vadd.f32 %v2632_v63, %v2631_v16  ;;  %v2639_v31 = vrot.slane %v2638_v7, 2  ;;  %v2668_v50 = vsel %vm2395_vm3, %v2667_v24, %v2666_v15  ;;  %v2675_v35 = vrot.slane %v6117_v21, 5 }
 0x266   :  { %v2670_v26 = vsel %vm2398_vm9, %v2669_v18, %v2668_v50  ;;  %v2672_v28 = vsel %vm2392_vm7, %v2671_v2, %v6100_v29  ;;  %v2680_v54 = vsel %vm6399_vm1, %v2664_v56, 0.0  ;;  %v2646_v51 = vrot.slane %v2645_v17, 2 }
 0x267   :  { %v2634_v62 = vrot.slane %v2633_v42, 1  ;;  %v2640_v59 = vadd.f32 %v2639_v31, %v2638_v7  ;;  %v2674_v11 = vsel %vm2395_vm3, %v2673_v14, %v2672_v28  ;;  %v6464_v8 = vadd.f32 %v2488_v46, %v6331_v34  ;;  %v7765_v14 = vld [vmem:[#allocation37_spill] sm:$0xff] }
 0x268   :  { %v2676_v40 = vsel %vm2398_vm9, %v2675_v35, %v2674_v11  ;;  %v2681_v29 = vsel %vm6406_vm4, %v2670_v26, 0.0  ;;  %v2683_v16 = vsel %vm7758_vm8, %v2680_v54, 0.0  ;;  %v6473_v9 = vadd.f32 %v2495_v33, %v6340_v23  ;;  %v7767_v26 = vld [vmem:[#allocation75_spill] sm:$0xff] }
 0x269   :  { %v2647_v19 = vadd.f32 %v2646_v51, %v2645_v17  ;;  %v2682_v36 = vsel %vm6423_vm2, %v2676_v40, 0.0  ;;  %v2704_v34 = vsel %vm2274_vm6, %v7760_v37, -inf  ;;  %v2684_v46 = vrot.slane %v2683_v16, 4  ;;  %v7766_v17 = vld [vmem:[#allocation38_spill] sm:$0xff] }
 0x26a   :  { %7759 = vst [vmem:[#allocation31_spill] sm:$0xff] %v6473_v9  ;;  %v2690_v39 = vsel %vm7761_vm12, %v2681_v29, 0.0  ;;  %v2697_v49 = vsel %vm7762_vm10, %v2682_v36, 0.0  ;;  %v2705_v30 = vsel %vm2274_vm6, %v7763_v60, -inf  ;;  %v6483_v27 = vadd.f32 %v2634_v62, %v2633_v42 }
 0x26b   :  { %v2641_v24 = vrot.slane %v2640_v59, 1  ;;  %v2691_v23 = vrot.slane %v2690_v39, 4  ;;  %v2698_v33 = vrot.slane %v2697_v49, 4  ;;  %v2648_v63 = vrot.slane %v2647_v19, 1 }
 0x26c   :  { %v2685_v7 = vadd.f32 %v2684_v46, %v2683_v16  ;;  %v2706_v12 = vmax.f32 %v6317_v4, %v2705_v30  ;;  %v6488_v56 = vsel %vm2274_vm6, %v7764_v20, -inf  ;;  %v2710_v31 = vsel %vm2274_vm6, %v7765_v14, -inf  ;;  %v7768_v4 = vld [vmem:[#allocation45_spill] sm:$0xff]  ;;  %v7769_v16 = vld [vmem:[#allocation47_spill] sm:$0xff] }
 0x26d   :  { %v2692_v15 = vadd.f32 %v2691_v23, %v2690_v39  ;;  %v2699_v18 = vadd.f32 %v2698_v33, %v2697_v49  ;;  %v2708_v2 = vmax.f32 %v2704_v34, %v6488_v56  ;;  %v2711_v50 = vsel %vm2274_vm6, %v7766_v17, -inf  ;;  %v7770_v34 = vld [vmem:[#allocation49_spill] sm:$0xff] }
 0x26e   :  { %v2686_v42 = vrot.slane %v2685_v7, 2  ;;  %v6497_v28 = vsel %vm2274_vm6, %v7767_v26, -inf  ;;  %v2716_v35 = vsel %vm2274_vm6, %v7768_v4, -inf  ;;  %v2712_v11 = vmax.f32 %v6326_v48, %v2711_v50  ;;  %v7771_v50 = vld [vmem:[#allocation9_spill] sm:$0xff] }
 0x26f   :  { %v2693_v54 = vrot.slane %v2692_v15, 2  ;;  %v2700_v62 = vrot.slane %v2699_v18, 2  ;;  %v2709_v51 = vmax.f32 %v2706_v12, %v2708_v2  ;;  %v2714_v29 = vmax.f32 %v2710_v31, %v6497_v28 }
 0x270   :  { %v2687_v40 = vadd.f32 %v2686_v42, %v2685_v7  ;;  %v2717_v36 = vsel %vm2274_vm6, %v7769_v16, -inf  ;;  %v6507_v46 = vsel %vm2274_vm6, %v7770_v34, -inf  ;;  %v6515_v33 = vadd.f32 %v2641_v24, %v2640_v59 }
 0x271   :  { %v6509_v39 = vadd.f32 %v2693_v54, %v2692_v15  ;;  %v6511_v49 = vadd.f32 %v2700_v62, %v2699_v18  ;;  %v2718_v30 = vmax.f32 %v6338_v43, %v2717_v36  ;;  %v2720_v23 = vmax.f32 %v2716_v35, %v6507_v46  ;;  %v7773_v35 = vld [vmem:[#allocation10_spill] sm:$0xff] }
 0x272   :  { %v2688_v48 = vrot.slane %v2687_v40, 1  ;;  %v2715_v7 = vmax.f32 %v2712_v11, %v2714_v29  ;;  %v2725_v12 = vrot.slane %v2709_v51, %v6172_v44  ;;  %v6518_v2 = vadd.f32 %v2648_v63, %v2647_v19 }
 0x273   :  { %v2695_v31 = vrot.slane %v6509_v39, 1  ;;  %v2721_v42 = vmax.f32 %v2718_v30, %v2720_v23  ;;  %v2812_v15 = vrot.slane %v7771_v50, 7  ;;  %v2702_v18 = vrot.slane %v6511_v49, 1 }
 0x274   :  { %v6522_v54 = vadd.f32 %v2688_v48, %v2687_v40  ;;  %v2729_v43 = vrot.slane %v2715_v7, %v6172_v44  ;;  %v2814_v59 = vrot.slane %v7773_v35, 6  ;;  %vm2734_vm14 = vcmp.eq.f32.partialorder %v7730_v3, %v2725_v12 }
 0x275   :  { %v2733_v24 = vrot.slane %v2721_v42, %v6172_v44  ;;  %vm2735_vm5 = vcmp.eq.f32.partialorder %v7760_v37, %v2725_v12  ;;  %vm2736_vm11 = vcmp.eq.f32.partialorder %v7763_v60, %v2725_v12  ;;  %vm2737_vm1 = vcmp.eq.f32.partialorder %v7764_v20, %v2725_v12 }
 0x276   :  { %7772 = vst [vmem:[#allocation32_spill] sm:$0xff] %v6522_v54  ;;  %vm2738_vm4 = vcmp.eq.f32.partialorder %v7733_v1, %v2729_v43  ;;  %vm2739_vm2 = vcmp.eq.f32.partialorder %v7765_v14, %v2729_v43  ;;  %vm2740_vm13 = vcmp.eq.f32.partialorder %v7766_v17, %v2729_v43  ;;  %vm2741_vm0 = vcmp.eq.f32.partialorder %v7767_v26, %v2729_v43 }
 0x277   :  { %vm2742_vm15 = vcmp.eq.f32.partialorder %v7736_v0, %v2733_v24  ;;  %vm2743_vm8 = vcmp.eq.f32.partialorder %v7768_v4, %v2733_v24  ;;  %vm2744_vm12 = vcmp.eq.f32.partialorder %v7769_v16, %v2733_v24  ;;  %vm2745_vm10 = vcmp.eq.f32.partialorder %v7770_v34, %v2733_v24 }
 0x278   :  { %v2746_v3 = vsel %vm2734_vm14, %v7322_v41, 4  ;;  %v2747_v19 = vsel %vm2735_vm5, %v6176_v45, 4  ;;  %v2748_v1 = vsel %vm2736_vm11, %v6180_v22, 4  ;;  %v2749_v37 = vsel %vm2737_vm1, %v7703_v52, 4 }
 0x279   :  { %v2750_v60 = vsel %vm2738_vm4, %v7322_v41, 4  ;;  %v2751_v63 = vsel %vm2739_vm2, %v6176_v45, 4  ;;  %v2752_v0 = vsel %vm2740_vm13, %v6180_v22, 4  ;;  %v2753_v14 = vsel %vm2741_vm0, %v7703_v52, 4 }
 0x27a   :  { %v2754_v17 = vsel %vm2742_vm15, %v7322_v41, 4  ;;  %v2755_v4 = vsel %vm2743_vm8, %v6176_v45, 4  ;;  %v2756_v62 = vsel %vm2744_vm12, %v6180_v22, 4  ;;  %v2757_v51 = vsel %vm2745_vm10, %v7703_v52, 4 }
 0x27b   :  { %v2758_v11 = vsel %vm2274_vm6, %v2746_v3, 2147483647  ;;  %v2759_v40 = vsel %vm2274_vm6, %v2747_v19, 2147483647  ;;  %v2813_v29 = vsel %vm2392_vm7, %v2812_v15, %v7741_v38  ;;  %v2760_v16 = vsel %vm2274_vm6, %v2748_v1, 2147483647 }
 0x27c   :  { %v2763_v36 = vsel %vm2274_vm6, %v2749_v37, 2147483647  ;;  %v2768_v30 = vsel %vm2274_vm6, %v2750_v60, 2147483647  ;;  %v2815_v23 = vsel %vm2395_vm3, %v2814_v59, %v2813_v29  ;;  %vm2761_vm14 = vcmp.lt.s32.totalorder %v2758_v11, %v2760_v16  ;;  %v7774_v60 = vld [vmem:[#allocation11_spill] sm:$0xff]  ;;  %v7779_v29 = vld [vmem:[#allocation86_spill] sm:$0xff] }
 0x27d   :  { %vm2764_vm5 = vcmp.lt.s32.totalorder %v2759_v40, %v2763_v36  ;;  %v2769_v48 = vsel %vm2274_vm6, %v2751_v63, 2147483647  ;;  %v2770_v7 = vsel %vm2274_vm6, %v2752_v0, 2147483647  ;;  %v2762_v12 = vsel %vm2761_vm14, %v2758_v11, %v2760_v16  ;;  %v7778_v11 = vld [vmem:[#allocation85_spill] sm:$0xff] }
 0x27e   :  { %v2765_v42 = vsel %vm2764_vm5, %v2759_v40, %v2763_v36  ;;  %vm2771_vm11 = vcmp.lt.s32.totalorder %v2768_v30, %v2770_v7  ;;  %v2773_v50 = vsel %vm2274_vm6, %v2753_v14, 2147483647  ;;  %v2778_v15 = vsel %vm2274_vm6, %v2754_v17, 2147483647 }
 0x27f   :  { %vm2766_vm1 = vcmp.lt.s32.totalorder %v2762_v12, %v2765_v42  ;;  %v2772_v38 = vsel %vm2771_vm11, %v2768_v30, %v2770_v7  ;;  %vm2774_vm4 = vcmp.lt.s32.totalorder %v2769_v48, %v2773_v50  ;;  %v2779_v59 = vsel %vm2274_vm6, %v2755_v4, 2147483647  ;;  %v7777_v4 = vld [vmem:[#allocation84_spill] sm:$0xff] }
 0x280   :  { %v2767_v43 = vsel %vm2766_vm1, %v2762_v12, %v2765_v42  ;;  %v2775_v35 = vsel %vm2774_vm4, %v2769_v48, %v2773_v50  ;;  %v2780_v24 = vsel %vm2274_vm6, %v2756_v62, 2147483647  ;;  %v2783_v3 = vsel %vm2274_vm6, %v2757_v51, 2147483647 }
 0x281   :  { %vm2776_vm2 = vcmp.lt.s32.totalorder %v2772_v38, %v2775_v35  ;;  %vm2781_vm13 = vcmp.lt.s32.totalorder %v2778_v15, %v2780_v24  ;;  %v2791_v19 = vrot.slane %v2767_v43, %v6172_v44  ;;  %vm2784_vm0 = vcmp.lt.s32.totalorder %v2779_v59, %v2783_v3 }
 0x282   :  { %v2777_v1 = vsel %vm2776_vm2, %v2772_v38, %v2775_v35  ;;  %v2782_v37 = vsel %vm2781_vm13, %v2778_v15, %v2780_v24  ;;  %v2816_v63 = vrot.slane %v7774_v60, 5  ;;  %v2785_v0 = vsel %vm2784_vm0, %v2779_v59, %v2783_v3  ;;  %v7782_v35 = vld [vmem:[#allocation27_spill] sm:$0xff] }
 0x283   :  { %v2795_v14 = vrot.slane %v2777_v1, %v6172_v44  ;;  %vm6571_vm15 = vcmp.eq.s32.totalorder %v7322_v41, %v2791_v19  ;;  %v2818_v62 = vrot.slane %v7777_v4, 7  ;;  %vm2786_vm8 = vcmp.lt.s32.totalorder %v2782_v37, %v2785_v0  ;;  %v7788_v4 = vld [vmem:[#allocation70_spill] sm:$0xff] }
 0x284   :  { %v2817_v51 = vsel %vm2398_vm9, %v2816_v63, %v2815_v23  ;;  %v2820_v40 = vrot.slane %v7778_v11, 6  ;;  %v2822_v16 = vrot.slane %v7779_v29, 5  ;;  %v2787_v36 = vsel %vm2786_vm8, %v2782_v37, %v2785_v0  ;;  %v7787_v0 = vld [vmem:[#allocation69_spill] sm:$0xff] }
 0x285   :  { %vm6580_vm12 = vcmp.eq.s32.totalorder %v7322_v41, %v2795_v14  ;;  %v2819_v48 = vsel %vm2392_vm7, %v2818_v62, %v7746_v10  ;;  %v2824_v7 = vrot.slane %v5966_v58, 7  ;;  %v2799_v12 = vrot.slane %v2787_v36, %v6172_v44  ;;  %v7791_v36 = vld [vmem:[#allocation101_spill] sm:$0xff] }
 0x286   :  { %v2821_v42 = vsel %vm2395_vm3, %v2820_v40, %v2819_v48  ;;  %v2826_v23 = vrot.slane %v5968_v55, 6  ;;  %v2828_v50 = vrot.slane %v5970_v25, 5  ;;  %v2833_v43 = vsel %vm6571_vm15, %v2817_v51, 0.0  ;;  %v7790_v40 = vld [vmem:[#allocation100_spill] sm:$0xff] }
 0x287   :  { %v2823_v38 = vsel %vm2398_vm9, %v2822_v16, %v2821_v42  ;;  %v2825_v15 = vsel %vm2392_vm7, %v2824_v7, %v5964_v5  ;;  %v2866_v10 = vrot.slane %v7782_v35, 7  ;;  %vm6598_vm10 = vcmp.eq.s32.totalorder %v7322_v41, %v2799_v12 }
 0x288   :  { %v2827_v59 = vsel %vm2395_vm3, %v2826_v23, %v2825_v15  ;;  %v2834_v55 = vsel %vm6580_vm12, %v2823_v38, 0.0  ;;  %vm7785_vm14 = vcmask 60416   ;;  %v2868_v14 = vrot.slane %v7787_v0, 6 }
 0x289   :  { %v2836_v24 = vsel %vm7785_vm14, %v2833_v43, 0.0  ;;  %v2829_v3 = vsel %vm2398_vm9, %v2828_v50, %v2827_v59  ;;  %vm7786_vm5 = vmmov %vm7785_vm14  ;;  %v2867_v1 = vsel %vm2392_vm7, %v2866_v10, %v7753_v53  ;;  %v2870_v62 = vrot.slane %v7788_v4, 5  ;;  %v7792_v53 = vld [vmem:[#allocation102_spill] sm:$0xff] }
 0x28a   :  { %v2837_v5 = vrot.slane %v2836_v24, 4  ;;  %v2843_v19 = vsel %vm7786_vm5, %v2834_v55, 0.0  ;;  %v2835_v37 = vsel %vm6598_vm10, %v2829_v3, 0.0  ;;  %vm7789_vm11 = vmmov %vm7786_vm5  ;;  %v2872_v16 = vrot.slane %v7790_v40, 7 }
 0x28b   :  { %v2844_v63 = vrot.slane %v2843_v19, 4  ;;  %v2850_v11 = vsel %vm7789_vm11, %v2835_v37, 0.0  ;;  %v2874_v48 = vrot.slane %v7791_v36, 6  ;;  %v2869_v42 = vsel %vm2395_vm3, %v2868_v14, %v2867_v1  ;;  %vm7794_vm1 = vmmov %vm7786_vm5 }
 0x28c   :  { %v2838_v51 = vadd.f32 %v2837_v5, %v2836_v24  ;;  %v2851_v12 = vrot.slane %v2850_v11, 4  ;;  %v2876_v23 = vrot.slane %v7792_v53, 5  ;;  %v2871_v38 = vsel %vm2398_vm9, %v2870_v62, %v2869_v42  ;;  %vm7797_vm4 = vmmov %vm7794_vm1  ;;  %v7800_v42 = vld [vmem:[#allocation61_spill] sm:$0xff] }
 0x28d   :  { %v2845_v7 = vadd.f32 %v2844_v63, %v2843_v19  ;;  %v2873_v15 = vsel %vm2392_vm7, %v2872_v16, %v7757_v6  ;;  %v2878_v43 = vrot.slane %v6119_v32, 7  ;;  %v2880_v55 = vrot.slane %v6121_v61, 6  ;;  %v7793_v19 = vld [vmem:[#allocation116_spill] sm:$0xff]  ;;  %vm7798_vm2 = vmmov %vm7794_vm1 }
 0x28e   :  { %v2839_v50 = vrot.slane %v2838_v51, 2  ;;  %v2852_v10 = vadd.f32 %v2851_v12, %v2850_v11  ;;  %v2875_v59 = vsel %vm2395_vm3, %v2874_v48, %v2873_v15  ;;  %v2882_v1 = vrot.slane %v7793_v19, 5 }
 0x28f   :  { %v2846_v35 = vrot.slane %v2845_v7, 2  ;;  %v2877_v3 = vsel %vm2398_vm9, %v2876_v23, %v2875_v59  ;;  %v2879_v5 = vsel %vm2392_vm7, %v2878_v43, %v6117_v21  ;;  %v2887_v32 = vsel %vm6571_vm15, %v2871_v38, 0.0 }
 0x290   :  { %v2840_v24 = vadd.f32 %v2839_v50, %v2838_v51  ;;  %v2853_v63 = vrot.slane %v2852_v10, 2  ;;  %v2881_v6 = vsel %vm2395_vm3, %v2880_v55, %v2879_v5  ;;  %v2888_v61 = vsel %vm6580_vm12, %v2877_v3, 0.0  ;;  %v7801_v50 = vld [vmem:[#allocation62_spill] sm:$0xff] }
 0x291   :  { %v2847_v37 = vadd.f32 %v2846_v35, %v2845_v7  ;;  %v2883_v14 = vsel %vm2398_vm9, %v2882_v1, %v2881_v6  ;;  %v2890_v62 = vsel %vm7794_vm1, %v2887_v32, 0.0  ;;  %v6639_v21 = vadd.f32 %v2695_v31, %v6509_v39  ;;  %v7799_v31 = vld [vmem:[#allocation60_spill] sm:$0xff]  ;;  %v7804_v5 = vld [vmem:[#allocation78_spill] sm:$0xff] }
 0x292   :  { %v2841_v0 = vrot.slane %v2840_v24, 1  ;;  %v2854_v51 = vadd.f32 %v2853_v63, %v2852_v10  ;;  %v2889_v11 = vsel %vm6598_vm10, %v2883_v14, 0.0  ;;  %v2891_v40 = vrot.slane %v2890_v62, 4 }
 0x293   :  { %7795 = vst [vmem:[#allocation33_spill] sm:$0xff] %v6639_v21  ;;  %v6646_v17 = vadd.f32 %v2702_v18, %v6511_v49  ;;  %v2848_v16 = vrot.slane %v2847_v37, 1  ;;  %v2897_v30 = vsel %vm7797_vm4, %v2888_v61, 0.0  ;;  %v2904_v36 = vsel %vm7798_vm2, %v2889_v11, 0.0  ;;  %v7802_v18 = vld [vmem:[#allocation22_spill] sm:$0xff]  ;;  %v7806_v11 = vld [vmem:[#allocation21_spill] sm:$0xff] }
 0x294   :  { %v6650_v48 = vadd.f32 %v2841_v0, %v2840_v24  ;;  %v2892_v7 = vadd.f32 %v2891_v40, %v2890_v62  ;;  %v2898_v39 = vrot.slane %v2897_v30, 4  ;;  %v2911_v12 = vsel %vm2274_vm6, %v7799_v31, -inf  ;;  %v7803_v24 = vld [vmem:[#allocation76_spill] sm:$0xff]  ;;  %v7805_v62 = vld [vmem:[#allocation19_spill] sm:$0xff] }
 0x295   :  { %7796 = vst [vmem:[#allocation3_spill] sm:$0xff] %v6646_v17  ;;  %v2905_v58 = vrot.slane %v2904_v36, 4  ;;  %v2912_v23 = vsel %vm2274_vm6, %v7800_v42, -inf  ;;  %v6658_v49 = vsel %vm2274_vm6, %v7801_v50, -inf  ;;  %v2917_v38 = vsel %vm2274_vm6, %v7802_v18, -inf }
 0x296   :  { %v2855_v15 = vrot.slane %v2854_v51, 1  ;;  %v2893_v43 = vrot.slane %v2892_v7, 2  ;;  %v2899_v35 = vadd.f32 %v2898_v39, %v2897_v30  ;;  %v2913_v10 = vmax.f32 %v6488_v56, %v2912_v23 }
 0x297   :  { %v2906_v59 = vadd.f32 %v2905_v58, %v2904_v36  ;;  %v2915_v55 = vmax.f32 %v2911_v12, %v6658_v49  ;;  %v2918_v3 = vsel %vm2274_vm6, %v7803_v24, -inf  ;;  %v6668_v1 = vsel %vm2274_vm6, %v7804_v5, -inf }
 0x298   :  { %v2894_v63 = vadd.f32 %v2893_v43, %v2892_v7  ;;  %v2900_v6 = vrot.slane %v2899_v35, 2  ;;  %v2919_v32 = vmax.f32 %v6497_v28, %v2918_v3  ;;  %v2921_v0 = vmax.f32 %v2917_v38, %v6668_v1  ;;  %v7807_v28 = vld [vmem:[#allocation109_spill] sm:$0xff] }
 0x299   :  { %v2907_v14 = vrot.slane %v2906_v59, 2  ;;  %v2916_v61 = vmax.f32 %v2913_v10, %v2915_v55  ;;  %v2923_v56 = vsel %vm2274_vm6, %v7805_v62, -inf  ;;  %v2924_v40 = vsel %vm2274_vm6, %v7806_v11, -inf }
 0x29a   :  { %v2895_v30 = vrot.slane %v2894_v63, 1  ;;  %v2901_v36 = vadd.f32 %v2900_v6, %v2899_v35  ;;  %v2922_v39 = vmax.f32 %v2919_v32, %v2921_v0  ;;  %v2925_v12 = vmax.f32 %v6507_v46, %v2924_v40  ;;  %v7809_v46 = vld [vmem:[#allocation12_spill] sm:$0xff] }
 0x29b   :  { %v6677_v58 = vadd.f32 %v2848_v16, %v2847_v37  ;;  %v6679_v7 = vadd.f32 %v2907_v14, %v2906_v59  ;;  %v6683_v23 = vsel %vm2274_vm6, %v7807_v28, -inf  ;;  %v2932_v38 = vrot.slane %v2916_v61, %v6172_v44 }
 0x29c   :  { %v6686_v43 = vadd.f32 %v2855_v15, %v2854_v51  ;;  %v2902_v10 = vrot.slane %v2901_v36, 1  ;;  %v2927_v55 = vmax.f32 %v2923_v56, %v6683_v23  ;;  %v2936_v35 = vrot.slane %v2922_v39, %v6172_v44 }
 0x29d   :  { %v6690_v3 = vadd.f32 %v2895_v30, %v2894_v63  ;;  %vm2941_vm13 = vcmp.eq.f32.partialorder %v7764_v20, %v2932_v38  ;;  %vm2942_vm0 = vcmp.eq.f32.partialorder %v7799_v31, %v2932_v38  ;;  %v3019_v37 = vrot.slane %v7809_v46, 7 }
 0x29e   :  { %v2928_v16 = vmax.f32 %v2925_v12, %v2927_v55  ;;  %vm2943_vm15 = vcmp.eq.f32.partialorder %v7800_v42, %v2932_v38  ;;  %vm2944_vm8 = vcmp.eq.f32.partialorder %v7801_v50, %v2932_v38  ;;  %vm2945_vm12 = vcmp.eq.f32.partialorder %v7767_v26, %v2936_v35 }
 0x29f   :  { %7808 = vst [vmem:[#allocation4_spill] sm:$0xff] %v6690_v3  ;;  %v6698_v51 = vadd.f32 %v2902_v10, %v2901_v36  ;;  %v2909_v15 = vrot.slane %v6679_v7, 1  ;;  %vm2946_vm10 = vcmp.eq.f32.partialorder %v7802_v18, %v2936_v35  ;;  %vm2947_vm14 = vcmp.eq.f32.partialorder %v7803_v24, %v2936_v35 }
 0x2a0   :  { %v2940_v20 = vrot.slane %v2928_v16, %v6172_v44  ;;  %vm2948_vm5 = vcmp.eq.f32.partialorder %v7804_v5, %v2936_v35  ;;  %v2953_v31 = vsel %vm2941_vm13, %v7322_v41, 4  ;;  %v2954_v42 = vsel %vm2942_vm0, %v6176_v45, 4 }
 0x2a1   :  { %7810 = vst [vmem:[#allocation77_spill] sm:$0xff] %v6698_v51  ;;  %v2955_v59 = vsel %vm2943_vm15, %v6180_v22, 4  ;;  %v2956_v26 = vsel %vm2944_vm8, %v7703_v52, 4  ;;  %v2957_v63 = vsel %vm2945_vm12, %v7322_v41, 4  ;;  %v2958_v6 = vsel %vm2946_vm10, %v6176_v45, 4 }
 0x2a2   :  { %vm2949_vm11 = vcmp.eq.f32.partialorder %v7770_v34, %v2940_v20  ;;  %vm2950_vm1 = vcmp.eq.f32.partialorder %v7805_v62, %v2940_v20  ;;  %vm2951_vm4 = vcmp.eq.f32.partialorder %v7806_v11, %v2940_v20  ;;  %vm2952_vm2 = vcmp.eq.f32.partialorder %v7807_v28, %v2940_v20 }
 0x2a3   :  { %v2959_v18 = vsel %vm2947_vm14, %v6180_v22, 4  ;;  %v2960_v24 = vsel %vm2948_vm5, %v7703_v52, 4  ;;  %v2961_v32 = vsel %vm2949_vm11, %v7322_v41, 4  ;;  %v2962_v0 = vsel %vm2950_vm1, %v6176_v45, 4 }
 0x2a4   :  { %v2963_v14 = vsel %vm2951_vm4, %v6180_v22, 4  ;;  %v2964_v61 = vsel %vm2952_vm2, %v7703_v52, 4  ;;  %v2965_v34 = vsel %vm2274_vm6, %v2953_v31, 2147483647  ;;  %v2966_v62 = vsel %vm2274_vm6, %v2954_v42, 2147483647 }
 0x2a5   :  { %v2967_v56 = vsel %vm2274_vm6, %v2955_v59, 2147483647  ;;  %v2970_v11 = vsel %vm2274_vm6, %v2956_v26, 2147483647  ;;  %v2975_v40 = vsel %vm2274_vm6, %v2957_v63, 2147483647  ;;  %v3020_v30 = vsel %vm2392_vm7, %v3019_v37, %v7774_v60 }
 0x2a6   :  { %vm2968_vm13 = vcmp.lt.s32.totalorder %v2965_v34, %v2967_v56  ;;  %vm2971_vm0 = vcmp.lt.s32.totalorder %v2966_v62, %v2970_v11  ;;  %v2976_v36 = vsel %vm2274_vm6, %v2958_v6, 2147483647  ;;  %v2977_v39 = vsel %vm2274_vm6, %v2959_v18, 2147483647  ;;  %v7811_v26 = vld [vmem:[#allocation14_spill] sm:$0xff] }
 0x2a7   :  { %v2969_v12 = vsel %vm2968_vm13, %v2965_v34, %v2967_v56  ;;  %v2972_v38 = vsel %vm2971_vm0, %v2966_v62, %v2970_v11  ;;  %vm2978_vm15 = vcmp.lt.s32.totalorder %v2975_v40, %v2977_v39  ;;  %v2980_v10 = vsel %vm2274_vm6, %v2960_v24, 2147483647  ;;  %v7816_v62 = vld [vmem:[#allocation88_spill] sm:$0xff] }
 0x2a8   :  { %vm2973_vm8 = vcmp.lt.s32.totalorder %v2969_v12, %v2972_v38  ;;  %v2979_v55 = vsel %vm2978_vm15, %v2975_v40, %v2977_v39  ;;  %vm2981_vm12 = vcmp.lt.s32.totalorder %v2976_v36, %v2980_v10  ;;  %v2985_v35 = vsel %vm2274_vm6, %v2961_v32, 2147483647  ;;  %v7814_v32 = vld [vmem:[#allocation15_spill] sm:$0xff]  ;;  %v7819_v39 = vld [vmem:[#allocation89_spill] sm:$0xff] }
 0x2a9   :  { %v2974_v46 = vsel %vm2973_vm8, %v2969_v12, %v2972_v38  ;;  %v2982_v16 = vsel %vm2981_vm12, %v2976_v36, %v2980_v10  ;;  %v2986_v60 = vsel %vm2274_vm6, %v2962_v0, 2147483647  ;;  %v2987_v37 = vsel %vm2274_vm6, %v2963_v14, 2147483647 }
 0x2aa   :  { %vm2983_vm10 = vcmp.lt.s32.totalorder %v2979_v55, %v2982_v16  ;;  %vm2988_vm14 = vcmp.lt.s32.totalorder %v2985_v35, %v2987_v37  ;;  %v2990_v20 = vsel %vm2274_vm6, %v2964_v61, 2147483647  ;;  %v2998_v31 = vrot.slane %v2974_v46, %v6172_v44  ;;  %v7815_v61 = vld [vmem:[#allocation87_spill] sm:$0xff] }
 0x2ab   :  { %v2984_v42 = vsel %vm2983_vm10, %v2979_v55, %v2982_v16  ;;  %v2989_v59 = vsel %vm2988_vm14, %v2985_v35, %v2987_v37  ;;  %vm2991_vm5 = vcmp.lt.s32.totalorder %v2986_v60, %v2990_v20  ;;  %v3021_v63 = vrot.slane %v7811_v26, 6  ;;  %v7821_v35 = vld [vmem:[#allocation42_spill] sm:$0xff] }
 0x2ac   :  { %v2992_v6 = vsel %vm2991_vm5, %v2986_v60, %v2990_v20  ;;  %v3002_v18 = vrot.slane %v2984_v42, %v6172_v44  ;;  %vm6739_vm11 = vcmp.eq.s32.totalorder %v7322_v41, %v2998_v31  ;;  %v3023_v0 = vrot.slane %v7814_v32, 5  ;;  %v7822_v60 = vld [vmem:[#allocation44_spill] sm:$0xff]  ;;  %v7823_v31 = vld [vmem:[#allocation71_spill] sm:$0xff] }
 0x2ad   :  { %vm2993_vm1 = vcmp.lt.s32.totalorder %v2989_v59, %v2992_v6  ;;  %v3022_v14 = vsel %vm2395_vm3, %v3021_v63, %v3020_v30  ;;  %v3025_v34 = vrot.slane %v7815_v61, 7  ;;  %v3027_v56 = vrot.slane %v7816_v62, 6  ;;  %v7820_v30 = vld [vmem:[#allocation40_spill] sm:$0xff] }
 0x2ae   :  { %v2994_v11 = vsel %vm2993_vm1, %v2989_v59, %v2992_v6  ;;  %vm6748_vm4 = vcmp.eq.s32.totalorder %v7322_v41, %v3002_v18  ;;  %v3024_v36 = vsel %vm2398_vm9, %v3023_v0, %v3022_v14  ;;  %v3029_v12 = vrot.slane %v7819_v39, 5  ;;  %v7828_v62 = vld [vmem:[#allocation72_spill] sm:$0xff] }
 0x2af   :  { %v3006_v38 = vrot.slane %v2994_v11, %v6172_v44  ;;  %v3026_v10 = vsel %vm2392_vm7, %v3025_v34, %v7779_v29  ;;  %v3031_v55 = vrot.slane %v7820_v30, 7  ;;  %v3033_v46 = vrot.slane %v7821_v35, 6  ;;  %v7829_v11 = vld [vmem:[#allocation73_spill] sm:$0xff] }
 0x2b0   :  { %v3028_v16 = vsel %vm2395_vm3, %v3027_v56, %v3026_v10  ;;  %v3035_v37 = vrot.slane %v7822_v60, 5  ;;  %v3040_v20 = vsel %vm6739_vm11, %v3024_v36, 0.0  ;;  %v3073_v42 = vrot.slane %v7823_v31, 7  ;;  %v7830_v10 = vld [vmem:[#allocation103_spill] sm:$0xff] }
 0x2b1   :  { %vm6765_vm2 = vcmp.eq.s32.totalorder %v7322_v41, %v3006_v38  ;;  %v3030_v29 = vsel %vm2398_vm9, %v3029_v12, %v3028_v16  ;;  %v3032_v26 = vsel %vm2392_vm7, %v3031_v55, %v5970_v25  ;;  %vm7826_vm13 = vcmask 60416   ;;  %v7833_v16 = vld [vmem:[#allocation105_spill] sm:$0xff] }
 0x2b2   :  { %v3043_v63 = vsel %vm7826_vm13, %v3040_v20, 0.0  ;;  %v3034_v6 = vsel %vm2395_vm3, %v3033_v46, %v3032_v26  ;;  %v3041_v18 = vsel %vm6748_vm4, %v3030_v29, 0.0  ;;  %v3074_v14 = vsel %vm2392_vm7, %v3073_v42, %v7788_v4  ;;  %vm7827_vm0 = vmmov %vm7826_vm13  ;;  %v7832_v4 = vld [vmem:[#allocation104_spill] sm:$0xff] }
 0x2b3   :  { %v3044_v0 = vrot.slane %v3043_v63, 4  ;;  %v3036_v61 = vsel %vm2398_vm9, %v3035_v37, %v3034_v6  ;;  %v3050_v34 = vsel %vm7827_vm0, %v3041_v18, 0.0  ;;  %v3075_v56 = vrot.slane %v7828_v62, 6  ;;  %vm7831_vm15 = vmmov %vm7827_vm0  ;;  %v7835_v18 = vld [vmem:[#allocation118_spill] sm:$0xff] }
 0x2b4   :  { %v3077_v36 = vrot.slane %v7829_v11, 5  ;;  %v3042_v25 = vsel %vm6765_vm2, %v3036_v61, 0.0  ;;  %v3051_v38 = vrot.slane %v3050_v34, 4  ;;  %v3079_v30 = vrot.slane %v7830_v10, 7  ;;  %v7836_v61 = vld [vmem:[#allocation51_spill] sm:$0xff]  ;;  %vm7838_vm8 = vmmov %vm7827_vm0 }
 0x2b5   :  { %v3045_v12 = vadd.f32 %v3044_v0, %v3043_v63  ;;  %v3057_v55 = vsel %vm7831_vm15, %v3042_v25, 0.0  ;;  %v3076_v35 = vsel %vm2395_vm3, %v3075_v56, %v3074_v14  ;;  %v3081_v46 = vrot.slane %v7832_v4, 6  ;;  %v7834_v63 = vld [vmem:[#allocation117_spill] sm:$0xff]  ;;  %vm7841_vm12 = vmmov %vm7827_vm0 }
 0x2b6   :  { %v3083_v37 = vrot.slane %v7833_v16, 5  ;;  %v3052_v31 = vadd.f32 %v3051_v38, %v3050_v34  ;;  %v3058_v42 = vrot.slane %v3057_v55, 4  ;;  %v3078_v29 = vsel %vm2398_vm9, %v3077_v36, %v3076_v35  ;;  %vm7842_vm10 = vmmov %vm7827_vm0 }
 0x2b7   :  { %v3046_v20 = vrot.slane %v3045_v12, 2  ;;  %v3080_v26 = vsel %vm2392_vm7, %v3079_v30, %v7792_v53  ;;  %v3085_v6 = vrot.slane %v7834_v63, 7  ;;  %v3087_v0 = vrot.slane %v7835_v18, 6 }
 0x2b8   :  { %v3089_v62 = vrot.slane %v7836_v61, 5  ;;  %v3053_v14 = vrot.slane %v3052_v31, 2  ;;  %v3059_v56 = vadd.f32 %v3058_v42, %v3057_v55  ;;  %v3082_v10 = vsel %vm2395_vm3, %v3081_v46, %v3080_v26  ;;  %v7840_v42 = vld [vmem:[#allocation63_spill] sm:$0xff] }
 0x2b9   :  { %v3047_v25 = vadd.f32 %v3046_v20, %v3045_v12  ;;  %v6799_v34 = vadd.f32 %v2909_v15, %v6679_v7  ;;  %v3084_v36 = vsel %vm2398_vm9, %v3083_v37, %v3082_v10  ;;  %v3086_v53 = vsel %vm2392_vm7, %v3085_v6, %v7793_v19  ;;  %v7839_v15 = vld [vmem:[#allocation64_spill] sm:$0xff]  ;;  %v7844_v10 = vld [vmem:[#allocation79_spill] sm:$0xff] }
 0x2ba   :  { %v3094_v38 = vsel %vm6739_vm11, %v3078_v29, 0.0  ;;  %v3054_v35 = vadd.f32 %v3053_v14, %v3052_v31  ;;  %v3060_v12 = vrot.slane %v3059_v56, 2  ;;  %v3088_v55 = vsel %vm2395_vm3, %v3087_v0, %v3086_v53 }
 0x2bb   :  { %7837 = vst [vmem:[#allocation2_spill] sm:$0xff] %v6799_v34  ;;  %v3048_v30 = vrot.slane %v3047_v25, 1  ;;  %v3090_v4 = vsel %vm2398_vm9, %v3089_v62, %v3088_v55  ;;  %v3095_v46 = vsel %vm6748_vm4, %v3084_v36, 0.0  ;;  %v3097_v7 = vsel %vm7838_vm8, %v3094_v38, 0.0  ;;  %v7848_v34 = vld [vmem:[#allocation111_spill] sm:$0xff] }
 0x2bc   :  { %v3119_v37 = vsel %vm2274_vm6, %v7839_v15, -inf  ;;  %v3055_v20 = vrot.slane %v3054_v35, 1  ;;  %v3061_v19 = vadd.f32 %v3060_v12, %v3059_v56  ;;  %v3096_v24 = vsel %vm6765_vm2, %v3090_v4, 0.0  ;;  %v7843_v56 = vld [vmem:[#allocation65_spill] sm:$0xff] }
 0x2bd   :  { %v3118_v31 = vsel %vm2274_vm6, %v7840_v42, -inf  ;;  %v6817_v29 = vadd.f32 %v3048_v30, %v3047_v25  ;;  %v3098_v26 = vrot.slane %v3097_v7, 4  ;;  %v3104_v63 = vsel %vm7841_vm12, %v3095_v46, 0.0  ;;  %v7845_v25 = vld [vmem:[#allocation80_spill] sm:$0xff]  ;;  %v7846_v46 = vld [vmem:[#allocation81_spill] sm:$0xff] }
 0x2be   :  { %v3111_v40 = vsel %vm7842_vm10, %v3096_v24, 0.0  ;;  %v6821_v6 = vadd.f32 %v3055_v20, %v3054_v35  ;;  %v3105_v18 = vrot.slane %v3104_v63, 4  ;;  %v3120_v62 = vmax.f32 %v6658_v49, %v3119_v37 }
 0x2bf   :  { %v3112_v0 = vrot.slane %v3111_v40, 4  ;;  %v3099_v14 = vadd.f32 %v3098_v26, %v3097_v7  ;;  %v3121_v59 = vsel %vm2274_vm6, %v7843_v56, -inf  ;;  %v3124_v36 = vsel %vm2274_vm6, %v7844_v10, -inf  ;;  %v7847_v7 = vld [vmem:[#allocation110_spill] sm:$0xff] }
 0x2c0   :  { %v3125_v53 = vsel %vm2274_vm6, %v7845_v25, -inf  ;;  %v3062_v38 = vrot.slane %v3061_v19, 1  ;;  %v3106_v30 = vadd.f32 %v3105_v18, %v3104_v63  ;;  %v3122_v55 = vmax.f32 %v3118_v31, %v3121_v59  ;;  %v7849_v63 = vld [vmem:[#allocation112_spill] sm:$0xff] }
 0x2c1   :  { %v3113_v12 = vadd.f32 %v3112_v0, %v3111_v40  ;;  %v3100_v35 = vrot.slane %v3099_v14, 2  ;;  %v3126_v4 = vmax.f32 %v6668_v1, %v3125_v53  ;;  %v3127_v49 = vsel %vm2274_vm6, %v7846_v46, -inf  ;;  %v7850_v40 = vld [vmem:[#allocation16_spill] sm:$0xff] }
 0x2c2   :  { %v3130_v37 = vsel %vm2274_vm6, %v7847_v7, -inf  ;;  %v3107_v20 = vrot.slane %v3106_v30, 2  ;;  %v3123_v26 = vmax.f32 %v3120_v62, %v3122_v55  ;;  %v3128_v3 = vmax.f32 %v3124_v36, %v3127_v49 }
 0x2c3   :  { %v3114_v24 = vrot.slane %v3113_v12, 2  ;;  %v3101_v54 = vadd.f32 %v3100_v35, %v3099_v14  ;;  %v3131_v51 = vsel %vm2274_vm6, %v7848_v34, -inf  ;;  %v3133_v31 = vsel %vm2274_vm6, %v7849_v63, -inf }
 0x2c4   :  { %v3226_v18 = vrot.slane %v7850_v40, 7  ;;  %v3108_v1 = vadd.f32 %v3107_v20, %v3106_v30  ;;  %v3129_v59 = vmax.f32 %v3126_v4, %v3128_v3  ;;  %v3132_v53 = vmax.f32 %v6683_v23, %v3131_v51  ;;  %v7851_v3 = vld [vmem:[#allocation17_spill] sm:$0xff] }
 0x2c5   :  { %v3115_v0 = vadd.f32 %v3114_v24, %v3113_v12  ;;  %v6841_v17 = vadd.f32 %v3062_v38, %v3061_v19  ;;  %v3102_v21 = vrot.slane %v3101_v54, 1  ;;  %v3134_v9 = vmax.f32 %v3130_v37, %v3133_v31 }
 0x2c6   :  { %v3139_v62 = vrot.slane %v3123_v26, %v6172_v44  ;;  %v3109_v14 = vrot.slane %v3108_v1, 1  ;;  %v3143_v55 = vrot.slane %v3129_v59, %v6172_v44  ;;  %v3227_v35 = vsel %vm2392_vm7, %v3226_v18, %v7814_v32 }
 0x2c7   :  { %v3116_v36 = vrot.slane %v3115_v0, 1  ;;  %v3135_v49 = vmax.f32 %v3132_v53, %v3134_v9  ;;  %v3228_v23 = vrot.slane %v7851_v3, 6  ;;  %v6850_v51 = vadd.f32 %v3102_v21, %v3101_v54  ;;  %v7855_v3 = vld [vmem:[#allocation90_spill] sm:$0xff] }
 0x2c8   :  { %vm3148_vm14 = vcmp.eq.f32.partialorder %v7801_v50, %v3139_v62  ;;  %vm3149_vm5 = vcmp.eq.f32.partialorder %v7840_v42, %v3139_v62  ;;  %v6852_v19 = vadd.f32 %v3109_v14, %v3108_v1  ;;  %vm3150_vm11 = vcmp.eq.f32.partialorder %v7839_v15, %v3139_v62  ;;  %v7852_v14 = vld [vmem:[#allocation18_spill] sm:$0xff] }
 0x2c9   :  { %v6854_v38 = vadd.f32 %v3116_v36, %v3115_v0  ;;  %v3147_v30 = vrot.slane %v3135_v49, %v6172_v44  ;;  %vm3151_vm1 = vcmp.eq.f32.partialorder %v7843_v56, %v3139_v62  ;;  %vm3152_vm4 = vcmp.eq.f32.partialorder %v7804_v5, %v3143_v55 }
 0x2ca   :  { %vm3153_vm2 = vcmp.eq.f32.partialorder %v7844_v10, %v3143_v55  ;;  %vm3154_vm13 = vcmp.eq.f32.partialorder %v7845_v25, %v3143_v55  ;;  %vm3155_vm0 = vcmp.eq.f32.partialorder %v7846_v46, %v3143_v55  ;;  %v3160_v9 = vsel %vm3148_vm14, %v7322_v41, 4 }
 0x2cb   :  { %v3161_v54 = vsel %vm3149_vm5, %v6176_v45, 4  ;;  %vm3156_vm15 = vcmp.eq.f32.partialorder %v7807_v28, %v3147_v30  ;;  %vm3157_vm8 = vcmp.eq.f32.partialorder %v7847_v7, %v3147_v30  ;;  %vm3158_vm12 = vcmp.eq.f32.partialorder %v7848_v34, %v3147_v30 }
 0x2cc   :  { %vm3159_vm10 = vcmp.eq.f32.partialorder %v7849_v63, %v3147_v30  ;;  %v3162_v21 = vsel %vm3150_vm11, %v6180_v22, 4  ;;  %v3163_v50 = vsel %vm3151_vm1, %v7703_v52, 4  ;;  %v3164_v5 = vsel %vm3152_vm4, %v7322_v41, 4 }
 0x2cd   :  { %v3165_v32 = vsel %vm3153_vm2, %v6176_v45, 4  ;;  %v3166_v15 = vsel %vm3154_vm13, %v6180_v22, 4  ;;  %v3167_v42 = vsel %vm3155_vm0, %v7703_v52, 4  ;;  %v3168_v28 = vsel %vm3156_vm15, %v7322_v41, 4 }
 0x2ce   :  { %v3169_v56 = vsel %vm3157_vm8, %v6176_v45, 4  ;;  %v3170_v34 = vsel %vm3158_vm12, %v6180_v22, 4  ;;  %v3171_v10 = vsel %vm3159_vm10, %v7703_v52, 4  ;;  %v3172_v25 = vsel %vm2274_vm6, %v3160_v9, 2147483647  ;;  %v7856_v9 = vld [vmem:[#allocation91_spill] sm:$0xff] }
 0x2cf   :  { %v3173_v12 = vsel %vm2274_vm6, %v3161_v54, 2147483647  ;;  %v3174_v4 = vsel %vm2274_vm6, %v3162_v21, 2147483647  ;;  %v3177_v46 = vsel %vm2274_vm6, %v3163_v50, 2147483647  ;;  %v3229_v37 = vsel %vm2395_vm3, %v3228_v23, %v3227_v35 }
 0x2d0   :  { %v3182_v7 = vsel %vm2274_vm6, %v3164_v5, 2147483647  ;;  %vm3175_vm14 = vcmp.lt.s32.totalorder %v3172_v25, %v3174_v4  ;;  %vm3178_vm5 = vcmp.lt.s32.totalorder %v3173_v12, %v3177_v46  ;;  %v3183_v45 = vsel %vm2274_vm6, %v3165_v32, 2147483647  ;;  %v7857_v21 = vld [vmem:[#allocation92_spill] sm:$0xff] }
 0x2d1   :  { %v3184_v22 = vsel %vm2274_vm6, %v3166_v15, 2147483647  ;;  %v3176_v20 = vsel %vm3175_vm14, %v3172_v25, %v3174_v4  ;;  %v3179_v52 = vsel %vm3178_vm5, %v3173_v12, %v3177_v46  ;;  %v3187_v24 = vsel %vm2274_vm6, %v3167_v42, 2147483647  ;;  %v7860_v42 = vld [vmem:[#allocation113_spill] sm:$0xff]  ;;  %v7862_v12 = vld [vmem:[#allocation115_spill] sm:$0xff] }
 0x2d2   :  { %vm3185_vm11 = vcmp.lt.s32.totalorder %v3182_v7, %v3184_v22  ;;  %vm3180_vm1 = vcmp.lt.s32.totalorder %v3176_v20, %v3179_v52  ;;  %vm3188_vm4 = vcmp.lt.s32.totalorder %v3183_v45, %v3187_v24  ;;  %v3192_v63 = vsel %vm2274_vm6, %v3168_v28, 2147483647 }
 0x2d3   :  { %v3186_v26 = vsel %vm3185_vm11, %v3182_v7, %v3184_v22  ;;  %v3181_v31 = vsel %vm3180_vm1, %v3176_v20, %v3179_v52  ;;  %v3189_v40 = vsel %vm3188_vm4, %v3183_v45, %v3187_v24  ;;  %v3193_v18 = vsel %vm2274_vm6, %v3169_v56, 2147483647  ;;  %v7863_v45 = vld [vmem:[#allocation74_spill] sm:$0xff] }
 0x2d4   :  { %v3194_v1 = vsel %vm2274_vm6, %v3170_v34, 2147483647  ;;  %vm3190_vm2 = vcmp.lt.s32.totalorder %v3186_v26, %v3189_v40  ;;  %v3197_v0 = vsel %vm2274_vm6, %v3171_v10, 2147483647  ;;  %v3205_v59 = vrot.slane %v3181_v31, %v6172_v44  ;;  %v7861_v10 = vld [vmem:[#allocation114_spill] sm:$0xff] }
 0x2d5   :  { %vm3195_vm13 = vcmp.lt.s32.totalorder %v3192_v63, %v3194_v1  ;;  %v3191_v53 = vsel %vm3190_vm2, %v3186_v26, %v3189_v40  ;;  %vm3198_vm0 = vcmp.lt.s32.totalorder %v3193_v18, %v3197_v0  ;;  %v3230_v36 = vrot.slane %v7852_v14, 5  ;;  %v7868_v40 = vld [vmem:[#allocation28_spill] sm:$0xff] }
 0x2d6   :  { %v3196_v62 = vsel %vm3195_vm13, %v3192_v63, %v3194_v1  ;;  %v3199_v55 = vsel %vm3198_vm0, %v3193_v18, %v3197_v0  ;;  %v3209_v35 = vrot.slane %v3191_v53, %v6172_v44  ;;  %vm6896_vm15 = vcmp.eq.s32.totalorder %v7322_v41, %v3205_v59  ;;  %v7869_v1 = vld [vmem:[#allocation29_spill] sm:$0xff] }
 0x2d7   :  { %v3232_v23 = vrot.slane %v7855_v3, 7  ;;  %vm3200_vm8 = vcmp.lt.s32.totalorder %v3196_v62, %v3199_v55  ;;  %v3231_v30 = vsel %vm2398_vm9, %v3230_v36, %v3229_v37  ;;  %v3234_v54 = vrot.slane %v7856_v9, 6  ;;  %v7872_v36 = vld [vmem:[#allocation107_spill] sm:$0xff] }
 0x2d8   :  { %v3236_v50 = vrot.slane %v7857_v21, 5  ;;  %v3201_v5 = vsel %vm3200_vm8, %v3196_v62, %v3199_v55  ;;  %vm6905_vm6 = vcmp.eq.s32.totalorder %v7322_v41, %v3209_v35  ;;  %v3238_v28 = vrot.slane %v7860_v42, 7  ;;  %v7871_v62 = vld [vmem:[#allocation106_spill] sm:$0xff] }
 0x2d9   :  { %v3233_v15 = vsel %vm2392_vm7, %v3232_v23, %v7819_v39  ;;  %v3213_v56 = vrot.slane %v3201_v5, %v6172_v44  ;;  %v3240_v25 = vrot.slane %v7861_v10, 6  ;;  %v3242_v4 = vrot.slane %v7862_v12, 5 }
 0x2da   :  { %v3235_v34 = vsel %vm2395_vm3, %v3234_v54, %v3233_v15  ;;  %v3239_v7 = vsel %vm2392_vm7, %v3238_v28, %v7822_v60  ;;  %v3247_v37 = vsel %vm6896_vm15, %v3231_v30, 0.0  ;;  %v3280_v39 = vrot.slane %v7863_v45, 7 }
 0x2db   :  { %v3237_v46 = vsel %vm2398_vm9, %v3236_v50, %v3235_v34  ;;  %vm6923_vm12 = vcmp.eq.s32.totalorder %v7322_v41, %v3213_v56  ;;  %v3241_v44 = vsel %vm2395_vm3, %v3240_v25, %v3239_v7  ;;  %vm7866_vm10 = vcmask 60416   ;;  %v7874_v50 = vld [vmem:[#allocation52_spill] sm:$0xff]  ;;  %v7875_v56 = vld [vmem:[#allocation53_spill] sm:$0xff] }
 0x2dc   :  { %v3248_v20 = vsel %vm6905_vm6, %v3237_v46, 0.0  ;;  %v3250_v52 = vsel %vm7866_vm10, %v3247_v37, 0.0  ;;  %v3243_v24 = vsel %vm2398_vm9, %v3242_v4, %v3241_v44  ;;  %vm7867_vm14 = vmmov %vm7866_vm10  ;;  %v3281_v63 = vsel %vm2392_vm7, %v3280_v39, %v7829_v11  ;;  %v7873_v11 = vld [vmem:[#allocation108_spill] sm:$0xff]  ;;  %v7876_v4 = vld [vmem:[#allocation54_spill] sm:$0xff] }
 0x2dd   :  { %v3251_v60 = vrot.slane %v3250_v52, 4  ;;  %v3257_v26 = vsel %vm7867_vm14, %v3248_v20, 0.0  ;;  %v3249_v41 = vsel %vm6923_vm12, %v3243_v24, 0.0  ;;  %v3282_v18 = vrot.slane %v7868_v40, 6  ;;  %vm7870_vm5 = vmmov %vm7866_vm10 }
 0x2de   :  { %v3258_v31 = vrot.slane %v3257_v26, 4  ;;  %v3284_v0 = vrot.slane %v7869_v1, 5  ;;  %v3264_v53 = vsel %vm7870_vm5, %v3249_v41, 0.0  ;;  %v3286_v14 = vrot.slane %v7871_v62, 7  ;;  %vm7877_vm11 = vmmov %vm7870_vm5 }
 0x2df   :  { %v3252_v59 = vadd.f32 %v3251_v60, %v3250_v52  ;;  %v3288_v55 = vrot.slane %v7872_v36, 6  ;;  %v3265_v3 = vrot.slane %v3264_v53, 4  ;;  %v3283_v23 = vsel %vm2395_vm3, %v3282_v18, %v3281_v63  ;;  %vm7878_vm1 = vmmov %vm7870_vm5 }
 0x2e0   :  { %v3259_v35 = vadd.f32 %v3258_v31, %v3257_v26  ;;  %v3290_v30 = vrot.slane %v7873_v11, 5  ;;  %v3285_v54 = vsel %vm2398_vm9, %v3284_v0, %v3283_v23  ;;  %v3287_v21 = vsel %vm2392_vm7, %v3286_v14, %v7833_v16  ;;  %vm7879_vm4 = vmmov %vm7878_vm1 }
 0x2e1   :  { %v3253_v9 = vrot.slane %v3252_v59, 2  ;;  %v3292_v5 = vrot.slane %v7874_v50, 7  ;;  %v3266_v42 = vadd.f32 %v3265_v3, %v3264_v53  ;;  %v3289_v28 = vsel %vm2395_vm3, %v3288_v55, %v3287_v21 }
 0x2e2   :  { %v3260_v15 = vrot.slane %v3259_v35, 2  ;;  %v3294_v34 = vrot.slane %v7875_v56, 6  ;;  %v3291_v25 = vsel %vm2398_vm9, %v3290_v30, %v3289_v28  ;;  %v3296_v46 = vrot.slane %v7876_v4, 5 }
 0x2e3   :  { %v3254_v10 = vadd.f32 %v3253_v9, %v3252_v59  ;;  %v3293_v12 = vsel %vm2392_vm7, %v3292_v5, %v7836_v61  ;;  %v3267_v37 = vrot.slane %v3266_v42, 2  ;;  %v3301_v45 = vsel %vm6896_vm15, %v3285_v54, 0.0  ;;  %v7880_v59 = vld [vmem:[#allocation30_spill] sm:$0xff] }
 0x2e4   :  { %v3261_v7 = vadd.f32 %v3260_v15, %v3259_v35  ;;  %v3295_v16 = vsel %vm2395_vm3, %v3294_v34, %v3293_v12  ;;  %v3302_v20 = vsel %vm6905_vm6, %v3291_v25, 0.0  ;;  %v3304_v52 = vsel %vm7877_vm11, %v3301_v45, 0.0  ;;  %v7885_v12 = vld [vmem:[#allocation31_spill] sm:$0xff]  ;;  %v7889_v45 = vld [vmem:[#allocation77_spill] sm:$0xff] }
 0x2e5   :  { %v3255_v39 = vrot.slane %v3254_v10, 1  ;;  %v3297_v44 = vsel %vm2398_vm9, %v3296_v46, %v3295_v16  ;;  %v3268_v60 = vadd.f32 %v3267_v37, %v3266_v42  ;;  %v3305_v26 = vrot.slane %v3304_v52, 4  ;;  %v7887_v46 = vld [vmem:[#allocation33_spill] sm:$0xff]  ;;  %v7888_v37 = vld [vmem:[#allocation3_spill] sm:$0xff] }
 0x2e6   :  { %v3262_v24 = vrot.slane %v3261_v7, 1  ;;  %v3303_v61 = vsel %vm6923_vm12, %v3297_v44, 0.0  ;;  %v3311_v41 = vsel %vm7878_vm1, %v3302_v20, 0.0  ;;  %v3340_v31 = vrot.slane %v6344_v57, 7 }
 0x2e7   :  { %v3256_v63 = vadd.f32 %v3255_v39, %v3254_v10  ;;  %v3318_v49 = vsel %vm7879_vm4, %v3303_v61, 0.0  ;;  %v3269_v18 = vrot.slane %v3268_v60, 1  ;;  %v3306_v1 = vadd.f32 %v3305_v26, %v3304_v52  ;;  %v7890_v52 = vld [vmem:[#allocation2_spill] sm:$0xff]  ;;  %v7892_v26 = vld [vmem:[#allocation4_spill] sm:$0xff] }
 0x2e8   :  { %v3263_v40 = vadd.f32 %v3262_v24, %v3261_v7  ;;  %v3312_v32 = vrot.slane %v3311_v41, 4  ;;  %v3319_v0 = vrot.slane %v3318_v49, 4  ;;  %v3341_v53 = vsel %vm2392_vm7, %v3340_v31, %v7880_v59 }
 0x2e9   :  { %v3342_v62 = vrot.slane %v6346_v13, 6  ;;  %v3344_v22 = vrot.slane %v6515_v33, 7  ;;  %v3270_v14 = vadd.f32 %v3269_v18, %v3268_v60  ;;  %v3307_v36 = vrot.slane %v3306_v1, 2  ;;  %v7891_v60 = vld [vmem:[#allocation32_spill] sm:$0xff] }
 0x2ea   :  { %v3313_v55 = vadd.f32 %v3312_v32, %v3311_v41  ;;  %v3346_v35 = vrot.slane %v6518_v2, 6  ;;  %v3320_v3 = vadd.f32 %v3319_v0, %v3318_v49  ;;  %v3348_v11 = vrot.slane %v6677_v58, 7 }
 0x2eb   :  { %v3343_v57 = vsel %vm2395_vm3, %v3342_v62, %v3341_v53  ;;  %v3345_v23 = vsel %vm2392_vm7, %v3344_v22, %v6483_v27  ;;  %v3308_v30 = vadd.f32 %v3307_v36, %v3306_v1  ;;  %v3350_v13 = vrot.slane %v6686_v43, 6 }
 0x2ec   :  { %v3314_v9 = vrot.slane %v3313_v55, 2  ;;  %v3347_v54 = vsel %vm2395_vm3, %v3346_v35, %v3345_v23  ;;  %vm7881_vm9 = vcmask 59392   ;;  %v3321_v33 = vrot.slane %v3320_v3, 2 }
 0x2ed   :  { %3365 = vst.msk [vmem:[%s7050_s1] sm:$0x7] %vm7881_vm9, %v3343_v57  ;;  %v3349_v2 = vsel %vm2392_vm7, %v3348_v11, %v6650_v48  ;;  %v3352_v21 = vrot.slane %v6821_v6, 7  ;;  %v3354_v27 = vrot.slane %v6841_v17, 6  ;;  %vm7882_vm2 = vmmov %vm7881_vm9  ;;  %v3309_v58 = vrot.slane %v3308_v30, 1 }
 0x2ee   :  { %3366 = vst.msk [vmem:[%s7050_s1 + $0x4] sm:$0x7] %vm7882_vm2, %v3347_v54  ;;  %v3315_v43 = vadd.f32 %v3314_v9, %v3313_v55  ;;  %v3351_v50 = vsel %vm2395_vm3, %v3350_v13, %v3349_v2  ;;  %v3356_v5 = vrot.slane %v3263_v40, 7  ;;  %v3322_v15 = vadd.f32 %v3321_v33, %v3320_v3  ;;  %vm7883_vm13 = vmmov %vm7882_vm2 }
 0x2ef   :  { %v3353_v42 = vsel %vm2392_vm7, %v3352_v21, %v6817_v29  ;;  %v3358_v28 = vrot.slane %v3270_v14, 6  ;;  %3367 = vst.msk [vmem:[%s7050_s1 + $0x8] sm:$0x7] %vm7883_vm13, %v3351_v50  ;;  %v3385_v17 = vrot.slane %v6464_v8, 7  ;;  %v3310_v48 = vadd.f32 %v3309_v58, %v3308_v30  ;;  %vm7884_vm0 = vmmov %vm7882_vm2 }
 0x2f0   :  { %v3316_v6 = vrot.slane %v3315_v43, 1  ;;  %v3355_v56 = vsel %vm2395_vm3, %v3354_v27, %v3353_v42  ;;  %v3357_v34 = vsel %vm2392_vm7, %v3356_v5, %v3256_v63  ;;  %v3323_v10 = vrot.slane %v3322_v15, 1  ;;  %vm7886_vm15 = vmmov %vm7884_vm0 }
 0x2f1   :  { %v3359_v25 = vsel %vm2395_vm3, %v3358_v28, %v3357_v34  ;;  %3368 = vst.msk [vmem:[%s7050_s1 + $0xc] sm:$0x7] %vm7884_vm0, %v3355_v56  ;;  %v3386_v29 = vsel %vm2392_vm7, %v3385_v17, %v6349_v47  ;;  %v3387_v4 = vrot.slane %v7885_v12, 6  ;;  %v3389_v7 = vrot.slane %v7887_v46, 7  ;;  %vm7893_vm8 = vmmov %vm7884_vm0 }
 0x2f2   :  { %v3317_v8 = vadd.f32 %v3316_v6, %v3315_v43  ;;  %3369 = vst.msk [vmem:[%s7050_s1 + $0x10] sm:$0x7] %vm7886_vm15, %v3359_v25  ;;  %v3391_v16 = vrot.slane %v7888_v37, 6  ;;  %v3393_v39 = vrot.slane %v7889_v45, 7  ;;  %v3324_v44 = vadd.f32 %v3323_v10, %v3322_v15  ;;  %vm7894_vm6 = vmmov %vm7884_vm0 }
 0x2f3   :  { %v3388_v20 = vsel %vm2395_vm3, %v3387_v4, %v3386_v29  ;;  %v3395_v24 = vrot.slane %v7890_v52, 6  ;;  %v3397_v47 = vrot.slane %v6852_v19, 7  ;;  %v3390_v61 = vsel %vm2392_vm7, %v3389_v7, %v7891_v60  ;;  %vm7895_vm12 = vmmov %vm7884_vm0 }
 0x2f4   :  { %v3394_v63 = vsel %vm2392_vm7, %v3393_v39, %v7892_v26  ;;  %v3399_v41 = vrot.slane %v6854_v38, 6  ;;  %v3401_v49 = vrot.slane %v3317_v8, 7  ;;  %3452 = vst.msk [vmem:[%s7050_s1 + $0x14] sm:$0x7] %vm7893_vm8, %v3388_v20  ;;  %v3392_v31 = vsel %vm2395_vm3, %v3391_v16, %v3390_v61  ;;  %vm7896_vm10 = vmmov %vm7884_vm0 }
 0x2f5   :  { %v3396_v40 = vsel %vm2395_vm3, %v3395_v24, %v3394_v63  ;;  %v3398_v19 = vsel %vm2392_vm7, %v3397_v47, %v6850_v51  ;;  %v3403_v18 = vrot.slane %v3324_v44, 6  ;;  %3453 = vst.msk [vmem:[%s7050_s1 + $0x18] sm:$0x7] %vm7894_vm6, %v3392_v31  ;;  %vm7897_vm14 = vmmov %vm7884_vm0 }
 0x2f6   :  { %v3400_v1 = vsel %vm2395_vm3, %v3399_v41, %v3398_v19  ;;  %v3402_v32 = vsel %vm2392_vm7, %v3401_v49, %v3310_v48  ;;  %3454 = vst.msk [vmem:[%s7050_s1 + $0x1c] sm:$0x7] %vm7895_vm12, %v3396_v40 }
 0x2f7   :  { %v3404_v38 = vsel %vm2395_vm3, %v3403_v18, %v3402_v32  ;;  %3455 = vst.msk [vmem:[%s7050_s1 + $0x20] sm:$0x7] %vm7896_vm10, %v3400_v1 }
 0x2f8   :  { %3456 = vst.msk [vmem:[%s7050_s1 + $0x24] sm:$0x7] %vm7897_vm14, %v3404_v38 }

</bundles_post_ra>
